<compile_context>
chip_gen: v7x
topology: tpu7x:2x2x1
jax: 0.10.0
libtpu: 0.0.40
codegen_flags: <defaults>
</compile_context>

<pallas_src>
import jax
import jax.numpy as jnp
from jax import lax
from jax.experimental import pallas as pl
from jax.experimental.pallas import tpu as pltpu

IN_FEATURES = 64 * 64 * 3   # 12288
OUT_FEATURES = 6


def _round_up(x, m):
    return ((x + m - 1) // m) * m


def _select_tiling():
    """Pick (max batch tile, scoped VMEM limit) from the chip's physical VMEM."""
    try:
        vmem_cap = pltpu.get_tpu_info().vmem_capacity_bytes
    except Exception:
        vmem_cap = 64 << 20          # conservative: assume smallest (v7x-sized) VMEM
    if vmem_cap >= (100 << 20):      # v5e / v6e: 128 MiB physical VMEM
        # 512 * 12288 * 4 B = 24 MiB per x buffer, ~49 MiB double-buffered.
        return 512, 64 << 20
    # v7x: 64 MiB physical. 384 rows -> 18 MiB/buffer, ~37 MiB double-buffered.
    return 384, 48 << 20


def _linear_kernel(x_ref, w_ref, b_ref, o_ref):
    """One grid step: (tm, 12288) @ (6, 12288)^T + bias -> (tm, 6)."""
    o_ref[...] = (
        lax.dot_general(
            x_ref[...],
            w_ref[...],
            dimension_numbers=(((1,), (1,)), ((), ())),   # contract feature dims: x @ W.T
            preferred_element_type=jnp.float32,
            precision=lax.Precision.HIGHEST,              # f32 parity with torch; hidden under DMA
        )
        + b_ref[...]
    ).astype(o_ref.dtype)


def linear_classifier_forward(x_nchw, w, b):
    """x_nchw: (B, 3, 64, 64) f32; w: (6, 12288) torch layout; b: (1, 6) -> (B, 6)."""
    batch = x_nchw.shape[0]
    x2d = x_nchw.reshape(batch, -1)          # glue: same as torch x.view(B, -1)
    assert x2d.shape[1] == IN_FEATURES
    assert w.shape == (OUT_FEATURES, IN_FEATURES)
    assert b.shape == (1, OUT_FEATURES)

    max_tm, vmem_limit = _select_tiling()

    if batch <= 8:
        # Single tiny block equal to the full batch dim (satisfies the (8,128) rule).
        tm = batch
    elif batch < 2 * max_tm:
        # Guarantee >= 2 grid steps so both v7x TensorCores get work.
        tm = min(_round_up(pl.cdiv(batch, 2), 8), max_tm)
    else:
        tm = max_tm
    grid = (pl.cdiv(batch, tm),)             # padded edge block is safe: rows independent

    cost = pl.CostEstimate(
        flops=2 * batch * IN_FEATURES * OUT_FEATURES,
        transcendentals=0,
        bytes_accessed=(batch * IN_FEATURES            # x
                        + OUT_FEATURES * IN_FEATURES   # w
                        + OUT_FEATURES                 # b
                        + batch * OUT_FEATURES) * 4,   # out
    )

    return pl.pallas_call(
        _linear_kernel,
        out_shape=jax.ShapeDtypeStruct((batch, OUT_FEATURES), x2d.dtype),
        grid_spec=pltpu.PrefetchScalarGridSpec(
            num_scalar_prefetch=0,
            grid=grid,
            in_specs=[
                # x tile: (tm, 12288) — batch-tiled, full feature axis.
                pl.BlockSpec((tm, IN_FEATURES), lambda m: (m, 0)),
                # weight: whole (6, 12288), lane-dense torch layout, resident every step.
                pl.BlockSpec((OUT_FEATURES, IN_FEATURES), lambda m: (0, 0)),
                # bias: whole (1, 6), resident every step.
                pl.BlockSpec((1, OUT_FEATURES), lambda m: (0, 0)),
            ],
            out_specs=pl.BlockSpec((tm, OUT_FEATURES), lambda m: (m, 0)),
        ),
        compiler_params=pltpu.CompilerParams(
            dimension_semantics=("parallel",),   # batch tiles are independent
            vmem_limit_bytes=vmem_limit,         # v5e default (16 MiB) is too small
        ),
        cost_estimate=cost,
    )(x2d, w, b)


def init_params(key):
    """Deterministic init mirroring torch.nn.Linear defaults (uniform ±1/sqrt(fan_in))."""
    kw, kb = jax.random.split(key)
    bound = 1.0 / jnp.sqrt(jnp.float32(IN_FEATURES))
    # torch-native (out, in) layout; the kernel contracts against dim 1.
    w = jax.random.uniform(
        kw, (OUT_FEATURES, IN_FEATURES), jnp.float32, -bound, bound
    )
    b = jax.random.uniform(kb, (1, OUT_FEATURES), jnp.float32, -bound, bound)
    return w, b


if __name__ == "__main__":
    key = jax.random.PRNGKey(0)
    k_x, k_p = jax.random.split(key)

    # Input matching the module's expected flattened size: (B=2, C=3, H=64, W=64)
    x = jax.random.normal(k_x, (2, 3, 64, 64), jnp.float32)
    w, b = init_params(k_p)

    out = linear_classifier_forward(x, w, b)
    out = jax.block_until_ready(out)

    # Sanity check against plain-JAX reference (torch: x.view(B,-1) @ W.T + b).
    ref = x.reshape(x.shape[0], -1) @ w.T + b
    assert out.shape == (2, 6)
    assert jnp.allclose(out, ref, atol=1e-4, rtol=1e-4)

    print("KERNEL_OK")
</pallas_src>

<mosaic_0001>
module attributes {stable_mosaic.version = 11 : i64} {
  func.func @_linear_kernel(%arg0: i32, %arg1: memref<2x12288xf32, #tpu.memory_space<vmem>>, %arg2: memref<6x12288xf32, #tpu.memory_space<vmem>>, %arg3: memref<1x6xf32, #tpu.memory_space<vmem>>, %arg4: memref<2x6xf32, #tpu.memory_space<vmem>>) attributes {dimension_semantics = [#tpu.dimension_semantics<parallel>], iteration_bounds = array<i64: 1>, scalar_prefetch = 0 : i64, scratch_operands = 0 : i64, tpu.core_type = #tpu.core_type<tc>, window_params = [{transform_indices = @transform_0, window_bounds = array<i64: 2, 12288>}, {pipeline_mode = #tpu.pipeline_mode<synchronous>, transform_indices = @transform_1, window_bounds = array<i64: 6, 12288>}, {pipeline_mode = #tpu.pipeline_mode<synchronous>, transform_indices = @transform_2, window_bounds = array<i64: 1, 6>}, {transform_indices = @transform_3, window_bounds = array<i64: 2, 6>}]} {
    %c0 = arith.constant 0 : index
    %c0_0 = arith.constant 0 : index
    %0 = vector.load %arg1[%c0, %c0_0] : memref<2x12288xf32, #tpu.memory_space<vmem>>, vector<2x12288xf32>
    %c0_1 = arith.constant 0 : index
    %c0_2 = arith.constant 0 : index
    %1 = vector.load %arg2[%c0_1, %c0_2] : memref<6x12288xf32, #tpu.memory_space<vmem>>, vector<6x12288xf32>
    %cst = arith.constant dense<0.000000e+00> : vector<2x6xf32>
    %2 = tpu.matmul %0, %1, %cst {dimension_numbers = #tpu.dot_dimension_numbers<[1], [1], [0], [0], [0, 0, 1, 0], [], []>, precision = #tpu.contract_precision<fp32>} : vector<2x12288xf32>, vector<6x12288xf32>, vector<2x6xf32> -> vector<2x6xf32>
    %c0_3 = arith.constant 0 : index
    %c0_4 = arith.constant 0 : index
    %3 = vector.load %arg3[%c0_3, %c0_4] : memref<1x6xf32, #tpu.memory_space<vmem>>, vector<1x6xf32>
    %4 = vector.broadcast %3 : vector<1x6xf32> to vector<2x6xf32>
    %5 = arith.addf %2, %4 : vector<2x6xf32>
    %c0_5 = arith.constant 0 : index
    %c0_6 = arith.constant 0 : index
    %6 = vector.load %arg4[%c0_5, %c0_6] : memref<2x6xf32, #tpu.memory_space<vmem>>, vector<2x6xf32>
    tpu.vector_store %arg4[%c0_5, %c0_6], %5 {strides = array<i32>} : memref<2x6xf32, #tpu.memory_space<vmem>>, vector<2x6xf32>,
    return
  }
  func.func @transform_0(%arg0: i32) -> (i32, i32) {
    %c0_i32 = arith.constant 0 : i32
    %c0_i32_0 = arith.constant 0 : i32
    return %arg0, %c0_i32 : i32, i32
  }
  func.func @transform_1(%arg0: i32) -> (i32, i32) {
    %c0_i32 = arith.constant 0 : i32
    %c0_i32_0 = arith.constant 0 : i32
    %c0_i32_1 = arith.constant 0 : i32
    return %c0_i32, %c0_i32_0 : i32, i32
  }
  func.func @transform_2(%arg0: i32) -> (i32, i32) {
    %c0_i32 = arith.constant 0 : i32
    %c0_i32_0 = arith.constant 0 : i32
    %c0_i32_1 = arith.constant 0 : i32
    return %c0_i32, %c0_i32_0 : i32, i32
  }
  func.func @transform_3(%arg0: i32) -> (i32, i32) {
    %c0_i32 = arith.constant 0 : i32
    %c0_i32_0 = arith.constant 0 : i32
    return %arg0, %c0_i32 : i32, i32
  }
}

</mosaic_0001>

<bundles_post_ra>
// kernel: tpu_custom_call.1
= control target key start
LH: loop header
LB: loop body
LE: loop exit
PB: predicated region body
PF: predicated region fallthrough
CT: control target
= control target key end

     0   :  { %8 = vsyncpa [#allocation3], 0  ;;  %s26735_s0 = inlined_call_operand.hbm [shape: f32[2,12288], index: 0, kind: input, shape index: {}]   ;;  %s26736_s1 = inlined_call_operand.hbm [shape: f32[6,12288], index: 1, kind: input, shape index: {}]   ;;  %s26737_s2 = inlined_call_operand.vmem [shape: f32[1,6], index: 2, kind: input, shape index: {}]   ;;  %s26738_s3 = inlined_call_operand.hbm [shape: f32[2,6], index: 3, kind: output, shape index: {}]  }
   0x1   :  { %9 = vsyncpa [#allocation6], 0 }
   0x2   :  { %10 = vsyncpa [#allocation4], 0  ;;  %s24043_s12 = smov [#allocation2]   ;;  %s24044_s14 = smov [#allocation5]  }
   0x3   :  { %s17_s13 = sshll.u32 %s24043_s12, 4  ;;  %s27_s15 = sshll.u32 %s24044_s14, 4  ;;  %s18_s13 = int_to_ptr.vmem [resolvable:$true] %s17_s13  ;;  %s28_s15 = int_to_ptr.vmem [resolvable:$true] %s27_s15 }
   0x4   :  { %s23971_s18 = scalar_lea.hbm %s26735_s0, 3072 }
   0x5   :  { %p23972_p0 = scmp.ne.s32.totalorder %s26735_s0, %s23971_s18  ;;  %p23975_p1 = scmp.lt.u32.totalorder %s23971_s18, %s26735_s0 }
   0x7   :  { %p23977_p2 = pnand %p23975_p1, %p23972_p0 }
   0x9   :  { %23980 = shalt.err (!%p23977_p2)
}
   0xa   :  { %s23981_s23 = scalar_lea.vmem %s18_s13, 3072  ;;  %p23986_p4 = scmp.lt.s32.totalorder %s18_s13, %s18_s13 }
   0xb   :  { %p23982_p3 = scmp.ne.s32.totalorder %s18_s13, %s23981_s23  ;;  %p23987_p5 = scmp.lt.s32.totalorder %s23981_s23, %s23981_s23 }
   0xd   :  { %p23988_p6 = por %p23987_p5, %p23986_p4 }
   0xf   :  { %p23989_p7 = pnand %p23988_p6, %p23982_p3 }
  0x11   :  { %23992 = shalt.err (!%p23989_p7)
}
  0x12   :  { %20 = dma.hbm_to_vmem [thread:$0]  %s26735_s0, 3072, %s18_s13, [#allocation3]  }
  0x13   :  { %s23993_s28 = scalar_lea.hbm %s26736_s1, 12288 }
  0x14   :  { %p23994_p8 = scmp.ne.s32.totalorder %s26736_s1, %s23993_s28  ;;  %p23997_p9 = scmp.lt.u32.totalorder %s23993_s28, %s26736_s1 }
  0x16   :  { %p23999_p10 = pnand %p23997_p9, %p23994_p8 }
  0x18   :  { %24002 = shalt.err (!%p23999_p10)
}
  0x19   :  { %s24003_s6 = scalar_lea.vmem %s28_s15, 12288  ;;  %p24008_p12 = scmp.lt.s32.totalorder %s28_s15, %s28_s15 }
  0x1a   :  { %p24004_p11 = scmp.ne.s32.totalorder %s28_s15, %s24003_s6  ;;  %p24009_p13 = scmp.lt.s32.totalorder %s24003_s6, %s24003_s6 }
  0x1c   :  { %p24010_p0 = por %p24009_p13, %p24008_p12 }
  0x1e   :  { %p24011_p1 = pnand %p24010_p0, %p24004_p11 }
  0x20   :  { %24014 = shalt.err (!%p24011_p1)
}
  0x21   :  { %30 = dma.hbm_to_vmem [thread:$0]  %s26736_s1, 12288, %s28_s15, [#allocation6]  }
  0x22   :  { %24037 = dma.done.wait [#allocation3], 3072  }
  0x23   :  { %24038 = vsyncadd [#allocation3], 4294964224 }
  0x24   :  { %24039 = dma.done.wait [#allocation6], 12288  }
  0x25   :  { %24040 = vsyncadd [#allocation6], 4294955008  ;;  %v194_v0 = vlaneseq  ;;  %v24045_v1 = vmov 1983009808   ;;  %v64_v6 = vld [vmem:[#allocation5 + $0x8] sm:$0x3f] }
  0x26   :  { %v192_v2 = vunpack.c.l.s4 %v24045_v1  ;;  %v63_v7 = vld [vmem:[#allocation5] sm:$0x3f]  ;;  %v112_v8 = vld [vmem:[#allocation5 + $0x188] sm:$0x3f]  ;;  %v24093_v9 = vand.u32 4294901760, %v64_v6  ;;  %s24046_s9 = smov [#allocation7]  }
  0x27   :  { %v195_v3 = vshrl.u32 %v194_v0, 7  ;;  %v24095_v10 = vand.u32 4294901760, %v63_v7  ;;  %v24097_v11 = vand.u32 4294901760, %v112_v8  ;;  %v111_v12 = vld [vmem:[#allocation5 + $0x180] sm:$0x3f]  ;;  %s23358_s10 = sshll.u32 %s24046_s9, 4  ;;  %s23359_s10 = int_to_ptr.vmem [resolvable:$true] %s23358_s10 }
  0x28   :  { %v193_v4 = vunpack.c.0.s8 %v192_v2  ;;  %v24099_v13 = vld [vmem:[#allocation2] sm:$0xff]  ;;  %v24101_v14 = vand.u32 4294901760, %v111_v12  ;;  %695 = vmatprep.subr.mxu1 %v24093_v9  ;;  %v24113_v18 = vsub.f32 %v64_v6, %v24093_v9  ;;  %v66_v61 = vld [vmem:[#allocation5 + $0x18] sm:$0x3f]  ;;  %v65_v6 = vld [vmem:[#allocation5 + $0x10] sm:$0x3f]  ;;  %p24020_p3 = scmp.lt.s32.totalorder %s23359_s10, %s23359_s10 }
  0x29   :  { %v24105_v16 = vld [vmem:[#allocation2 + $0x60] sm:$0xff]  ;;  %v24109_v17 = vsub.f32 %v63_v7, %v24095_v10  ;;  %12023 = vmatprep.subr.mxu0 %v24097_v11  ;;  %697 = vmatpush1.xpose.msra.mxu1 %v24095_v10  ;;  %v24127_v25 = vsub.f32 %v112_v8, %v24097_v11  ;;  %v190_v56 = vcombine.high %v24099_v13, %v24099_v13  ;;  %v114_v63 = vld [vmem:[#allocation5 + $0x198] sm:$0x3f]  ;;  %v24179_v1 = vand.u32 4294901760, %v66_v61  ;;  %s24015_s11 = scalar_lea.vmem %s23359_s10, 32 }
  0x2a   :  { %v24091_v5 = vsub.s32 %v193_v4, %v195_v3  ;;  %12025 = vmatpush1.xpose.msra.mxu0 %v24101_v14  ;;  %v24118_v19 = vsub.f32 %v111_v12, %v24101_v14  ;;  %v778_v23 = vand.u32 4294901760, %v24113_v18  ;;  %v394_v57 = vcombine.high %v24105_v16, %v24105_v16  ;;  %v113_v12 = vld [vmem:[#allocation5 + $0x190] sm:$0x3f]  ;;  %p24016_p2 = scmp.ne.s32.totalorder %s23359_s10, %s24015_s11  ;;  %p24021_p4 = scmp.lt.s32.totalorder %s24015_s11, %s24015_s11 }
  0x2b   :  { %v784_v24 = vand.u32 4294901760, %v24109_v17  ;;  %v12106_v31 = vand.u32 4294901760, %v24127_v25  ;;  %v24183_v3 = vand.u32 4294901760, %v114_v63  ;;  %v24193_v7 = vsub.f32 %v66_v61, %v24179_v1 }
  0x2c   :  { %v197_v15 = vrot.slane %v24099_v13, %v24091_v5  ;;  %v401_v22 = vrot.slane %v24105_v16, %v24091_v5  ;;  %v779_v30 = vsub.f32 %v24113_v18, %v778_v23  ;;  %v12112_v32 = vand.u32 4294901760, %v24118_v19  ;;  %p24022_p5 = por %p24021_p4, %p24020_p3 }
  0x2d   :  { %v785_v38 = vsub.f32 %v24109_v17, %v784_v24  ;;  %v12107_v39 = vsub.f32 %v24127_v25, %v12106_v31  ;;  %v204_v58 = vrot.slane %v190_v56, %v24091_v5  ;;  %v408_v59 = vrot.slane %v394_v57, %v24091_v5  ;;  %v67_v56 = vld [vmem:[#allocation5 + $0x20] sm:$0x3f] }
  0x2e   :  { %v205_v20 = vcombine.high %v197_v15, %v197_v15  ;;  %v24120_v21 = vand.u32 4294901760, %v197_v15  ;;  %v409_v27 = vcombine.high %v401_v22, %v401_v22  ;;  %v24131_v28 = vand.u32 4294901760, %v401_v22  ;;  %p24023_p6 = pnand %p24022_p5, %p24016_p2 }
  0x2f   :  { %v780_v37 = vand.u32 4294901760, %v779_v30  ;;  %v12108_v44 = vand.u32 4294901760, %v12107_v39  ;;  %v12113_v48 = vsub.f32 %v24118_v19, %v12112_v32  ;;  %v786_v52 = vand.u32 4294901760, %v785_v38 }
  0x30   :  { %v24129_v26 = vand.u32 4294901760, %v205_v20  ;;  %v24134_v29 = vsub.f32 %v197_v15, %v24120_v21  ;;  %v24140_v34 = vand.u32 4294901760, %v409_v27  ;;  %v24144_v36 = vsub.f32 %v401_v22, %v24131_v28 }
  0x31   :  { %781 = vmatprep.subr.mxu1 %v780_v37  ;;  %12109 = vmatprep.subr.mxu0 %v12108_v44  ;;  %v12114_v55 = vand.u32 4294901760, %v12113_v48  ;;  %v206_v60 = vcombine.high %v204_v58, %v204_v58  ;;  %v410_v62 = vcombine.high %v408_v59, %v408_v59  ;;  %v24202_v13 = vand.u32 4294901760, %v204_v58  ;;  %v24275_v44 = vld [vmem:[#allocation2 + $0x68] sm:$0xff] }
  0x32   :  { %v761_v33 = vsub.f32 %v205_v20, %v24129_v26  ;;  %v768_v35 = vand.u32 4294901760, %v24134_v29  ;;  %v12089_v41 = vsub.f32 %v409_v27, %v24140_v34  ;;  %v12096_v43 = vand.u32 4294901760, %v24144_v36  ;;  %v68_v48 = vld [vmem:[#allocation5 + $0x28] sm:$0x3f] }
  0x33   :  { %v24177_v0 = vand.u32 4294901760, %v206_v60  ;;  %v24181_v2 = vand.u32 4294901760, %v410_v62  ;;  %v24205_v15 = vsub.f32 %v114_v63, %v24183_v3  ;;  %vm23350_vm0 = vcmask 41984  }
  0x34   :  { %v762_v40 = vand.u32 4294901760, %v761_v33  ;;  %v769_v42 = vsub.f32 %v24134_v29, %v768_v35  ;;  %v12090_v46 = vand.u32 4294901760, %v12089_v41  ;;  %v12097_v47 = vsub.f32 %v24144_v36, %v12096_v43 }
  0x35   :  { %v24189_v4 = vsub.f32 %v206_v60, %v24177_v0  ;;  %v24199_v8 = vsub.f32 %v410_v62, %v24181_v2  ;;  %v12578_v22 = vand.u32 4294901760, %v24205_v15  ;;  %v24319_v62 = vand.u32 4294901760, %v67_v56 }
  0x36   :  { %v763_v45 = vsub.f32 %v761_v33, %v762_v40  ;;  %v770_v49 = vand.u32 4294901760, %v769_v42  ;;  %v12091_v51 = vsub.f32 %v12089_v41, %v12090_v46  ;;  %v12098_v53 = vand.u32 4294901760, %v12097_v47 }
  0x37   :  { %v1234_v16 = vand.u32 4294901760, %v24189_v4  ;;  %v12562_v20 = vand.u32 4294901760, %v24199_v8  ;;  %v12579_v30 = vsub.f32 %v24205_v15, %v12578_v22 }
  0x38   :  { %v764_v50 = vand.u32 4294901760, %v763_v45  ;;  %v12092_v54 = vand.u32 4294901760, %v12091_v51 }
  0x39   :  { %v12580_v37 = vand.u32 4294901760, %v12579_v30 }
  0x3a   :  { %765 = vmatprep.mubr.f32.mxu1 %v764_v50  ;;  %12093 = vmatprep.mubr.f32.mxu0 %v12092_v54  ;;  %v116_v50 = vld [vmem:[#allocation5 + $0x1a8] sm:$0x3f] }
  0x3b   :  { %771 = vmatmul.mubr.f32.vlgmr.msra.gmra.mrb[0].mxu1 %v770_v49  ;;  %12099 = vmatmul.mubr.f32.vlgmr.msra.gmra.mrb[0].mxu0 %v12098_v53  ;;  %v24299_v54 = vand.u32 4294901760, %v116_v50 }
  0x3c   :  { %787 = vmatpush1.xpose.msra.mxu1 %v786_v52  ;;  %851 = vmatprep.mubr.f32.mxu1 %v24129_v26  ;;  %v24295_v52 = vand.u32 4294901760, %v68_v48 }
  0x3d   :  { %12115 = vmatpush1.xpose.msra.mxu0 %v12114_v55  ;;  %860 = vmatprep.subr.mxu1 %v24113_v18  ;;  %v24211_v18 = vand.u32 4294901760, %v408_v59  ;;  %v24317_v61 = vsub.f32 %v116_v50, %v24299_v54 }
  0x3e   :  { %12179 = vmatprep.mubr.f32.mxu0 %v24140_v34  ;;  %12188 = vmatprep.subr.mxu0 %v24127_v25  ;;  %v24307_v57 = vsub.f32 %v68_v48, %v24295_v52 }
  0x3f   :  { %v24235_v27 = vsub.f32 %v408_v59, %v24211_v18  ;;  %v115_v59 = vld [vmem:[#allocation5 + $0x1a0] sm:$0x3f] }
  0x43   :  { %853 = vmatmul.mubr.f32.vlgmr.msra.gmra.mrb[0].mxu1 %v24120_v21  ;;  %12181 = vmatmul.mubr.f32.vlgmr.msra.gmra.mrb[0].mxu0 %v24131_v28 }
  0x44   :  { %863 = vmatpush1.xpose.msra.mxu1 %v24109_v17  ;;  %928 = vmatprep.mubr.f32.mxu1 %v761_v33  ;;  %v1250_v17 = vand.u32 4294901760, %v24193_v7  ;;  %v12568_v33 = vand.u32 4294901760, %v24235_v27 }
  0x45   :  { %937 = vmatprep.subr.mxu1 %v24093_v9  ;;  %12191 = vmatpush1.xpose.msra.mxu0 %v24118_v19  ;;  %v24213_v19 = vand.u32 4294901760, %v113_v12 }
  0x46   :  { %12256 = vmatprep.mubr.f32.mxu0 %v12089_v41  ;;  %12265 = vmatprep.subr.mxu0 %v24097_v11  ;;  %v1251_v25 = vsub.f32 %v24193_v7, %v1250_v17  ;;  %v12569_v39 = vsub.f32 %v24235_v27, %v12568_v33 }
  0x48   :  { %v12570_v42 = vand.u32 4294901760, %v12569_v39  ;;  %v118_v39 = vld [vmem:[#allocation5 + $0x1b8] sm:$0x3f] }
  0x4b   :  { %931 = vmatmul.mubr.f32.vlgmr.msra.gmra.mrb[0].mxu1 %v24134_v29  ;;  %12259 = vmatmul.mubr.f32.vlgmr.msra.gmra.mrb[0].mxu0 %v24144_v36 }
  0x4c   :  { %939 = vmatpush1.xpose.msra.mxu1 %v24095_v10  ;;  %1005 = vmatprep.mubr.f32.mxu1 %v762_v40 }
  0x4d   :  { %1017 = vmatprep.subr.mxu1 %v778_v23  ;;  %12267 = vmatpush1.xpose.msra.mxu0 %v24101_v14 }
  0x4e   :  { %12333 = vmatprep.mubr.f32.mxu0 %v12090_v46  ;;  %12345 = vmatprep.subr.mxu0 %v12106_v31  ;;  %v418_v46 = vrot.slane %v24275_v44, %v24091_v5 }
  0x50   :  { %v426_v49 = vcombine.high %v418_v46, %v418_v46 }
  0x52   :  { %v24297_v53 = vand.u32 4294901760, %v426_v49 }
  0x53   :  { %1009 = vmatmul.mubr.f32.vlgmr.msra.gmra.mrb[0].mxu1 %v768_v35  ;;  %12337 = vmatmul.mubr.f32.vlgmr.msra.gmra.mrb[0].mxu0 %v12096_v43 }
  0x54   :  { %1021 = vmatpush1.xpose.msra.mxu1 %v784_v24  ;;  %1085 = vmatprep.mubr.f32.mxu1 %v24129_v26  ;;  %v1235_v24 = vsub.f32 %v24189_v4, %v1234_v16 }
  0x55   :  { %1093 = vmatprep.subr.mxu1 %v24093_v9  ;;  %12349 = vmatpush1.xpose.msra.mxu0 %v12112_v32  ;;  %v24207_v9 = vand.u32 4294901760, %v65_v6  ;;  %v1252_v32 = vand.u32 4294901760, %v1251_v25 }
  0x56   :  { %12413 = vmatprep.mubr.f32.mxu0 %v24140_v34  ;;  %12421 = vmatprep.subr.mxu0 %v24097_v11  ;;  %v24218_v11 = vsub.f32 %v204_v58, %v24202_v13  ;;  %v1236_v31 = vand.u32 4294901760, %v1235_v24  ;;  %v24311_v58 = vsub.f32 %v426_v49, %v24297_v53 }
  0x57   :  { %v24224_v23 = vsub.f32 %v65_v6, %v24207_v9  ;;  %v24325_v6 = vand.u32 4294901760, %v115_v59 }
  0x58   :  { %v1240_v29 = vand.u32 4294901760, %v24218_v11 }
  0x5a   :  { %v1241_v36 = vsub.f32 %v24218_v11, %v1240_v29 }
  0x5b   :  { %1087 = vmatmul.mubr.f32.vlgmr.msra.gmra.mrb[0].mxu1 %v24120_v21  ;;  %12415 = vmatmul.mubr.f32.vlgmr.msra.gmra.mrb[0].mxu0 %v24131_v28 }
  0x5c   :  { %1095 = vmatpush1.xpose.msra.mxu1 %v24095_v10  ;;  %1159 = vmatprep.mubr.f32.mxu1 %v24129_v26  ;;  %v24240_v10 = vsub.f32 %v113_v12, %v24213_v19  ;;  %v12563_v26 = vsub.f32 %v24199_v8, %v12562_v20  ;;  %v1242_v41 = vand.u32 4294901760, %v1241_v36  ;;  %v24336_v12 = vsub.f32 %v67_v56, %v24319_v62 }
  0x5d   :  { %1167 = vmatprep.subr.mxu1 %v24179_v1  ;;  %12423 = vmatpush1.xpose.msra.mxu0 %v24101_v14  ;;  %v1256_v14 = vand.u32 4294901760, %v24224_v23 }
  0x5e   :  { %12487 = vmatprep.mubr.f32.mxu0 %v24140_v34  ;;  %12495 = vmatprep.subr.mxu0 %v24183_v3  ;;  %v12564_v34 = vand.u32 4294901760, %v12563_v26  ;;  %v12584_v35 = vand.u32 4294901760, %v24240_v10 }
  0x5f   :  { %v1257_v38 = vsub.f32 %v24224_v23, %v1256_v14 }
  0x60   :  { %v12585_v40 = vsub.f32 %v24240_v10, %v12584_v35 }
  0x62   :  { %v12586_v43 = vand.u32 4294901760, %v12585_v40 }
  0x63   :  { %1161 = vmatmul.mubr.f32.vlgmr.msra.gmra.mrb[0].mxu1 %v24120_v21  ;;  %12489 = vmatmul.mubr.f32.vlgmr.msra.gmra.mrb[0].mxu0 %v24131_v28  ;;  %v1258_v21 = vand.u32 4294901760, %v1257_v38  ;;  %v24270_v28 = vld [vmem:[#allocation2 + $0x8] sm:$0xff] }
  0x64   :  { %1169 = vmatpush1.xpose.msra.mxu1 %v24207_v9  ;;  %1237 = vmatprep.mubr.f32.mxu1 %v1236_v31  ;;  %v214_v45 = vrot.slane %v24270_v28, %v24091_v5 }
  0x65   :  { %1253 = vmatprep.subr.mxu1 %v1252_v32  ;;  %12497 = vmatpush1.xpose.msra.mxu0 %v24213_v19 }
  0x66   :  { %12565 = vmatprep.mubr.f32.mxu0 %v12564_v34  ;;  %12581 = vmatprep.subr.mxu0 %v12580_v37  ;;  %v222_v47 = vcombine.high %v214_v45, %v214_v45  ;;  %v24314_v60 = vand.u32 4294901760, %v214_v45  ;;  %v70_v37 = vld [vmem:[#allocation5 + $0x38] sm:$0x3f] }
  0x68   :  { %v24293_v51 = vand.u32 4294901760, %v222_v47 }
  0x6a   :  { %v24303_v55 = vsub.f32 %v222_v47, %v24293_v51 }
  0x6b   :  { %1243 = vmatmul.mubr.f32.vlgmr.msra.gmra.mrb[0].mxu1 %v1242_v41  ;;  %12571 = vmatmul.mubr.f32.vlgmr.msra.gmra.mrb[0].mxu0 %v12570_v42  ;;  %v24405_v41 = vand.u32 4294901760, %v70_v37  ;;  %v24409_v42 = vand.u32 4294901760, %v118_v39 }
  0x6c   :  { %1259 = vmatpush1.xpose.msra.mxu1 %v1258_v21  ;;  %1323 = vmatprep.mubr.f32.mxu1 %v24177_v0  ;;  %v1706_v63 = vand.u32 4294901760, %v24303_v55 }
  0x6d   :  { %1332 = vmatprep.subr.mxu1 %v24193_v7  ;;  %12587 = vmatpush1.xpose.msra.mxu0 %v12586_v43  ;;  %v13034_v7 = vand.u32 4294901760, %v24311_v58  ;;  %v24427_v48 = vsub.f32 %v118_v39, %v24409_v42 }
  0x6e   :  { %12651 = vmatprep.mubr.f32.mxu0 %v24181_v2  ;;  %12660 = vmatprep.subr.mxu0 %v24205_v15  ;;  %v1707_v15 = vsub.f32 %v24303_v55, %v1706_v63 }
  0x73   :  { %1325 = vmatmul.mubr.f32.vlgmr.msra.gmra.mrb[0].mxu1 %v24202_v13  ;;  %12653 = vmatmul.mubr.f32.vlgmr.msra.gmra.mrb[0].mxu0 %v24211_v18 }
  0x74   :  { %1335 = vmatpush1.xpose.msra.mxu1 %v24224_v23  ;;  %1400 = vmatprep.mubr.f32.mxu1 %v24189_v4  ;;  %v24323_v4 = vand.u32 4294901760, %v418_v46 }
  0x75   :  { %1409 = vmatprep.subr.mxu1 %v24179_v1  ;;  %12663 = vmatpush1.xpose.msra.mxu0 %v24240_v10 }
  0x76   :  { %12728 = vmatprep.mubr.f32.mxu0 %v24199_v8  ;;  %12737 = vmatprep.subr.mxu0 %v24183_v3  ;;  %v13050_v8 = vand.u32 4294901760, %v24317_v61 }
  0x7b   :  { %1403 = vmatmul.mubr.f32.vlgmr.msra.gmra.mrb[0].mxu1 %v24218_v11  ;;  %12731 = vmatmul.mubr.f32.vlgmr.msra.gmra.mrb[0].mxu0 %v24235_v27  ;;  %v13051_v11 = vsub.f32 %v24317_v61, %v13050_v8 }
  0x7c   :  { %1411 = vmatpush1.xpose.msra.mxu1 %v24207_v9  ;;  %1477 = vmatprep.mubr.f32.mxu1 %v1234_v16 }
  0x7d   :  { %1489 = vmatprep.subr.mxu1 %v1250_v17  ;;  %12739 = vmatpush1.xpose.msra.mxu0 %v24213_v19  ;;  %v24347_v17 = vsub.f32 %v418_v46, %v24323_v4  ;;  %v13052_v10 = vand.u32 4294901760, %v13051_v11  ;;  %v117_v46 = vld [vmem:[#allocation5 + $0x1b0] sm:$0x3f] }
  0x7e   :  { %12805 = vmatprep.mubr.f32.mxu0 %v12562_v20  ;;  %12817 = vmatprep.subr.mxu0 %v12578_v22  ;;  %v1708_v22 = vand.u32 4294901760, %v1707_v15  ;;  %v24435_v56 = vand.u32 4294901760, %v117_v46 }
  0x83   :  { %1481 = vmatmul.mubr.f32.vlgmr.msra.gmra.mrb[0].mxu1 %v1240_v29  ;;  %12809 = vmatmul.mubr.f32.vlgmr.msra.gmra.mrb[0].mxu0 %v12568_v33  ;;  %v411_v33 = vcombine.high %v24275_v44, %v24275_v44  ;;  %v24417_v44 = vsub.f32 %v70_v37, %v24405_v41 }
  0x84   :  { %1493 = vmatpush1.xpose.msra.mxu1 %v1256_v14  ;;  %1557 = vmatprep.mubr.f32.mxu1 %v24177_v0 }
  0x85   :  { %1565 = vmatprep.subr.mxu1 %v24179_v1  ;;  %12821 = vmatpush1.xpose.msra.mxu0 %v12584_v35  ;;  %v1722_v1 = vand.u32 4294901760, %v24307_v57  ;;  %v425_v35 = vrot.slane %v411_v33, %v24091_v5 }
  0x86   :  { %12885 = vmatprep.mubr.f32.mxu0 %v24181_v2  ;;  %12893 = vmatprep.subr.mxu0 %v24183_v3  ;;  %v24330_v3 = vsub.f32 %v214_v45, %v24314_v60 }
  0x87   :  { %v1723_v16 = vsub.f32 %v24307_v57, %v1722_v1  ;;  %v427_v38 = vcombine.high %v425_v35, %v425_v35 }
  0x88   :  { %v1712_v20 = vand.u32 4294901760, %v24330_v3 }
  0x89   :  { %v1724_v23 = vand.u32 4294901760, %v1723_v16  ;;  %v24407_v21 = vand.u32 4294901760, %v427_v38 }
  0x8a   :  { %v1713_v27 = vsub.f32 %v24330_v3, %v1712_v20 }
  0x8b   :  { %1559 = vmatmul.mubr.f32.vlgmr.msra.gmra.mrb[0].mxu1 %v24202_v13  ;;  %12887 = vmatmul.mubr.f32.vlgmr.msra.gmra.mrb[0].mxu0 %v24211_v18  ;;  %v24421_v45 = vsub.f32 %v427_v38, %v24407_v21 }
  0x8c   :  { %1567 = vmatpush1.xpose.msra.mxu1 %v24207_v9  ;;  %1631 = vmatprep.mubr.f32.mxu1 %v24177_v0  ;;  %v24352_v0 = vsub.f32 %v115_v59, %v24325_v6  ;;  %v13035_v9 = vsub.f32 %v24311_v58, %v13034_v7  ;;  %v1714_v31 = vand.u32 4294901760, %v1713_v27 }
  0x8d   :  { %1639 = vmatprep.subr.mxu1 %v24295_v52  ;;  %12895 = vmatpush1.xpose.msra.mxu0 %v24213_v19  ;;  %v1728_v19 = vand.u32 4294901760, %v24336_v12 }
  0x8e   :  { %12959 = vmatprep.mubr.f32.mxu0 %v24181_v2  ;;  %12967 = vmatprep.subr.mxu0 %v24299_v54  ;;  %v13040_v2 = vand.u32 4294901760, %v24347_v17  ;;  %v13036_v24 = vand.u32 4294901760, %v13035_v9  ;;  %v13056_v25 = vand.u32 4294901760, %v24352_v0 }
  0x8f   :  { %v1729_v26 = vsub.f32 %v24336_v12, %v1728_v19 }
  0x90   :  { %v13041_v29 = vsub.f32 %v24347_v17, %v13040_v2  ;;  %v13057_v30 = vsub.f32 %v24352_v0, %v13056_v25 }
  0x92   :  { %v13042_v14 = vand.u32 4294901760, %v13041_v29  ;;  %v13058_v32 = vand.u32 4294901760, %v13057_v30  ;;  %v120_v29 = vld [vmem:[#allocation5 + $0x1c8] sm:$0x3f] }
  0x93   :  { %1633 = vmatmul.mubr.f32.vlgmr.msra.gmra.mrb[0].mxu1 %v24202_v13  ;;  %12961 = vmatmul.mubr.f32.vlgmr.msra.gmra.mrb[0].mxu0 %v24211_v18  ;;  %v1730_v13 = vand.u32 4294901760, %v1729_v26  ;;  %v207_v18 = vcombine.high %v24270_v28, %v24270_v28  ;;  %v69_v28 = vld [vmem:[#allocation5 + $0x30] sm:$0x3f] }
  0x94   :  { %1641 = vmatpush1.xpose.msra.mxu1 %v24319_v62  ;;  %1709 = vmatprep.mubr.f32.mxu1 %v1708_v22  ;;  %v24429_v49 = vand.u32 4294901760, %v69_v28 }
  0x95   :  { %1725 = vmatprep.subr.mxu1 %v1724_v23  ;;  %12969 = vmatpush1.xpose.msra.mxu0 %v24325_v6  ;;  %v221_v34 = vrot.slane %v207_v18, %v24091_v5  ;;  %v71_v18 = vld [vmem:[#allocation5 + $0x40] sm:$0x3f] }
  0x96   :  { %13037 = vmatprep.mubr.f32.mxu0 %v13036_v24  ;;  %13053 = vmatprep.subr.mxu0 %v13052_v10  ;;  %v24446_v59 = vsub.f32 %v69_v28, %v24429_v49  ;;  %v72_v10 = vld [vmem:[#allocation5 + $0x48] sm:$0x3f]  ;;  %v24541_v38 = vand.u32 4294901760, %v71_v18 }
  0x97   :  { %v223_v36 = vcombine.high %v221_v34, %v221_v34  ;;  %v24424_v47 = vand.u32 4294901760, %v221_v34 }
  0x99   :  { %v24403_v40 = vand.u32 4294901760, %v223_v36 }
  0x9b   :  { %1715 = vmatmul.mubr.f32.vlgmr.msra.gmra.mrb[0].mxu1 %v1714_v31  ;;  %13043 = vmatmul.mubr.f32.vlgmr.msra.gmra.mrb[0].mxu0 %v13042_v14  ;;  %v24413_v43 = vsub.f32 %v223_v36, %v24403_v40  ;;  %v24517_v31 = vand.u32 4294901760, %v72_v10  ;;  %v24521_v14 = vand.u32 4294901760, %v120_v29 }
  0x9c   :  { %1731 = vmatpush1.xpose.msra.mxu1 %v1730_v13  ;;  %1795 = vmatprep.mubr.f32.mxu1 %v24293_v51 }
  0x9d   :  { %1804 = vmatprep.subr.mxu1 %v24307_v57  ;;  %13059 = vmatpush1.xpose.msra.mxu0 %v13058_v32  ;;  %v2178_v50 = vand.u32 4294901760, %v24413_v43  ;;  %v13506_v57 = vand.u32 4294901760, %v24421_v45  ;;  %v24529_v33 = vsub.f32 %v72_v10, %v24517_v31  ;;  %v24539_v37 = vsub.f32 %v120_v29, %v24521_v14 }
  0x9e   :  { %13123 = vmatprep.mubr.f32.mxu0 %v24297_v53  ;;  %13132 = vmatprep.subr.mxu0 %v24317_v61 }
  0x9f   :  { %v2179_v61 = vsub.f32 %v24413_v43, %v2178_v50 }
  0xa3   :  { %1797 = vmatmul.mubr.f32.vlgmr.msra.gmra.mrb[0].mxu1 %v24314_v60  ;;  %13125 = vmatmul.mubr.f32.vlgmr.msra.gmra.mrb[0].mxu0 %v24323_v4 }
  0xa4   :  { %1807 = vmatpush1.xpose.msra.mxu1 %v24336_v12  ;;  %1872 = vmatprep.mubr.f32.mxu1 %v24303_v55  ;;  %v24433_v55 = vand.u32 4294901760, %v425_v35 }
  0xa5   :  { %1881 = vmatprep.subr.mxu1 %v24295_v52  ;;  %13135 = vmatpush1.xpose.msra.mxu0 %v24352_v0 }
  0xa6   :  { %13200 = vmatprep.mubr.f32.mxu0 %v24311_v58  ;;  %13209 = vmatprep.subr.mxu0 %v24299_v54  ;;  %v13522_v58 = vand.u32 4294901760, %v24427_v48 }
  0xab   :  { %1875 = vmatmul.mubr.f32.vlgmr.msra.gmra.mrb[0].mxu1 %v24330_v3  ;;  %13203 = vmatmul.mubr.f32.vlgmr.msra.gmra.mrb[0].mxu0 %v24347_v17  ;;  %v13523_v3 = vsub.f32 %v24427_v48, %v13522_v58 }
  0xac   :  { %1883 = vmatpush1.xpose.msra.mxu1 %v24319_v62  ;;  %1949 = vmatprep.mubr.f32.mxu1 %v1706_v63 }
  0xad   :  { %1961 = vmatprep.subr.mxu1 %v1722_v1  ;;  %13211 = vmatpush1.xpose.msra.mxu0 %v24325_v6  ;;  %v24457_v1 = vsub.f32 %v425_v35, %v24433_v55  ;;  %v13524_v0 = vand.u32 4294901760, %v13523_v3  ;;  %v119_v35 = vld [vmem:[#allocation5 + $0x1c0] sm:$0x3f] }
  0xae   :  { %13277 = vmatprep.mubr.f32.mxu0 %v13034_v7  ;;  %13289 = vmatprep.subr.mxu0 %v13050_v8  ;;  %v2180_v8 = vand.u32 4294901760, %v2179_v61  ;;  %v24547_v28 = vand.u32 4294901760, %v119_v35 }
  0xb3   :  { %1953 = vmatmul.mubr.f32.vlgmr.msra.gmra.mrb[0].mxu1 %v1712_v20  ;;  %13281 = vmatmul.mubr.f32.vlgmr.msra.gmra.mrb[0].mxu0 %v13040_v2  ;;  %v24497_v2 = vld [vmem:[#allocation2 + $0x70] sm:$0xff] }
  0xb4   :  { %1965 = vmatpush1.xpose.msra.mxu1 %v1728_v19  ;;  %2029 = vmatprep.mubr.f32.mxu1 %v24293_v51 }
  0xb5   :  { %2037 = vmatprep.subr.mxu1 %v24295_v52  ;;  %13293 = vmatpush1.xpose.msra.mxu0 %v13056_v25  ;;  %v2194_v52 = vand.u32 4294901760, %v24417_v44  ;;  %v435_v25 = vrot.slane %v24497_v2, %v24091_v5 }
  0xb6   :  { %13357 = vmatprep.mubr.f32.mxu0 %v24297_v53  ;;  %13365 = vmatprep.subr.mxu0 %v24299_v54  ;;  %v24440_v54 = vsub.f32 %v221_v34, %v24424_v47 }
  0xb7   :  { %v2195_v63 = vsub.f32 %v24417_v44, %v2194_v52  ;;  %v443_v26 = vcombine.high %v435_v25, %v435_v25 }
  0xb8   :  { %v2184_v7 = vand.u32 4294901760, %v24440_v54 }
  0xb9   :  { %v2196_v12 = vand.u32 4294901760, %v2195_v63  ;;  %v24519_v13 = vand.u32 4294901760, %v443_v26 }
  0xba   :  { %v2185_v17 = vsub.f32 %v24440_v54, %v2184_v7 }
  0xbb   :  { %2031 = vmatmul.mubr.f32.vlgmr.msra.gmra.mrb[0].mxu1 %v24314_v60  ;;  %13359 = vmatmul.mubr.f32.vlgmr.msra.gmra.mrb[0].mxu0 %v24323_v4  ;;  %v24533_v34 = vsub.f32 %v443_v26, %v24519_v13 }
  0xbc   :  { %2039 = vmatpush1.xpose.msra.mxu1 %v24319_v62  ;;  %2103 = vmatprep.mubr.f32.mxu1 %v24293_v51  ;;  %v24462_v51 = vsub.f32 %v117_v46, %v24435_v56  ;;  %v13507_v62 = vsub.f32 %v24421_v45, %v13506_v57  ;;  %v2186_v22 = vand.u32 4294901760, %v2185_v17  ;;  %v24558_v46 = vsub.f32 %v71_v18, %v24541_v38 }
  0xbd   :  { %2111 = vmatprep.subr.mxu1 %v24405_v41  ;;  %13367 = vmatpush1.xpose.msra.mxu0 %v24325_v6  ;;  %v2200_v6 = vand.u32 4294901760, %v24446_v59 }
  0xbe   :  { %13431 = vmatprep.mubr.f32.mxu0 %v24297_v53  ;;  %13439 = vmatprep.subr.mxu0 %v24409_v42  ;;  %v13512_v53 = vand.u32 4294901760, %v24457_v1  ;;  %v13508_v15 = vand.u32 4294901760, %v13507_v62  ;;  %v13528_v16 = vand.u32 4294901760, %v24462_v51 }
  0xbf   :  { %v2201_v9 = vsub.f32 %v24446_v59, %v2200_v6 }
  0xc0   :  { %v13513_v20 = vsub.f32 %v24457_v1, %v13512_v53  ;;  %v13529_v11 = vsub.f32 %v24462_v51, %v13528_v16 }
  0xc2   :  { %v13514_v19 = vand.u32 4294901760, %v13513_v20  ;;  %v13530_v23 = vand.u32 4294901760, %v13529_v11  ;;  %v122_v20 = vld [vmem:[#allocation5 + $0x1d8] sm:$0x3f] }
  0xc3   :  { %2105 = vmatmul.mubr.f32.vlgmr.msra.gmra.mrb[0].mxu1 %v24314_v60  ;;  %13433 = vmatmul.mubr.f32.vlgmr.msra.gmra.mrb[0].mxu0 %v24323_v4  ;;  %v2202_v60 = vand.u32 4294901760, %v2201_v9  ;;  %v24492_v4 = vld [vmem:[#allocation2 + $0x10] sm:$0xff] }
  0xc4   :  { %2113 = vmatpush1.xpose.msra.mxu1 %v24429_v49  ;;  %2181 = vmatprep.mubr.f32.mxu1 %v2180_v8  ;;  %v231_v24 = vrot.slane %v24492_v4, %v24091_v5 }
  0xc5   :  { %2197 = vmatprep.subr.mxu1 %v2196_v12  ;;  %13441 = vmatpush1.xpose.msra.mxu0 %v24435_v56 }
  0xc6   :  { %13509 = vmatprep.mubr.f32.mxu0 %v13508_v15  ;;  %13525 = vmatprep.subr.mxu0 %v13524_v0  ;;  %v239_v27 = vcombine.high %v231_v24, %v231_v24  ;;  %v24536_v36 = vand.u32 4294901760, %v231_v24  ;;  %v74_v0 = vld [vmem:[#allocation5 + $0x58] sm:$0x3f] }
  0xc8   :  { %v24515_v30 = vand.u32 4294901760, %v239_v27 }
  0xca   :  { %v24525_v32 = vsub.f32 %v239_v27, %v24515_v30 }
  0xcb   :  { %2187 = vmatmul.mubr.f32.vlgmr.msra.gmra.mrb[0].mxu1 %v2186_v22  ;;  %13515 = vmatmul.mubr.f32.vlgmr.msra.gmra.mrb[0].mxu0 %v13514_v19  ;;  %v24627_v22 = vand.u32 4294901760, %v74_v0  ;;  %v24631_v19 = vand.u32 4294901760, %v122_v20 }
  0xcc   :  { %2203 = vmatpush1.xpose.msra.mxu1 %v2202_v60  ;;  %2267 = vmatprep.mubr.f32.mxu1 %v24403_v40  ;;  %v2650_v39 = vand.u32 4294901760, %v24525_v32 }
  0xcd   :  { %2276 = vmatprep.subr.mxu1 %v24417_v44  ;;  %13531 = vmatpush1.xpose.msra.mxu0 %v13530_v23  ;;  %v13978_v44 = vand.u32 4294901760, %v24533_v34  ;;  %v24649_v10 = vsub.f32 %v122_v20, %v24631_v19 }
  0xce   :  { %13595 = vmatprep.mubr.f32.mxu0 %v24407_v21  ;;  %13604 = vmatprep.subr.mxu0 %v24427_v48  ;;  %v2651_v48 = vsub.f32 %v24525_v32, %v2650_v39 }
  0xd3   :  { %2269 = vmatmul.mubr.f32.vlgmr.msra.gmra.mrb[0].mxu1 %v24424_v47  ;;  %13597 = vmatmul.mubr.f32.vlgmr.msra.gmra.mrb[0].mxu0 %v24433_v55 }
  0xd4   :  { %2279 = vmatpush1.xpose.msra.mxu1 %v24446_v59  ;;  %2344 = vmatprep.mubr.f32.mxu1 %v24413_v43  ;;  %v24545_v43 = vand.u32 4294901760, %v435_v25 }
  0xd5   :  { %2353 = vmatprep.subr.mxu1 %v24405_v41  ;;  %13607 = vmatpush1.xpose.msra.mxu0 %v24462_v51 }
  0xd6   :  { %13672 = vmatprep.mubr.f32.mxu0 %v24421_v45  ;;  %13681 = vmatprep.subr.mxu0 %v24409_v42  ;;  %v13994_v45 = vand.u32 4294901760, %v24539_v37 }
  0xdb   :  { %2347 = vmatmul.mubr.f32.vlgmr.msra.gmra.mrb[0].mxu1 %v24440_v54  ;;  %13675 = vmatmul.mubr.f32.vlgmr.msra.gmra.mrb[0].mxu0 %v24457_v1  ;;  %v13995_v54 = vsub.f32 %v24539_v37, %v13994_v45 }
  0xdc   :  { %2355 = vmatpush1.xpose.msra.mxu1 %v24429_v49  ;;  %2421 = vmatprep.mubr.f32.mxu1 %v2178_v50 }
  0xdd   :  { %2433 = vmatprep.subr.mxu1 %v2194_v52  ;;  %13683 = vmatpush1.xpose.msra.mxu0 %v24435_v56  ;;  %v24569_v52 = vsub.f32 %v435_v25, %v24545_v43  ;;  %v13996_v51 = vand.u32 4294901760, %v13995_v54  ;;  %v121_v25 = vld [vmem:[#allocation5 + $0x1d0] sm:$0x3f] }
  0xde   :  { %13749 = vmatprep.mubr.f32.mxu0 %v13506_v57  ;;  %13761 = vmatprep.subr.mxu0 %v13522_v58  ;;  %v2652_v58 = vand.u32 4294901760, %v2651_v48  ;;  %v24657_v18 = vand.u32 4294901760, %v121_v25 }
  0xe3   :  { %2425 = vmatmul.mubr.f32.vlgmr.msra.gmra.mrb[0].mxu1 %v2184_v7  ;;  %13753 = vmatmul.mubr.f32.vlgmr.msra.gmra.mrb[0].mxu0 %v13512_v53  ;;  %v428_v53 = vcombine.high %v24497_v2, %v24497_v2  ;;  %v24639_v2 = vsub.f32 %v74_v0, %v24627_v22 }
  0xe4   :  { %2437 = vmatpush1.xpose.msra.mxu1 %v2200_v6  ;;  %2501 = vmatprep.mubr.f32.mxu1 %v24403_v40 }
  0xe5   :  { %2509 = vmatprep.subr.mxu1 %v24405_v41  ;;  %13765 = vmatpush1.xpose.msra.mxu0 %v13528_v16  ;;  %v2666_v41 = vand.u32 4294901760, %v24529_v33  ;;  %v442_v16 = vrot.slane %v428_v53, %v24091_v5 }
  0xe6   :  { %13829 = vmatprep.mubr.f32.mxu0 %v24407_v21  ;;  %13837 = vmatprep.subr.mxu0 %v24409_v42  ;;  %v24552_v42 = vsub.f32 %v231_v24, %v24536_v36 }
  0xe7   :  { %v2667_v50 = vsub.f32 %v24529_v33, %v2666_v41  ;;  %v444_v9 = vcombine.high %v442_v16, %v442_v16 }
  0xe8   :  { %v2656_v57 = vand.u32 4294901760, %v24552_v42 }
  0xe9   :  { %v2668_v59 = vand.u32 4294901760, %v2667_v50  ;;  %v24629_v60 = vand.u32 4294901760, %v444_v9 }
  0xea   :  { %v2657_v1 = vsub.f32 %v24552_v42, %v2656_v57 }
  0xeb   :  { %2503 = vmatmul.mubr.f32.vlgmr.msra.gmra.mrb[0].mxu1 %v24424_v47  ;;  %13831 = vmatmul.mubr.f32.vlgmr.msra.gmra.mrb[0].mxu0 %v24433_v55  ;;  %v24643_v24 = vsub.f32 %v444_v9, %v24629_v60 }
  0xec   :  { %2511 = vmatpush1.xpose.msra.mxu1 %v24429_v49  ;;  %2575 = vmatprep.mubr.f32.mxu1 %v24403_v40  ;;  %v24574_v40 = vsub.f32 %v119_v35, %v24547_v28  ;;  %v13979_v49 = vsub.f32 %v24533_v34, %v13978_v44  ;;  %v2658_v8 = vand.u32 4294901760, %v2657_v1 }
  0xed   :  { %2583 = vmatprep.subr.mxu1 %v24517_v31  ;;  %13839 = vmatpush1.xpose.msra.mxu0 %v24435_v56  ;;  %v2672_v56 = vand.u32 4294901760, %v24558_v46 }
  0xee   :  { %13903 = vmatprep.mubr.f32.mxu0 %v24407_v21  ;;  %13911 = vmatprep.subr.mxu0 %v24521_v14  ;;  %v13984_v21 = vand.u32 4294901760, %v24569_v52  ;;  %v13980_v61 = vand.u32 4294901760, %v13979_v49  ;;  %v14000_v63 = vand.u32 4294901760, %v24574_v40 }
  0xef   :  { %v2673_v62 = vsub.f32 %v24558_v46, %v2672_v56 }
  0xf0   :  { %v13985_v7 = vsub.f32 %v24569_v52, %v13984_v21  ;;  %v14001_v3 = vsub.f32 %v24574_v40, %v14000_v63 }
  0xf2   :  { %v13986_v6 = vand.u32 4294901760, %v13985_v7  ;;  %v14002_v12 = vand.u32 4294901760, %v14001_v3  ;;  %v124_v7 = vld [vmem:[#allocation5 + $0x1e8] sm:$0x3f] }
  0xf3   :  { %2577 = vmatmul.mubr.f32.vlgmr.msra.gmra.mrb[0].mxu1 %v24424_v47  ;;  %13905 = vmatmul.mubr.f32.vlgmr.msra.gmra.mrb[0].mxu0 %v24433_v55  ;;  %v2674_v47 = vand.u32 4294901760, %v2673_v62  ;;  %v224_v55 = vcombine.high %v24492_v4, %v24492_v4  ;;  %v73_v4 = vld [vmem:[#allocation5 + $0x50] sm:$0x3f] }
  0xf4   :  { %2585 = vmatpush1.xpose.msra.mxu1 %v24541_v38  ;;  %2653 = vmatprep.mubr.f32.mxu1 %v2652_v58  ;;  %v24651_v26 = vand.u32 4294901760, %v73_v4 }
  0xf5   :  { %2669 = vmatprep.subr.mxu1 %v2668_v59  ;;  %13913 = vmatpush1.xpose.msra.mxu0 %v24547_v28  ;;  %v238_v15 = vrot.slane %v224_v55, %v24091_v5  ;;  %v75_v55 = vld [vmem:[#allocation5 + $0x60] sm:$0x3f] }
  0xf6   :  { %13981 = vmatprep.mubr.f32.mxu0 %v13980_v61  ;;  %13997 = vmatprep.subr.mxu0 %v13996_v51  ;;  %v24668_v35 = vsub.f32 %v73_v4, %v24651_v26  ;;  %v76_v51 = vld [vmem:[#allocation5 + $0x68] sm:$0x3f]  ;;  %v24763_v9 = vand.u32 4294901760, %v75_v55 }
  0xf7   :  { %v240_v17 = vcombine.high %v238_v15, %v238_v15  ;;  %v24646_v27 = vand.u32 4294901760, %v238_v15 }
  0xf9   :  { %v24625_v11 = vand.u32 4294901760, %v240_v17 }
  0xfb   :  { %2659 = vmatmul.mubr.f32.vlgmr.msra.gmra.mrb[0].mxu1 %v2658_v8  ;;  %13987 = vmatmul.mubr.f32.vlgmr.msra.gmra.mrb[0].mxu0 %v13986_v6  ;;  %v24635_v23 = vsub.f32 %v240_v17, %v24625_v11  ;;  %v24739_v8 = vand.u32 4294901760, %v76_v51  ;;  %v24743_v6 = vand.u32 4294901760, %v124_v7 }
  0xfc   :  { %2675 = vmatpush1.xpose.msra.mxu1 %v2674_v47  ;;  %2739 = vmatprep.mubr.f32.mxu1 %v24515_v30 }
  0xfd   :  { %2748 = vmatprep.subr.mxu1 %v24529_v33  ;;  %14003 = vmatpush1.xpose.msra.mxu0 %v14002_v12  ;;  %v3122_v29 = vand.u32 4294901760, %v24635_v23  ;;  %v14450_v33 = vand.u32 4294901760, %v24643_v24  ;;  %v24751_v53 = vsub.f32 %v76_v51, %v24739_v8  ;;  %v24761_v0 = vsub.f32 %v124_v7, %v24743_v6 }
  0xfe   :  { %14067 = vmatprep.mubr.f32.mxu0 %v24519_v13  ;;  %14076 = vmatprep.subr.mxu0 %v24539_v37 }
  0xff   :  { %v3123_v37 = vsub.f32 %v24635_v23, %v3122_v29 }
 0x103   :  { %2741 = vmatmul.mubr.f32.vlgmr.msra.gmra.mrb[0].mxu1 %v24536_v36  ;;  %14069 = vmatmul.mubr.f32.vlgmr.msra.gmra.mrb[0].mxu0 %v24545_v43 }
 0x104   :  { %2751 = vmatpush1.xpose.msra.mxu1 %v24558_v46  ;;  %2816 = vmatprep.mubr.f32.mxu1 %v24525_v32  ;;  %v24655_v32 = vand.u32 4294901760, %v442_v16 }
 0x105   :  { %2825 = vmatprep.subr.mxu1 %v24517_v31  ;;  %14079 = vmatpush1.xpose.msra.mxu0 %v24574_v40 }
 0x106   :  { %14144 = vmatprep.mubr.f32.mxu0 %v24533_v34  ;;  %14153 = vmatprep.subr.mxu0 %v24521_v14  ;;  %v14466_v34 = vand.u32 4294901760, %v24649_v10 }
 0x10b   :  { %2819 = vmatmul.mubr.f32.vlgmr.msra.gmra.mrb[0].mxu1 %v24552_v42  ;;  %14147 = vmatmul.mubr.f32.vlgmr.msra.gmra.mrb[0].mxu0 %v24569_v52  ;;  %v14467_v42 = vsub.f32 %v24649_v10, %v14466_v34 }
 0x10c   :  { %2827 = vmatpush1.xpose.msra.mxu1 %v24541_v38  ;;  %2893 = vmatprep.mubr.f32.mxu1 %v2650_v39 }
 0x10d   :  { %2905 = vmatprep.subr.mxu1 %v2666_v41  ;;  %14155 = vmatpush1.xpose.msra.mxu0 %v24547_v28  ;;  %v24679_v41 = vsub.f32 %v442_v16, %v24655_v32  ;;  %v14468_v40 = vand.u32 4294901760, %v14467_v42  ;;  %v123_v16 = vld [vmem:[#allocation5 + $0x1e0] sm:$0x3f] }
 0x10e   :  { %14221 = vmatprep.mubr.f32.mxu0 %v13978_v44  ;;  %14233 = vmatprep.subr.mxu0 %v13994_v45  ;;  %v3124_v45 = vand.u32 4294901760, %v3123_v37  ;;  %v24769_v4 = vand.u32 4294901760, %v123_v16 }
 0x113   :  { %2897 = vmatmul.mubr.f32.vlgmr.msra.gmra.mrb[0].mxu1 %v2656_v57  ;;  %14225 = vmatmul.mubr.f32.vlgmr.msra.gmra.mrb[0].mxu0 %v13984_v21  ;;  %v24719_v21 = vld [vmem:[#allocation2 + $0x78] sm:$0xff] }
 0x114   :  { %2909 = vmatpush1.xpose.msra.mxu1 %v2672_v56  ;;  %2973 = vmatprep.mubr.f32.mxu1 %v24515_v30 }
 0x115   :  { %2981 = vmatprep.subr.mxu1 %v24517_v31  ;;  %14237 = vmatpush1.xpose.msra.mxu0 %v14000_v63  ;;  %v3138_v31 = vand.u32 4294901760, %v24639_v2  ;;  %v452_v63 = vrot.slane %v24719_v21, %v24091_v5 }
 0x116   :  { %14301 = vmatprep.mubr.f32.mxu0 %v24519_v13  ;;  %14309 = vmatprep.subr.mxu0 %v24521_v14  ;;  %v24662_v14 = vsub.f32 %v238_v15, %v24646_v27 }
 0x117   :  { %v3139_v39 = vsub.f32 %v24639_v2, %v3138_v31  ;;  %v460_v62 = vcombine.high %v452_v63, %v452_v63 }
 0x118   :  { %v3128_v44 = vand.u32 4294901760, %v24662_v14 }
 0x119   :  { %v3140_v46 = vand.u32 4294901760, %v3139_v39  ;;  %v24741_v47 = vand.u32 4294901760, %v460_v62 }
 0x11a   :  { %v3129_v52 = vsub.f32 %v24662_v14, %v3128_v44 }
 0x11b   :  { %2975 = vmatmul.mubr.f32.vlgmr.msra.gmra.mrb[0].mxu1 %v24536_v36  ;;  %14303 = vmatmul.mubr.f32.vlgmr.msra.gmra.mrb[0].mxu0 %v24545_v43  ;;  %v24755_v15 = vsub.f32 %v460_v62, %v24741_v47 }
 0x11c   :  { %2983 = vmatpush1.xpose.msra.mxu1 %v24541_v38  ;;  %3047 = vmatprep.mubr.f32.mxu1 %v24515_v30  ;;  %v24684_v30 = vsub.f32 %v121_v25, %v24657_v18  ;;  %v14451_v38 = vsub.f32 %v24643_v24, %v14450_v33  ;;  %v3130_v58 = vand.u32 4294901760, %v3129_v52  ;;  %v24780_v25 = vsub.f32 %v75_v55, %v24763_v9 }
 0x11d   :  { %3055 = vmatprep.subr.mxu1 %v24627_v22  ;;  %14311 = vmatpush1.xpose.msra.mxu0 %v24547_v28  ;;  %v3144_v28 = vand.u32 4294901760, %v24668_v35 }
 0x11e   :  { %14375 = vmatprep.mubr.f32.mxu0 %v24519_v13  ;;  %14383 = vmatprep.subr.mxu0 %v24631_v19  ;;  %v14456_v13 = vand.u32 4294901760, %v24679_v41  ;;  %v14452_v48 = vand.u32 4294901760, %v14451_v38  ;;  %v14472_v50 = vand.u32 4294901760, %v24684_v30 }
 0x11f   :  { %v3145_v49 = vsub.f32 %v24668_v35, %v3144_v28 }
 0x120   :  { %v14457_v57 = vsub.f32 %v24679_v41, %v14456_v13  ;;  %v14473_v54 = vsub.f32 %v24684_v30, %v14472_v50 }
 0x122   :  { %v14458_v56 = vand.u32 4294901760, %v14457_v57  ;;  %v14474_v59 = vand.u32 4294901760, %v14473_v54  ;;  %v126_v57 = vld [vmem:[#allocation5 + $0x1f8] sm:$0x3f] }
 0x123   :  { %3049 = vmatmul.mubr.f32.vlgmr.msra.gmra.mrb[0].mxu1 %v24536_v36  ;;  %14377 = vmatmul.mubr.f32.vlgmr.msra.gmra.mrb[0].mxu0 %v24545_v43  ;;  %v3146_v36 = vand.u32 4294901760, %v3145_v49  ;;  %v24714_v43 = vld [vmem:[#allocation2 + $0x18] sm:$0xff] }
 0x124   :  { %3057 = vmatpush1.xpose.msra.mxu1 %v24651_v26  ;;  %3125 = vmatprep.mubr.f32.mxu1 %v3124_v45  ;;  %v248_v61 = vrot.slane %v24714_v43, %v24091_v5 }
 0x125   :  { %3141 = vmatprep.subr.mxu1 %v3140_v46  ;;  %14385 = vmatpush1.xpose.msra.mxu0 %v24657_v18 }
 0x126   :  { %14453 = vmatprep.mubr.f32.mxu0 %v14452_v48  ;;  %14469 = vmatprep.subr.mxu0 %v14468_v40  ;;  %v256_v1 = vcombine.high %v248_v61, %v248_v61  ;;  %v24758_v17 = vand.u32 4294901760, %v248_v61  ;;  %v78_v40 = vld [vmem:[#allocation5 + $0x78] sm:$0x3f] }
 0x128   :  { %v24737_v3 = vand.u32 4294901760, %v256_v1 }
 0x12a   :  { %v24747_v12 = vsub.f32 %v256_v1, %v24737_v3 }
 0x12b   :  { %3131 = vmatmul.mubr.f32.vlgmr.msra.gmra.mrb[0].mxu1 %v3130_v58  ;;  %14459 = vmatmul.mubr.f32.vlgmr.msra.gmra.mrb[0].mxu0 %v14458_v56  ;;  %v24849_v58 = vand.u32 4294901760, %v78_v40  ;;  %v24853_v56 = vand.u32 4294901760, %v126_v57 }
 0x12c   :  { %3147 = vmatpush1.xpose.msra.mxu1 %v3146_v36  ;;  %3211 = vmatprep.mubr.f32.mxu1 %v24625_v11  ;;  %v3594_v20 = vand.u32 4294901760, %v24747_v12 }
 0x12d   :  { %3220 = vmatprep.subr.mxu1 %v24639_v2  ;;  %14475 = vmatpush1.xpose.msra.mxu0 %v14474_v59  ;;  %v14922_v2 = vand.u32 4294901760, %v24755_v15  ;;  %v24871_v51 = vsub.f32 %v126_v57, %v24853_v56 }
 0x12e   :  { %14539 = vmatprep.mubr.f32.mxu0 %v24629_v60  ;;  %14548 = vmatprep.subr.mxu0 %v24649_v10  ;;  %v3595_v10 = vsub.f32 %v24747_v12, %v3594_v20 }
 0x133   :  { %3213 = vmatmul.mubr.f32.vlgmr.msra.gmra.mrb[0].mxu1 %v24646_v27  ;;  %14541 = vmatmul.mubr.f32.vlgmr.msra.gmra.mrb[0].mxu0 %v24655_v32 }
 0x134   :  { %3223 = vmatpush1.xpose.msra.mxu1 %v24668_v35  ;;  %3288 = vmatprep.mubr.f32.mxu1 %v24635_v23  ;;  %v24767_v23 = vand.u32 4294901760, %v452_v63 }
 0x135   :  { %3297 = vmatprep.subr.mxu1 %v24627_v22  ;;  %14551 = vmatpush1.xpose.msra.mxu0 %v24684_v30 }
 0x136   :  { %14616 = vmatprep.mubr.f32.mxu0 %v24643_v24  ;;  %14625 = vmatprep.subr.mxu0 %v24631_v19  ;;  %v14938_v24 = vand.u32 4294901760, %v24761_v0 }
 0x13b   :  { %3291 = vmatmul.mubr.f32.vlgmr.msra.gmra.mrb[0].mxu1 %v24662_v14  ;;  %14619 = vmatmul.mubr.f32.vlgmr.msra.gmra.mrb[0].mxu0 %v24679_v41  ;;  %v14939_v14 = vsub.f32 %v24761_v0, %v14938_v24 }
 0x13c   :  { %3299 = vmatpush1.xpose.msra.mxu1 %v24651_v26  ;;  %3365 = vmatprep.mubr.f32.mxu1 %v3122_v29 }
 0x13d   :  { %3377 = vmatprep.subr.mxu1 %v3138_v31  ;;  %14627 = vmatpush1.xpose.msra.mxu0 %v24657_v18  ;;  %v24791_v31 = vsub.f32 %v452_v63, %v24767_v23  ;;  %v14940_v30 = vand.u32 4294901760, %v14939_v14  ;;  %v125_v63 = vld [vmem:[#allocation5 + $0x1f0] sm:$0x3f] }
 0x13e   :  { %14693 = vmatprep.mubr.f32.mxu0 %v14450_v33  ;;  %14705 = vmatprep.subr.mxu0 %v14466_v34  ;;  %v3596_v34 = vand.u32 4294901760, %v3595_v10  ;;  %v24879_v55 = vand.u32 4294901760, %v125_v63 }
 0x143   :  { %3369 = vmatmul.mubr.f32.vlgmr.msra.gmra.mrb[0].mxu1 %v3128_v44  ;;  %14697 = vmatmul.mubr.f32.vlgmr.msra.gmra.mrb[0].mxu0 %v14456_v13  ;;  %v445_v13 = vcombine.high %v24719_v21, %v24719_v21  ;;  %v24861_v21 = vsub.f32 %v78_v40, %v24849_v58 }
 0x144   :  { %3381 = vmatpush1.xpose.msra.mxu1 %v3144_v28  ;;  %3445 = vmatprep.mubr.f32.mxu1 %v24625_v11 }
 0x145   :  { %3453 = vmatprep.subr.mxu1 %v24627_v22  ;;  %14709 = vmatpush1.xpose.msra.mxu0 %v14472_v50  ;;  %v3610_v22 = vand.u32 4294901760, %v24751_v53  ;;  %v459_v50 = vrot.slane %v445_v13, %v24091_v5 }
 0x146   :  { %14773 = vmatprep.mubr.f32.mxu0 %v24629_v60  ;;  %14781 = vmatprep.subr.mxu0 %v24631_v19  ;;  %v24774_v19 = vsub.f32 %v248_v61, %v24758_v17 }
 0x147   :  { %v3611_v29 = vsub.f32 %v24751_v53, %v3610_v22  ;;  %v461_v49 = vcombine.high %v459_v50, %v459_v50 }
 0x148   :  { %v3600_v33 = vand.u32 4294901760, %v24774_v19 }
 0x149   :  { %v3612_v35 = vand.u32 4294901760, %v3611_v29  ;;  %v24851_v36 = vand.u32 4294901760, %v461_v49 }
 0x14a   :  { %v3601_v41 = vsub.f32 %v24774_v19, %v3600_v33 }
 0x14b   :  { %3447 = vmatmul.mubr.f32.vlgmr.msra.gmra.mrb[0].mxu1 %v24646_v27  ;;  %14775 = vmatmul.mubr.f32.vlgmr.msra.gmra.mrb[0].mxu0 %v24655_v32  ;;  %v24865_v61 = vsub.f32 %v461_v49, %v24851_v36 }
 0x14c   :  { %3455 = vmatpush1.xpose.msra.mxu1 %v24651_v26  ;;  %3519 = vmatprep.mubr.f32.mxu1 %v24625_v11  ;;  %v24796_v11 = vsub.f32 %v123_v16, %v24769_v4  ;;  %v14923_v26 = vsub.f32 %v24755_v15, %v14922_v2  ;;  %v3602_v45 = vand.u32 4294901760, %v3601_v41 }
 0x14d   :  { %3527 = vmatprep.subr.mxu1 %v24739_v8  ;;  %14783 = vmatpush1.xpose.msra.mxu0 %v24657_v18  ;;  %v3616_v18 = vand.u32 4294901760, %v24780_v25 }
 0x14e   :  { %14847 = vmatprep.mubr.f32.mxu0 %v24629_v60  ;;  %14855 = vmatprep.subr.mxu0 %v24743_v6  ;;  %v14928_v60 = vand.u32 4294901760, %v24791_v31  ;;  %v14924_v37 = vand.u32 4294901760, %v14923_v26  ;;  %v14944_v39 = vand.u32 4294901760, %v24796_v11 }
 0x14f   :  { %v3617_v38 = vsub.f32 %v24780_v25, %v3616_v18 }
 0x150   :  { %v14929_v44 = vsub.f32 %v24791_v31, %v14928_v60  ;;  %v14945_v42 = vsub.f32 %v24796_v11, %v14944_v39 }
 0x152   :  { %v14930_v28 = vand.u32 4294901760, %v14929_v44  ;;  %v14946_v46 = vand.u32 4294901760, %v14945_v42  ;;  %v128_v44 = vld [vmem:[#allocation5 + $0x208] sm:$0x3f] }
 0x153   :  { %3521 = vmatmul.mubr.f32.vlgmr.msra.gmra.mrb[0].mxu1 %v24646_v27  ;;  %14849 = vmatmul.mubr.f32.vlgmr.msra.gmra.mrb[0].mxu0 %v24655_v32  ;;  %v3618_v27 = vand.u32 4294901760, %v3617_v38  ;;  %v241_v32 = vcombine.high %v24714_v43, %v24714_v43  ;;  %v77_v43 = vld [vmem:[#allocation5 + $0x70] sm:$0x3f] }
 0x154   :  { %3529 = vmatpush1.xpose.msra.mxu1 %v24763_v9  ;;  %3597 = vmatprep.mubr.f32.mxu1 %v3596_v34  ;;  %v24873_v62 = vand.u32 4294901760, %v77_v43 }
 0x155   :  { %3613 = vmatprep.subr.mxu1 %v3612_v35  ;;  %14857 = vmatpush1.xpose.msra.mxu0 %v24769_v4  ;;  %v255_v48 = vrot.slane %v241_v32, %v24091_v5  ;;  %v79_v32 = vld [vmem:[#allocation5 + $0x80] sm:$0x3f] }
 0x156   :  { %14925 = vmatprep.mubr.f32.mxu0 %v14924_v37  ;;  %14941 = vmatprep.subr.mxu0 %v14940_v30  ;;  %v24890_v16 = vsub.f32 %v77_v43, %v24873_v62  ;;  %v80_v30 = vld [vmem:[#allocation5 + $0x88] sm:$0x3f]  ;;  %v24985_v49 = vand.u32 4294901760, %v79_v32 }
 0x157   :  { %v257_v52 = vcombine.high %v255_v48, %v255_v48  ;;  %v24868_v1 = vand.u32 4294901760, %v255_v48 }
 0x159   :  { %v24847_v54 = vand.u32 4294901760, %v257_v52 }
 0x15b   :  { %3603 = vmatmul.mubr.f32.vlgmr.msra.gmra.mrb[0].mxu1 %v3602_v45  ;;  %14931 = vmatmul.mubr.f32.vlgmr.msra.gmra.mrb[0].mxu0 %v14930_v28  ;;  %v24857_v59 = vsub.f32 %v257_v52, %v24847_v54  ;;  %v24961_v45 = vand.u32 4294901760, %v80_v30  ;;  %v24965_v28 = vand.u32 4294901760, %v128_v44 }
 0x15c   :  { %3619 = vmatpush1.xpose.msra.mxu1 %v3618_v27  ;;  %3683 = vmatprep.mubr.f32.mxu1 %v24737_v3 }
 0x15d   :  { %3692 = vmatprep.subr.mxu1 %v24751_v53  ;;  %14947 = vmatpush1.xpose.msra.mxu0 %v14946_v46  ;;  %v4066_v7 = vand.u32 4294901760, %v24857_v59  ;;  %v15394_v53 = vand.u32 4294901760, %v24865_v61  ;;  %v24973_v13 = vsub.f32 %v80_v30, %v24961_v45  ;;  %v24983_v40 = vsub.f32 %v128_v44, %v24965_v28 }
 0x15e   :  { %15011 = vmatprep.mubr.f32.mxu0 %v24741_v47  ;;  %15020 = vmatprep.subr.mxu0 %v24761_v0 }
 0x15f   :  { %v4067_v0 = vsub.f32 %v24857_v59, %v4066_v7 }
 0x163   :  { %3685 = vmatmul.mubr.f32.vlgmr.msra.gmra.mrb[0].mxu1 %v24758_v17  ;;  %15013 = vmatmul.mubr.f32.vlgmr.msra.gmra.mrb[0].mxu0 %v24767_v23 }
 0x164   :  { %3695 = vmatpush1.xpose.msra.mxu1 %v24780_v25  ;;  %3760 = vmatprep.mubr.f32.mxu1 %v24747_v12  ;;  %v24877_v12 = vand.u32 4294901760, %v459_v50 }
 0x165   :  { %3769 = vmatprep.subr.mxu1 %v24739_v8  ;;  %15023 = vmatpush1.xpose.msra.mxu0 %v24796_v11 }
 0x166   :  { %15088 = vmatprep.mubr.f32.mxu0 %v24755_v15  ;;  %15097 = vmatprep.subr.mxu0 %v24743_v6  ;;  %v15410_v15 = vand.u32 4294901760, %v24871_v51 }
 0x16b   :  { %3763 = vmatmul.mubr.f32.vlgmr.msra.gmra.mrb[0].mxu1 %v24774_v19  ;;  %15091 = vmatmul.mubr.f32.vlgmr.msra.gmra.mrb[0].mxu0 %v24791_v31  ;;  %v15411_v19 = vsub.f32 %v24871_v51, %v15410_v15 }
 0x16c   :  { %3771 = vmatpush1.xpose.msra.mxu1 %v24763_v9  ;;  %3837 = vmatprep.mubr.f32.mxu1 %v3594_v20 }
 0x16d   :  { %3849 = vmatprep.subr.mxu1 %v3610_v22  ;;  %15099 = vmatpush1.xpose.msra.mxu0 %v24769_v4  ;;  %v24901_v22 = vsub.f32 %v459_v50, %v24877_v12  ;;  %v15412_v11 = vand.u32 4294901760, %v15411_v19  ;;  %v127_v50 = vld [vmem:[#allocation5 + $0x200] sm:$0x3f] }
 0x16e   :  { %15165 = vmatprep.mubr.f32.mxu0 %v14922_v2  ;;  %15177 = vmatprep.subr.mxu0 %v14938_v24  ;;  %v4068_v24 = vand.u32 4294901760, %v4067_v0  ;;  %v24991_v43 = vand.u32 4294901760, %v127_v50 }
 0x173   :  { %3841 = vmatmul.mubr.f32.vlgmr.msra.gmra.mrb[0].mxu1 %v3600_v33  ;;  %15169 = vmatmul.mubr.f32.vlgmr.msra.gmra.mrb[0].mxu0 %v14928_v60  ;;  %v24941_v60 = vld [vmem:[#allocation2 + $0x80] sm:$0xff] }
 0x174   :  { %3853 = vmatpush1.xpose.msra.mxu1 %v3616_v18  ;;  %3917 = vmatprep.mubr.f32.mxu1 %v24737_v3 }
 0x175   :  { %3925 = vmatprep.subr.mxu1 %v24739_v8  ;;  %15181 = vmatpush1.xpose.msra.mxu0 %v14944_v39  ;;  %v4082_v8 = vand.u32 4294901760, %v24861_v21  ;;  %v469_v39 = vrot.slane %v24941_v60, %v24091_v5 }
 0x176   :  { %15245 = vmatprep.mubr.f32.mxu0 %v24741_v47  ;;  %15253 = vmatprep.subr.mxu0 %v24743_v6  ;;  %v24884_v6 = vsub.f32 %v255_v48, %v24868_v1 }
 0x177   :  { %v4083_v20 = vsub.f32 %v24861_v21, %v4082_v8  ;;  %v477_v38 = vcombine.high %v469_v39, %v469_v39 }
 0x178   :  { %v4072_v2 = vand.u32 4294901760, %v24884_v6 }
 0x179   :  { %v4084_v25 = vand.u32 4294901760, %v4083_v20  ;;  %v24963_v27 = vand.u32 4294901760, %v477_v38 }
 0x17a   :  { %v4073_v31 = vsub.f32 %v24884_v6, %v4072_v2 }
 0x17b   :  { %3919 = vmatmul.mubr.f32.vlgmr.msra.gmra.mrb[0].mxu1 %v24758_v17  ;;  %15247 = vmatmul.mubr.f32.vlgmr.msra.gmra.mrb[0].mxu0 %v24767_v23  ;;  %v24977_v48 = vsub.f32 %v477_v38, %v24963_v27 }
 0x17c   :  { %3927 = vmatpush1.xpose.msra.mxu1 %v24763_v9  ;;  %3991 = vmatprep.mubr.f32.mxu1 %v24737_v3  ;;  %v24906_v3 = vsub.f32 %v125_v63, %v24879_v55  ;;  %v15395_v9 = vsub.f32 %v24865_v61, %v15394_v53  ;;  %v4074_v34 = vand.u32 4294901760, %v4073_v31  ;;  %v25002_v63 = vsub.f32 %v79_v32, %v24985_v49 }
 0x17d   :  { %3999 = vmatprep.subr.mxu1 %v24849_v58  ;;  %15255 = vmatpush1.xpose.msra.mxu0 %v24769_v4  ;;  %v4088_v4 = vand.u32 4294901760, %v24890_v16 }
 0x17e   :  { %15319 = vmatprep.mubr.f32.mxu0 %v24741_v47  ;;  %15327 = vmatprep.subr.mxu0 %v24853_v56  ;;  %v15400_v47 = vand.u32 4294901760, %v24901_v22  ;;  %v15396_v10 = vand.u32 4294901760, %v15395_v9  ;;  %v15416_v29 = vand.u32 4294901760, %v24906_v3 }
 0x17f   :  { %v4089_v26 = vsub.f32 %v24890_v16, %v4088_v4 }
 0x180   :  { %v15401_v33 = vsub.f32 %v24901_v22, %v15400_v47  ;;  %v15417_v14 = vsub.f32 %v24906_v3, %v15416_v29 }
 0x182   :  { %v15402_v18 = vand.u32 4294901760, %v15401_v33  ;;  %v15418_v35 = vand.u32 4294901760, %v15417_v14  ;;  %v130_v33 = vld [vmem:[#allocation5 + $0x218] sm:$0x3f] }
 0x183   :  { %3993 = vmatmul.mubr.f32.vlgmr.msra.gmra.mrb[0].mxu1 %v24758_v17  ;;  %15321 = vmatmul.mubr.f32.vlgmr.msra.gmra.mrb[0].mxu0 %v24767_v23  ;;  %v4090_v17 = vand.u32 4294901760, %v4089_v26  ;;  %v24936_v23 = vld [vmem:[#allocation2 + $0x20] sm:$0xff] }
 0x184   :  { %4001 = vmatpush1.xpose.msra.mxu1 %v24873_v62  ;;  %4069 = vmatprep.mubr.f32.mxu1 %v4068_v24  ;;  %v265_v37 = vrot.slane %v24936_v23, %v24091_v5 }
 0x185   :  { %4085 = vmatprep.subr.mxu1 %v4084_v25  ;;  %15329 = vmatpush1.xpose.msra.mxu0 %v24879_v55 }
 0x186   :  { %15397 = vmatprep.mubr.f32.mxu0 %v15396_v10  ;;  %15413 = vmatprep.subr.mxu0 %v15412_v11  ;;  %v273_v41 = vcombine.high %v265_v37, %v265_v37  ;;  %v24980_v52 = vand.u32 4294901760, %v265_v37  ;;  %v82_v11 = vld [vmem:[#allocation5 + $0x98] sm:$0x3f] }
 0x188   :  { %v24959_v42 = vand.u32 4294901760, %v273_v41 }
 0x18a   :  { %v24969_v46 = vsub.f32 %v273_v41, %v24959_v42 }
 0x18b   :  { %4075 = vmatmul.mubr.f32.vlgmr.msra.gmra.mrb[0].mxu1 %v4074_v34  ;;  %15403 = vmatmul.mubr.f32.vlgmr.msra.gmra.mrb[0].mxu0 %v15402_v18  ;;  %v25071_v34 = vand.u32 4294901760, %v82_v11  ;;  %v25075_v18 = vand.u32 4294901760, %v130_v33 }
 0x18c   :  { %4091 = vmatpush1.xpose.msra.mxu1 %v4090_v17  ;;  %4155 = vmatprep.mubr.f32.mxu1 %v24847_v54  ;;  %v4538_v57 = vand.u32 4294901760, %v24969_v46 }
 0x18d   :  { %4164 = vmatprep.subr.mxu1 %v24861_v21  ;;  %15419 = vmatpush1.xpose.msra.mxu0 %v15418_v35  ;;  %v15866_v21 = vand.u32 4294901760, %v24977_v48  ;;  %v25093_v30 = vsub.f32 %v130_v33, %v25075_v18 }
 0x18e   :  { %15483 = vmatprep.mubr.f32.mxu0 %v24851_v36  ;;  %15492 = vmatprep.subr.mxu0 %v24871_v51  ;;  %v4539_v51 = vsub.f32 %v24969_v46, %v4538_v57 }
 0x193   :  { %4157 = vmatmul.mubr.f32.vlgmr.msra.gmra.mrb[0].mxu1 %v24868_v1  ;;  %15485 = vmatmul.mubr.f32.vlgmr.msra.gmra.mrb[0].mxu0 %v24877_v12 }
 0x194   :  { %4167 = vmatpush1.xpose.msra.mxu1 %v24890_v16  ;;  %4232 = vmatprep.mubr.f32.mxu1 %v24857_v59  ;;  %v24989_v59 = vand.u32 4294901760, %v469_v39 }
 0x195   :  { %4241 = vmatprep.subr.mxu1 %v24849_v58  ;;  %15495 = vmatpush1.xpose.msra.mxu0 %v24906_v3 }
 0x196   :  { %15560 = vmatprep.mubr.f32.mxu0 %v24865_v61  ;;  %15569 = vmatprep.subr.mxu0 %v24853_v56  ;;  %v15882_v61 = vand.u32 4294901760, %v24983_v40 }
 0x19b   :  { %4235 = vmatmul.mubr.f32.vlgmr.msra.gmra.mrb[0].mxu1 %v24884_v6  ;;  %15563 = vmatmul.mubr.f32.vlgmr.msra.gmra.mrb[0].mxu0 %v24901_v22  ;;  %v15883_v6 = vsub.f32 %v24983_v40, %v15882_v61 }
 0x19c   :  { %4243 = vmatpush1.xpose.msra.mxu1 %v24873_v62  ;;  %4309 = vmatprep.mubr.f32.mxu1 %v4066_v7 }
 0x19d   :  { %4321 = vmatprep.subr.mxu1 %v4082_v8  ;;  %15571 = vmatpush1.xpose.msra.mxu0 %v24879_v55  ;;  %v25013_v8 = vsub.f32 %v469_v39, %v24989_v59  ;;  %v15884_v3 = vand.u32 4294901760, %v15883_v6  ;;  %v129_v39 = vld [vmem:[#allocation5 + $0x210] sm:$0x3f] }
 0x19e   :  { %15637 = vmatprep.mubr.f32.mxu0 %v15394_v53  ;;  %15649 = vmatprep.subr.mxu0 %v15410_v15  ;;  %v4540_v15 = vand.u32 4294901760, %v4539_v51  ;;  %v25101_v32 = vand.u32 4294901760, %v129_v39 }
 0x1a3   :  { %4313 = vmatmul.mubr.f32.vlgmr.msra.gmra.mrb[0].mxu1 %v4072_v2  ;;  %15641 = vmatmul.mubr.f32.vlgmr.msra.gmra.mrb[0].mxu0 %v15400_v47  ;;  %v462_v47 = vcombine.high %v24941_v60, %v24941_v60  ;;  %v25083_v60 = vsub.f32 %v82_v11, %v25071_v34 }
 0x1a4   :  { %4325 = vmatpush1.xpose.msra.mxu1 %v4088_v4  ;;  %4389 = vmatprep.mubr.f32.mxu1 %v24847_v54 }
 0x1a5   :  { %4397 = vmatprep.subr.mxu1 %v24849_v58  ;;  %15653 = vmatpush1.xpose.msra.mxu0 %v15416_v29  ;;  %v4554_v58 = vand.u32 4294901760, %v24973_v13  ;;  %v476_v29 = vrot.slane %v462_v47, %v24091_v5 }
 0x1a6   :  { %15717 = vmatprep.mubr.f32.mxu0 %v24851_v36  ;;  %15725 = vmatprep.subr.mxu0 %v24853_v56  ;;  %v24996_v56 = vsub.f32 %v265_v37, %v24980_v52 }
 0x1a7   :  { %v4555_v7 = vsub.f32 %v24973_v13, %v4554_v58  ;;  %v478_v26 = vcombine.high %v476_v29, %v476_v29 }
 0x1a8   :  { %v4544_v53 = vand.u32 4294901760, %v24996_v56 }
 0x1a9   :  { %v4556_v16 = vand.u32 4294901760, %v4555_v7  ;;  %v25073_v17 = vand.u32 4294901760, %v478_v26 }
 0x1aa   :  { %v4545_v22 = vsub.f32 %v24996_v56, %v4544_v53 }
 0x1ab   :  { %4391 = vmatmul.mubr.f32.vlgmr.msra.gmra.mrb[0].mxu1 %v24868_v1  ;;  %15719 = vmatmul.mubr.f32.vlgmr.msra.gmra.mrb[0].mxu0 %v24877_v12  ;;  %v25087_v37 = vsub.f32 %v478_v26, %v25073_v17 }
 0x1ac   :  { %4399 = vmatpush1.xpose.msra.mxu1 %v24873_v62  ;;  %4463 = vmatprep.mubr.f32.mxu1 %v24847_v54  ;;  %v25018_v54 = vsub.f32 %v127_v50, %v24991_v43  ;;  %v15867_v62 = vsub.f32 %v24977_v48, %v15866_v21  ;;  %v4546_v24 = vand.u32 4294901760, %v4545_v22 }
 0x1ad   :  { %4471 = vmatprep.subr.mxu1 %v24961_v45  ;;  %15727 = vmatpush1.xpose.msra.mxu0 %v24879_v55  ;;  %v4560_v55 = vand.u32 4294901760, %v25002_v63 }
 0x1ae   :  { %15791 = vmatprep.mubr.f32.mxu0 %v24851_v36  ;;  %15799 = vmatprep.subr.mxu0 %v24965_v28  ;;  %v15872_v36 = vand.u32 4294901760, %v25013_v8  ;;  %v15868_v0 = vand.u32 4294901760, %v15867_v62  ;;  %v15888_v20 = vand.u32 4294901760, %v25018_v54 }
 0x1af   :  { %v4561_v9 = vsub.f32 %v25002_v63, %v4560_v55 }
 0x1b0   :  { %v15873_v2 = vsub.f32 %v25013_v8, %v15872_v36  ;;  %v15889_v19 = vsub.f32 %v25018_v54, %v15888_v20 }
 0x1b2   :  { %v15874_v4 = vand.u32 4294901760, %v15873_v2  ;;  %v15890_v25 = vand.u32 4294901760, %v15889_v19  ;;  %v132_v2 = vld [vmem:[#allocation5 + $0x228] sm:$0x3f] }
 0x1b3   :  { %4465 = vmatmul.mubr.f32.vlgmr.msra.gmra.mrb[0].mxu1 %v24868_v1  ;;  %15793 = vmatmul.mubr.f32.vlgmr.msra.gmra.mrb[0].mxu0 %v24877_v12  ;;  %v4562_v1 = vand.u32 4294901760, %v4561_v9  ;;  %v258_v12 = vcombine.high %v24936_v23, %v24936_v23  ;;  %v81_v23 = vld [vmem:[#allocation5 + $0x90] sm:$0x3f] }
 0x1b4   :  { %4473 = vmatpush1.xpose.msra.mxu1 %v24985_v49  ;;  %4541 = vmatprep.mubr.f32.mxu1 %v4540_v15  ;;  %v25095_v38 = vand.u32 4294901760, %v81_v23 }
 0x1b5   :  { %4557 = vmatprep.subr.mxu1 %v4556_v16  ;;  %15801 = vmatpush1.xpose.msra.mxu0 %v24991_v43  ;;  %v272_v10 = vrot.slane %v258_v12, %v24091_v5  ;;  %v83_v12 = vld [vmem:[#allocation5 + $0xa0] sm:$0x3f] }
 0x1b6   :  { %15869 = vmatprep.mubr.f32.mxu0 %v15868_v0  ;;  %15885 = vmatprep.subr.mxu0 %v15884_v3  ;;  %v25112_v50 = vsub.f32 %v81_v23, %v25095_v38  ;;  %v84_v3 = vld [vmem:[#allocation5 + $0xa8] sm:$0x3f]  ;;  %v25207_v26 = vand.u32 4294901760, %v83_v12 }
 0x1b7   :  { %v274_v31 = vcombine.high %v272_v10, %v272_v10  ;;  %v25090_v41 = vand.u32 4294901760, %v272_v10 }
 0x1b9   :  { %v25069_v14 = vand.u32 4294901760, %v274_v31 }
 0x1bb   :  { %4547 = vmatmul.mubr.f32.vlgmr.msra.gmra.mrb[0].mxu1 %v4546_v24  ;;  %15875 = vmatmul.mubr.f32.vlgmr.msra.gmra.mrb[0].mxu0 %v15874_v4  ;;  %v25079_v35 = vsub.f32 %v274_v31, %v25069_v14  ;;  %v25183_v24 = vand.u32 4294901760, %v84_v3  ;;  %v25187_v4 = vand.u32 4294901760, %v132_v2 }
 0x1bc   :  { %4563 = vmatpush1.xpose.msra.mxu1 %v4562_v1  ;;  %4627 = vmatprep.mubr.f32.mxu1 %v24959_v42 }
 0x1bd   :  { %4636 = vmatprep.subr.mxu1 %v24973_v13  ;;  %15891 = vmatpush1.xpose.msra.mxu0 %v15890_v25  ;;  %v5010_v44 = vand.u32 4294901760, %v25079_v35  ;;  %v16338_v13 = vand.u32 4294901760, %v25087_v37  ;;  %v25195_v47 = vsub.f32 %v84_v3, %v25183_v24  ;;  %v25205_v11 = vsub.f32 %v132_v2, %v25187_v4 }
 0x1be   :  { %15955 = vmatprep.mubr.f32.mxu0 %v24963_v27  ;;  %15964 = vmatprep.subr.mxu0 %v24983_v40 }
 0x1bf   :  { %v5011_v40 = vsub.f32 %v25079_v35, %v5010_v44 }
 0x1c3   :  { %4629 = vmatmul.mubr.f32.vlgmr.msra.gmra.mrb[0].mxu1 %v24980_v52  ;;  %15957 = vmatmul.mubr.f32.vlgmr.msra.gmra.mrb[0].mxu0 %v24989_v59 }
 0x1c4   :  { %4639 = vmatpush1.xpose.msra.mxu1 %v25002_v63  ;;  %4704 = vmatprep.mubr.f32.mxu1 %v24969_v46  ;;  %v25099_v46 = vand.u32 4294901760, %v476_v29 }
 0x1c5   :  { %4713 = vmatprep.subr.mxu1 %v24961_v45  ;;  %15967 = vmatpush1.xpose.msra.mxu0 %v25018_v54 }
 0x1c6   :  { %16032 = vmatprep.mubr.f32.mxu0 %v24977_v48  ;;  %16041 = vmatprep.subr.mxu0 %v24965_v28  ;;  %v16354_v48 = vand.u32 4294901760, %v25093_v30 }
 0x1cb   :  { %4707 = vmatmul.mubr.f32.vlgmr.msra.gmra.mrb[0].mxu1 %v24996_v56  ;;  %16035 = vmatmul.mubr.f32.vlgmr.msra.gmra.mrb[0].mxu0 %v25013_v8  ;;  %v16355_v56 = vsub.f32 %v25093_v30, %v16354_v48 }
 0x1cc   :  { %4715 = vmatpush1.xpose.msra.mxu1 %v24985_v49  ;;  %4781 = vmatprep.mubr.f32.mxu1 %v4538_v57 }
 0x1cd   :  { %4793 = vmatprep.subr.mxu1 %v4554_v58  ;;  %16043 = vmatpush1.xpose.msra.mxu0 %v24991_v43  ;;  %v25123_v58 = vsub.f32 %v476_v29, %v25099_v46  ;;  %v16356_v54 = vand.u32 4294901760, %v16355_v56  ;;  %v131_v29 = vld [vmem:[#allocation5 + $0x220] sm:$0x3f] }
 0x1ce   :  { %16109 = vmatprep.mubr.f32.mxu0 %v15866_v21  ;;  %16121 = vmatprep.subr.mxu0 %v15882_v61  ;;  %v5012_v61 = vand.u32 4294901760, %v5011_v40  ;;  %v25213_v23 = vand.u32 4294901760, %v131_v29 }
 0x1d3   :  { %4785 = vmatmul.mubr.f32.vlgmr.msra.gmra.mrb[0].mxu1 %v4544_v53  ;;  %16113 = vmatmul.mubr.f32.vlgmr.msra.gmra.mrb[0].mxu0 %v15872_v36  ;;  %v25163_v36 = vld [vmem:[#allocation2 + $0x88] sm:$0xff] }
 0x1d4   :  { %4797 = vmatpush1.xpose.msra.mxu1 %v4560_v55  ;;  %4861 = vmatprep.mubr.f32.mxu1 %v24959_v42 }
 0x1d5   :  { %4869 = vmatprep.subr.mxu1 %v24961_v45  ;;  %16125 = vmatpush1.xpose.msra.mxu0 %v15888_v20  ;;  %v5026_v45 = vand.u32 4294901760, %v25083_v60  ;;  %v486_v20 = vrot.slane %v25163_v36, %v24091_v5 }
 0x1d6   :  { %16189 = vmatprep.mubr.f32.mxu0 %v24963_v27  ;;  %16197 = vmatprep.subr.mxu0 %v24965_v28  ;;  %v25106_v28 = vsub.f32 %v272_v10, %v25090_v41 }
 0x1d7   :  { %v5027_v57 = vsub.f32 %v25083_v60, %v5026_v45  ;;  %v494_v9 = vcombine.high %v486_v20, %v486_v20 }
 0x1d8   :  { %v5016_v21 = vand.u32 4294901760, %v25106_v28 }
 0x1d9   :  { %v5028_v63 = vand.u32 4294901760, %v5027_v57  ;;  %v25185_v1 = vand.u32 4294901760, %v494_v9 }
 0x1da   :  { %v5017_v8 = vsub.f32 %v25106_v28, %v5016_v21 }
 0x1db   :  { %4863 = vmatmul.mubr.f32.vlgmr.msra.gmra.mrb[0].mxu1 %v24980_v52  ;;  %16191 = vmatmul.mubr.f32.vlgmr.msra.gmra.mrb[0].mxu0 %v24989_v59  ;;  %v25199_v10 = vsub.f32 %v494_v9, %v25185_v1 }
 0x1dc   :  { %4871 = vmatpush1.xpose.msra.mxu1 %v24985_v49  ;;  %4935 = vmatprep.mubr.f32.mxu1 %v24959_v42  ;;  %v25128_v42 = vsub.f32 %v129_v39, %v25101_v32  ;;  %v16339_v49 = vsub.f32 %v25087_v37, %v16338_v13  ;;  %v5018_v15 = vand.u32 4294901760, %v5017_v8  ;;  %v25224_v39 = vsub.f32 %v83_v12, %v25207_v26 }
 0x1dd   :  { %4943 = vmatprep.subr.mxu1 %v25071_v34  ;;  %16199 = vmatpush1.xpose.msra.mxu0 %v24991_v43  ;;  %v5032_v43 = vand.u32 4294901760, %v25112_v50 }
 0x1de   :  { %16263 = vmatprep.mubr.f32.mxu0 %v24963_v27  ;;  %16271 = vmatprep.subr.mxu0 %v25075_v18  ;;  %v16344_v27 = vand.u32 4294901760, %v25123_v58  ;;  %v16340_v51 = vand.u32 4294901760, %v16339_v49  ;;  %v16360_v7 = vand.u32 4294901760, %v25128_v42 }
 0x1df   :  { %v5033_v62 = vsub.f32 %v25112_v50, %v5032_v43 }
 0x1e0   :  { %v16345_v53 = vsub.f32 %v25123_v58, %v16344_v27  ;;  %v16361_v6 = vsub.f32 %v25128_v42, %v16360_v7 }
 0x1e2   :  { %v16346_v55 = vand.u32 4294901760, %v16345_v53  ;;  %v16362_v16 = vand.u32 4294901760, %v16361_v6  ;;  %v134_v53 = vld [vmem:[#allocation5 + $0x238] sm:$0x3f] }
 0x1e3   :  { %4937 = vmatmul.mubr.f32.vlgmr.msra.gmra.mrb[0].mxu1 %v24980_v52  ;;  %16265 = vmatmul.mubr.f32.vlgmr.msra.gmra.mrb[0].mxu0 %v24989_v59  ;;  %v5034_v52 = vand.u32 4294901760, %v5033_v62  ;;  %v25158_v59 = vld [vmem:[#allocation2 + $0x28] sm:$0xff] }
 0x1e4   :  { %4945 = vmatpush1.xpose.msra.mxu1 %v25095_v38  ;;  %5013 = vmatprep.mubr.f32.mxu1 %v5012_v61  ;;  %v282_v0 = vrot.slane %v25158_v59, %v24091_v5 }
 0x1e5   :  { %5029 = vmatprep.subr.mxu1 %v5028_v63  ;;  %16273 = vmatpush1.xpose.msra.mxu0 %v25101_v32 }
 0x1e6   :  { %16341 = vmatprep.mubr.f32.mxu0 %v16340_v51  ;;  %16357 = vmatprep.subr.mxu0 %v16356_v54  ;;  %v290_v22 = vcombine.high %v282_v0, %v282_v0  ;;  %v25202_v31 = vand.u32 4294901760, %v282_v0  ;;  %v86_v54 = vld [vmem:[#allocation5 + $0xb8] sm:$0x3f] }
 0x1e8   :  { %v25181_v19 = vand.u32 4294901760, %v290_v22 }
 0x1ea   :  { %v25191_v25 = vsub.f32 %v290_v22, %v25181_v19 }
 0x1eb   :  { %5019 = vmatmul.mubr.f32.vlgmr.msra.gmra.mrb[0].mxu1 %v5018_v15  ;;  %16347 = vmatmul.mubr.f32.vlgmr.msra.gmra.mrb[0].mxu0 %v16346_v55  ;;  %v25293_v15 = vand.u32 4294901760, %v86_v54  ;;  %v25297_v55 = vand.u32 4294901760, %v134_v53 }
 0x1ec   :  { %5035 = vmatpush1.xpose.msra.mxu1 %v5034_v52  ;;  %5099 = vmatprep.mubr.f32.mxu1 %v25069_v14  ;;  %v5482_v33 = vand.u32 4294901760, %v25191_v25 }
 0x1ed   :  { %5108 = vmatprep.subr.mxu1 %v25083_v60  ;;  %16363 = vmatpush1.xpose.msra.mxu0 %v16362_v16  ;;  %v16810_v60 = vand.u32 4294901760, %v25199_v10  ;;  %v25315_v3 = vsub.f32 %v134_v53, %v25297_v55 }
 0x1ee   :  { %16427 = vmatprep.mubr.f32.mxu0 %v25073_v17  ;;  %16436 = vmatprep.subr.mxu0 %v25093_v30  ;;  %v5483_v30 = vsub.f32 %v25191_v25, %v5482_v33 }
 0x1f3   :  { %5101 = vmatmul.mubr.f32.vlgmr.msra.gmra.mrb[0].mxu1 %v25090_v41  ;;  %16429 = vmatmul.mubr.f32.vlgmr.msra.gmra.mrb[0].mxu0 %v25099_v46 }
 0x1f4   :  { %5111 = vmatpush1.xpose.msra.mxu1 %v25112_v50  ;;  %5176 = vmatprep.mubr.f32.mxu1 %v25079_v35  ;;  %v25211_v35 = vand.u32 4294901760, %v486_v20 }
 0x1f5   :  { %5185 = vmatprep.subr.mxu1 %v25071_v34  ;;  %16439 = vmatpush1.xpose.msra.mxu0 %v25128_v42 }
 0x1f6   :  { %16504 = vmatprep.mubr.f32.mxu0 %v25087_v37  ;;  %16513 = vmatprep.subr.mxu0 %v25075_v18  ;;  %v16826_v37 = vand.u32 4294901760, %v25205_v11 }
 0x1fb   :  { %5179 = vmatmul.mubr.f32.vlgmr.msra.gmra.mrb[0].mxu1 %v25106_v28  ;;  %16507 = vmatmul.mubr.f32.vlgmr.msra.gmra.mrb[0].mxu0 %v25123_v58  ;;  %v16827_v28 = vsub.f32 %v25205_v11, %v16826_v37 }
 0x1fc   :  { %5187 = vmatpush1.xpose.msra.mxu1 %v25095_v38  ;;  %5253 = vmatprep.mubr.f32.mxu1 %v5010_v44 }
 0x1fd   :  { %5265 = vmatprep.subr.mxu1 %v5026_v45  ;;  %16515 = vmatpush1.xpose.msra.mxu0 %v25101_v32  ;;  %v25235_v45 = vsub.f32 %v486_v20, %v25211_v35  ;;  %v16828_v42 = vand.u32 4294901760, %v16827_v28  ;;  %v133_v20 = vld [vmem:[#allocation5 + $0x230] sm:$0x3f] }
 0x1fe   :  { %16581 = vmatprep.mubr.f32.mxu0 %v16338_v13  ;;  %16593 = vmatprep.subr.mxu0 %v16354_v48  ;;  %v5484_v48 = vand.u32 4294901760, %v5483_v30  ;;  %v25323_v12 = vand.u32 4294901760, %v133_v20 }
 0x203   :  { %5257 = vmatmul.mubr.f32.vlgmr.msra.gmra.mrb[0].mxu1 %v5016_v21  ;;  %16585 = vmatmul.mubr.f32.vlgmr.msra.gmra.mrb[0].mxu0 %v16344_v27  ;;  %v479_v27 = vcombine.high %v25163_v36, %v25163_v36  ;;  %v25305_v36 = vsub.f32 %v86_v54, %v25293_v15 }
 0x204   :  { %5269 = vmatpush1.xpose.msra.mxu1 %v5032_v43  ;;  %5333 = vmatprep.mubr.f32.mxu1 %v25069_v14 }
 0x205   :  { %5341 = vmatprep.subr.mxu1 %v25071_v34  ;;  %16597 = vmatpush1.xpose.msra.mxu0 %v16360_v7  ;;  %v5498_v34 = vand.u32 4294901760, %v25195_v47  ;;  %v493_v7 = vrot.slane %v479_v27, %v24091_v5 }
 0x206   :  { %16661 = vmatprep.mubr.f32.mxu0 %v25073_v17  ;;  %16669 = vmatprep.subr.mxu0 %v25075_v18  ;;  %v25218_v18 = vsub.f32 %v282_v0, %v25202_v31 }
 0x207   :  { %v5499_v44 = vsub.f32 %v25195_v47, %v5498_v34  ;;  %v495_v62 = vcombine.high %v493_v7, %v493_v7 }
 0x208   :  { %v5488_v13 = vand.u32 4294901760, %v25218_v18 }
 0x209   :  { %v5500_v50 = vand.u32 4294901760, %v5499_v44  ;;  %v25295_v52 = vand.u32 4294901760, %v495_v62 }
 0x20a   :  { %v5489_v58 = vsub.f32 %v25218_v18, %v5488_v13 }
 0x20b   :  { %5335 = vmatmul.mubr.f32.vlgmr.msra.gmra.mrb[0].mxu1 %v25090_v41  ;;  %16663 = vmatmul.mubr.f32.vlgmr.msra.gmra.mrb[0].mxu0 %v25099_v46  ;;  %v25309_v0 = vsub.f32 %v495_v62, %v25295_v52 }
 0x20c   :  { %5343 = vmatpush1.xpose.msra.mxu1 %v25095_v38  ;;  %5407 = vmatprep.mubr.f32.mxu1 %v25069_v14  ;;  %v25240_v14 = vsub.f32 %v131_v29, %v25213_v23  ;;  %v16811_v38 = vsub.f32 %v25199_v10, %v16810_v60  ;;  %v5490_v61 = vand.u32 4294901760, %v5489_v58 }
 0x20d   :  { %5415 = vmatprep.subr.mxu1 %v25183_v24  ;;  %16671 = vmatpush1.xpose.msra.mxu0 %v25101_v32  ;;  %v5504_v32 = vand.u32 4294901760, %v25224_v39 }
 0x20e   :  { %16735 = vmatprep.mubr.f32.mxu0 %v25073_v17  ;;  %16743 = vmatprep.subr.mxu0 %v25187_v4  ;;  %v16816_v17 = vand.u32 4294901760, %v25235_v45  ;;  %v16812_v40 = vand.u32 4294901760, %v16811_v38  ;;  %v16832_v57 = vand.u32 4294901760, %v25240_v14 }
 0x20f   :  { %v5505_v49 = vsub.f32 %v25224_v39, %v5504_v32 }
 0x210   :  { %v16817_v21 = vsub.f32 %v25235_v45, %v16816_v17  ;;  %v16833_v56 = vsub.f32 %v25240_v14, %v16832_v57 }
 0x212   :  { %v16818_v43 = vand.u32 4294901760, %v16817_v21  ;;  %v16834_v63 = vand.u32 4294901760, %v16833_v56  ;;  %v136_v21 = vld [vmem:[#allocation5 + $0x248] sm:$0x3f] }
 0x213   :  { %5409 = vmatmul.mubr.f32.vlgmr.msra.gmra.mrb[0].mxu1 %v25090_v41  ;;  %16737 = vmatmul.mubr.f32.vlgmr.msra.gmra.mrb[0].mxu0 %v25099_v46  ;;  %v5506_v41 = vand.u32 4294901760, %v5505_v49  ;;  %v275_v46 = vcombine.high %v25158_v59, %v25158_v59  ;;  %v85_v59 = vld [vmem:[#allocation5 + $0xb0] sm:$0x3f] }
 0x214   :  { %5417 = vmatpush1.xpose.msra.mxu1 %v25207_v26  ;;  %5485 = vmatprep.mubr.f32.mxu1 %v5484_v48  ;;  %v25317_v9 = vand.u32 4294901760, %v85_v59 }
 0x215   :  { %5501 = vmatprep.subr.mxu1 %v5500_v50  ;;  %16745 = vmatpush1.xpose.msra.mxu0 %v25213_v23  ;;  %v289_v51 = vrot.slane %v275_v46, %v24091_v5  ;;  %v87_v46 = vld [vmem:[#allocation5 + $0xc0] sm:$0x3f] }
 0x216   :  { %16813 = vmatprep.mubr.f32.mxu0 %v16812_v40  ;;  %16829 = vmatprep.subr.mxu0 %v16828_v42  ;;  %v25334_v29 = vsub.f32 %v85_v59, %v25317_v9  ;;  %v88_v42 = vld [vmem:[#allocation5 + $0xc8] sm:$0x3f]  ;;  %v25429_v62 = vand.u32 4294901760, %v87_v46 }
 0x217   :  { %v291_v8 = vcombine.high %v289_v51, %v289_v51  ;;  %v25312_v22 = vand.u32 4294901760, %v289_v51 }
 0x219   :  { %v25291_v6 = vand.u32 4294901760, %v291_v8 }
 0x21b   :  { %5491 = vmatmul.mubr.f32.vlgmr.msra.gmra.mrb[0].mxu1 %v5490_v61  ;;  %16819 = vmatmul.mubr.f32.vlgmr.msra.gmra.mrb[0].mxu0 %v16818_v43  ;;  %v25301_v16 = vsub.f32 %v291_v8, %v25291_v6  ;;  %v25405_v61 = vand.u32 4294901760, %v88_v42  ;;  %v25409_v43 = vand.u32 4294901760, %v136_v21 }
 0x21c   :  { %5507 = vmatpush1.xpose.msra.mxu1 %v5506_v41  ;;  %5571 = vmatprep.mubr.f32.mxu1 %v25181_v19 }
 0x21d   :  { %5580 = vmatprep.subr.mxu1 %v25195_v47  ;;  %16835 = vmatpush1.xpose.msra.mxu0 %v16834_v63  ;;  %v5954_v2 = vand.u32 4294901760, %v25301_v16  ;;  %v17282_v47 = vand.u32 4294901760, %v25309_v0  ;;  %v25417_v27 = vsub.f32 %v88_v42, %v25405_v61  ;;  %v25427_v54 = vsub.f32 %v136_v21, %v25409_v43 }
 0x21e   :  { %16899 = vmatprep.mubr.f32.mxu0 %v25185_v1  ;;  %16908 = vmatprep.subr.mxu0 %v25205_v11 }
 0x21f   :  { %v5955_v11 = vsub.f32 %v25301_v16, %v5954_v2 }
 0x223   :  { %5573 = vmatmul.mubr.f32.vlgmr.msra.gmra.mrb[0].mxu1 %v25202_v31  ;;  %16901 = vmatmul.mubr.f32.vlgmr.msra.gmra.mrb[0].mxu0 %v25211_v35 }
 0x224   :  { %5583 = vmatpush1.xpose.msra.mxu1 %v25224_v39  ;;  %5648 = vmatprep.mubr.f32.mxu1 %v25191_v25  ;;  %v25321_v25 = vand.u32 4294901760, %v493_v7 }
 0x225   :  { %5657 = vmatprep.subr.mxu1 %v25183_v24  ;;  %16911 = vmatpush1.xpose.msra.mxu0 %v25240_v14 }
 0x226   :  { %16976 = vmatprep.mubr.f32.mxu0 %v25199_v10  ;;  %16985 = vmatprep.subr.mxu0 %v25187_v4  ;;  %v17298_v10 = vand.u32 4294901760, %v25315_v3 }
 0x22b   :  { %5651 = vmatmul.mubr.f32.vlgmr.msra.gmra.mrb[0].mxu1 %v25218_v18  ;;  %16979 = vmatmul.mubr.f32.vlgmr.msra.gmra.mrb[0].mxu0 %v25235_v45  ;;  %v17299_v18 = vsub.f32 %v25315_v3, %v17298_v10 }
 0x22c   :  { %5659 = vmatpush1.xpose.msra.mxu1 %v25207_v26  ;;  %5725 = vmatprep.mubr.f32.mxu1 %v5482_v33 }
 0x22d   :  { %5737 = vmatprep.subr.mxu1 %v5498_v34  ;;  %16987 = vmatpush1.xpose.msra.mxu0 %v25213_v23  ;;  %v25345_v34 = vsub.f32 %v493_v7, %v25321_v25  ;;  %v17300_v14 = vand.u32 4294901760, %v17299_v18  ;;  %v135_v7 = vld [vmem:[#allocation5 + $0x240] sm:$0x3f] }
 0x22e   :  { %17053 = vmatprep.mubr.f32.mxu0 %v16810_v60  ;;  %17065 = vmatprep.subr.mxu0 %v16826_v37  ;;  %v5956_v37 = vand.u32 4294901760, %v5955_v11  ;;  %v25435_v59 = vand.u32 4294901760, %v135_v7 }
 0x233   :  { %5729 = vmatmul.mubr.f32.vlgmr.msra.gmra.mrb[0].mxu1 %v5488_v13  ;;  %17057 = vmatmul.mubr.f32.vlgmr.msra.gmra.mrb[0].mxu0 %v16816_v17  ;;  %v25385_v17 = vld [vmem:[#allocation2 + $0x90] sm:$0xff] }
 0x234   :  { %5741 = vmatpush1.xpose.msra.mxu1 %v5504_v32  ;;  %5805 = vmatprep.mubr.f32.mxu1 %v25181_v19 }
 0x235   :  { %5813 = vmatprep.subr.mxu1 %v25183_v24  ;;  %17069 = vmatpush1.xpose.msra.mxu0 %v16832_v57  ;;  %v5970_v24 = vand.u32 4294901760, %v25305_v36  ;;  %v503_v57 = vrot.slane %v25385_v17, %v24091_v5 }
 0x236   :  { %17133 = vmatprep.mubr.f32.mxu0 %v25185_v1  ;;  %17141 = vmatprep.subr.mxu0 %v25187_v4  ;;  %v25328_v4 = vsub.f32 %v289_v51, %v25312_v22 }
 0x237   :  { %v5971_v33 = vsub.f32 %v25305_v36, %v5970_v24  ;;  %v511_v49 = vcombine.high %v503_v57, %v503_v57 }
 0x238   :  { %v5960_v60 = vand.u32 4294901760, %v25328_v4 }
 0x239   :  { %v5972_v39 = vand.u32 4294901760, %v5971_v33  ;;  %v25407_v41 = vand.u32 4294901760, %v511_v49 }
 0x23a   :  { %v5961_v45 = vsub.f32 %v25328_v4, %v5960_v60 }
 0x23b   :  { %5807 = vmatmul.mubr.f32.vlgmr.msra.gmra.mrb[0].mxu1 %v25202_v31  ;;  %17135 = vmatmul.mubr.f32.vlgmr.msra.gmra.mrb[0].mxu0 %v25211_v35  ;;  %v25421_v51 = vsub.f32 %v511_v49, %v25407_v41 }
 0x23c   :  { %5815 = vmatpush1.xpose.msra.mxu1 %v25207_v26  ;;  %5879 = vmatprep.mubr.f32.mxu1 %v25181_v19  ;;  %v25350_v19 = vsub.f32 %v133_v20, %v25323_v12  ;;  %v17283_v26 = vsub.f32 %v25309_v0, %v17282_v47  ;;  %v5962_v48 = vand.u32 4294901760, %v5961_v45  ;;  %v25446_v20 = vsub.f32 %v87_v46, %v25429_v62 }
 0x23d   :  { %5887 = vmatprep.subr.mxu1 %v25293_v15  ;;  %17143 = vmatpush1.xpose.msra.mxu0 %v25213_v23  ;;  %v5976_v23 = vand.u32 4294901760, %v25334_v29 }
 0x23e   :  { %17207 = vmatprep.mubr.f32.mxu0 %v25185_v1  ;;  %17215 = vmatprep.subr.mxu0 %v25297_v55  ;;  %v17288_v1 = vand.u32 4294901760, %v25345_v34  ;;  %v17284_v30 = vand.u32 4294901760, %v17283_v26  ;;  %v17304_v44 = vand.u32 4294901760, %v25350_v19 }
 0x23f   :  { %v5977_v38 = vsub.f32 %v25334_v29, %v5976_v23 }
 0x240   :  { %v17289_v13 = vsub.f32 %v25345_v34, %v17288_v1  ;;  %v17305_v28 = vsub.f32 %v25350_v19, %v17304_v44 }
 0x242   :  { %v17290_v32 = vand.u32 4294901760, %v17289_v13  ;;  %v17306_v50 = vand.u32 4294901760, %v17305_v28  ;;  %v138_v13 = vld [vmem:[#allocation5 + $0x258] sm:$0x3f] }
 0x243   :  { %5881 = vmatmul.mubr.f32.vlgmr.msra.gmra.mrb[0].mxu1 %v25202_v31  ;;  %17209 = vmatmul.mubr.f32.vlgmr.msra.gmra.mrb[0].mxu0 %v25211_v35  ;;  %v5978_v31 = vand.u32 4294901760, %v5977_v38  ;;  %v25380_v35 = vld [vmem:[#allocation2 + $0x30] sm:$0xff] }
 0x244   :  { %5889 = vmatpush1.xpose.msra.mxu1 %v25317_v9  ;;  %5957 = vmatprep.mubr.f32.mxu1 %v5956_v37  ;;  %v299_v40 = vrot.slane %v25380_v35, %v24091_v5 }
 0x245   :  { %5973 = vmatprep.subr.mxu1 %v5972_v39  ;;  %17217 = vmatpush1.xpose.msra.mxu0 %v25323_v12 }
 0x246   :  { %17285 = vmatprep.mubr.f32.mxu0 %v17284_v30  ;;  %17301 = vmatprep.subr.mxu0 %v17300_v14  ;;  %v307_v58 = vcombine.high %v299_v40, %v299_v40  ;;  %v25424_v8 = vand.u32 4294901760, %v299_v40  ;;  %v90_v14 = vld [vmem:[#allocation5 + $0xd8] sm:$0x3f] }
 0x248   :  { %v25403_v56 = vand.u32 4294901760, %v307_v58 }
 0x24a   :  { %v25413_v63 = vsub.f32 %v307_v58, %v25403_v56 }
 0x24b   :  { %5963 = vmatmul.mubr.f32.vlgmr.msra.gmra.mrb[0].mxu1 %v5962_v48  ;;  %17291 = vmatmul.mubr.f32.vlgmr.msra.gmra.mrb[0].mxu0 %v17290_v32  ;;  %v25515_v48 = vand.u32 4294901760, %v90_v14  ;;  %v25519_v32 = vand.u32 4294901760, %v138_v13 }
 0x24c   :  { %5979 = vmatpush1.xpose.msra.mxu1 %v5978_v31  ;;  %6043 = vmatprep.mubr.f32.mxu1 %v25291_v6  ;;  %v6426_v53 = vand.u32 4294901760, %v25413_v63 }
 0x24d   :  { %6052 = vmatprep.subr.mxu1 %v25305_v36  ;;  %17307 = vmatpush1.xpose.msra.mxu0 %v17306_v50  ;;  %v17754_v36 = vand.u32 4294901760, %v25421_v51  ;;  %v25537_v42 = vsub.f32 %v138_v13, %v25519_v32 }
 0x24e   :  { %17371 = vmatprep.mubr.f32.mxu0 %v25295_v52  ;;  %17380 = vmatprep.subr.mxu0 %v25315_v3  ;;  %v6427_v3 = vsub.f32 %v25413_v63, %v6426_v53 }
 0x253   :  { %6045 = vmatmul.mubr.f32.vlgmr.msra.gmra.mrb[0].mxu1 %v25312_v22  ;;  %17373 = vmatmul.mubr.f32.vlgmr.msra.gmra.mrb[0].mxu0 %v25321_v25 }
 0x254   :  { %6055 = vmatpush1.xpose.msra.mxu1 %v25334_v29  ;;  %6120 = vmatprep.mubr.f32.mxu1 %v25301_v16  ;;  %v25433_v16 = vand.u32 4294901760, %v503_v57 }
 0x255   :  { %6129 = vmatprep.subr.mxu1 %v25293_v15  ;;  %17383 = vmatpush1.xpose.msra.mxu0 %v25350_v19 }
 0x256   :  { %17448 = vmatprep.mubr.f32.mxu0 %v25309_v0  ;;  %17457 = vmatprep.subr.mxu0 %v25297_v55  ;;  %v17770_v0 = vand.u32 4294901760, %v25427_v54 }
 0x25b   :  { %6123 = vmatmul.mubr.f32.vlgmr.msra.gmra.mrb[0].mxu1 %v25328_v4  ;;  %17451 = vmatmul.mubr.f32.vlgmr.msra.gmra.mrb[0].mxu0 %v25345_v34  ;;  %v17771_v4 = vsub.f32 %v25427_v54, %v17770_v0 }
 0x25c   :  { %6131 = vmatpush1.xpose.msra.mxu1 %v25317_v9  ;;  %6197 = vmatprep.mubr.f32.mxu1 %v5954_v2 }
 0x25d   :  { %6209 = vmatprep.subr.mxu1 %v5970_v24  ;;  %17459 = vmatpush1.xpose.msra.mxu0 %v25323_v12  ;;  %v25457_v24 = vsub.f32 %v503_v57, %v25433_v16  ;;  %v17772_v19 = vand.u32 4294901760, %v17771_v4  ;;  %v137_v57 = vld [vmem:[#allocation5 + $0x250] sm:$0x3f] }
 0x25e   :  { %17525 = vmatprep.mubr.f32.mxu0 %v17282_v47  ;;  %17537 = vmatprep.subr.mxu0 %v17298_v10  ;;  %v6428_v10 = vand.u32 4294901760, %v6427_v3  ;;  %v25545_v46 = vand.u32 4294901760, %v137_v57 }
 0x263   :  { %6201 = vmatmul.mubr.f32.vlgmr.msra.gmra.mrb[0].mxu1 %v5960_v60  ;;  %17529 = vmatmul.mubr.f32.vlgmr.msra.gmra.mrb[0].mxu0 %v17288_v1  ;;  %v496_v1 = vcombine.high %v25385_v17, %v25385_v17  ;;  %v25527_v17 = vsub.f32 %v90_v14, %v25515_v48 }
 0x264   :  { %6213 = vmatpush1.xpose.msra.mxu1 %v5976_v23  ;;  %6277 = vmatprep.mubr.f32.mxu1 %v25291_v6 }
 0x265   :  { %6285 = vmatprep.subr.mxu1 %v25293_v15  ;;  %17541 = vmatpush1.xpose.msra.mxu0 %v17304_v44  ;;  %v6442_v15 = vand.u32 4294901760, %v25417_v27  ;;  %v510_v44 = vrot.slane %v496_v1, %v24091_v5 }
 0x266   :  { %17605 = vmatprep.mubr.f32.mxu0 %v25295_v52  ;;  %17613 = vmatprep.subr.mxu0 %v25297_v55  ;;  %v25440_v55 = vsub.f32 %v299_v40, %v25424_v8 }
 0x267   :  { %v6443_v2 = vsub.f32 %v25417_v27, %v6442_v15  ;;  %v512_v38 = vcombine.high %v510_v44, %v510_v44 }
 0x268   :  { %v6432_v47 = vand.u32 4294901760, %v25440_v55 }
 0x269   :  { %v6444_v29 = vand.u32 4294901760, %v6443_v2  ;;  %v25517_v31 = vand.u32 4294901760, %v512_v38 }
 0x26a   :  { %v6433_v34 = vsub.f32 %v25440_v55, %v6432_v47 }
 0x26b   :  { %6279 = vmatmul.mubr.f32.vlgmr.msra.gmra.mrb[0].mxu1 %v25312_v22  ;;  %17607 = vmatmul.mubr.f32.vlgmr.msra.gmra.mrb[0].mxu0 %v25321_v25  ;;  %v25531_v40 = vsub.f32 %v512_v38, %v25517_v31 }
 0x26c   :  { %6287 = vmatpush1.xpose.msra.mxu1 %v25317_v9  ;;  %6351 = vmatprep.mubr.f32.mxu1 %v25291_v6  ;;  %v25462_v6 = vsub.f32 %v135_v7, %v25435_v59  ;;  %v17755_v9 = vsub.f32 %v25421_v51, %v17754_v36  ;;  %v6434_v37 = vand.u32 4294901760, %v6433_v34 }
 0x26d   :  { %6359 = vmatprep.subr.mxu1 %v25405_v61  ;;  %17615 = vmatpush1.xpose.msra.mxu0 %v25323_v12  ;;  %v6448_v12 = vand.u32 4294901760, %v25446_v20 }
 0x26e   :  { %17679 = vmatprep.mubr.f32.mxu0 %v25295_v52  ;;  %17687 = vmatprep.subr.mxu0 %v25409_v43  ;;  %v17760_v52 = vand.u32 4294901760, %v25457_v24  ;;  %v17756_v11 = vand.u32 4294901760, %v17755_v9  ;;  %v17776_v33 = vand.u32 4294901760, %v25462_v6 }
 0x26f   :  { %v6449_v26 = vsub.f32 %v25446_v20, %v6448_v12 }
 0x270   :  { %v17761_v60 = vsub.f32 %v25457_v24, %v17760_v52  ;;  %v17777_v18 = vsub.f32 %v25462_v6, %v17776_v33 }
 0x272   :  { %v17762_v23 = vand.u32 4294901760, %v17761_v60  ;;  %v17778_v39 = vand.u32 4294901760, %v17777_v18  ;;  %v140_v60 = vld [vmem:[#allocation5 + $0x268] sm:$0x3f] }
 0x273   :  { %6353 = vmatmul.mubr.f32.vlgmr.msra.gmra.mrb[0].mxu1 %v25312_v22  ;;  %17681 = vmatmul.mubr.f32.vlgmr.msra.gmra.mrb[0].mxu0 %v25321_v25  ;;  %v6450_v22 = vand.u32 4294901760, %v6449_v26  ;;  %v292_v25 = vcombine.high %v25380_v35, %v25380_v35  ;;  %v89_v35 = vld [vmem:[#allocation5 + $0xd0] sm:$0x3f] }
 0x274   :  { %6361 = vmatpush1.xpose.msra.mxu1 %v25429_v62  ;;  %6429 = vmatprep.mubr.f32.mxu1 %v6428_v10  ;;  %v25539_v49 = vand.u32 4294901760, %v89_v35 }
 0x275   :  { %6445 = vmatprep.subr.mxu1 %v6444_v29  ;;  %17689 = vmatpush1.xpose.msra.mxu0 %v25435_v59  ;;  %v306_v30 = vrot.slane %v292_v25, %v24091_v5  ;;  %v91_v25 = vld [vmem:[#allocation5 + $0xe0] sm:$0x3f] }
 0x276   :  { %17757 = vmatprep.mubr.f32.mxu0 %v17756_v11  ;;  %17773 = vmatprep.subr.mxu0 %v17772_v19  ;;  %v25556_v7 = vsub.f32 %v89_v35, %v25539_v49  ;;  %v92_v19 = vld [vmem:[#allocation5 + $0xe8] sm:$0x3f]  ;;  %v25651_v38 = vand.u32 4294901760, %v91_v25 }
 0x277   :  { %v308_v45 = vcombine.high %v306_v30, %v306_v30  ;;  %v25534_v58 = vand.u32 4294901760, %v306_v30 }
 0x279   :  { %v25513_v28 = vand.u32 4294901760, %v308_v45 }
 0x27b   :  { %6435 = vmatmul.mubr.f32.vlgmr.msra.gmra.mrb[0].mxu1 %v6434_v37  ;;  %17763 = vmatmul.mubr.f32.vlgmr.msra.gmra.mrb[0].mxu0 %v17762_v23  ;;  %v25523_v50 = vsub.f32 %v308_v45, %v25513_v28  ;;  %v25627_v37 = vand.u32 4294901760, %v92_v19  ;;  %v25631_v23 = vand.u32 4294901760, %v140_v60 }
 0x27c   :  { %6451 = vmatpush1.xpose.msra.mxu1 %v6450_v22  ;;  %6515 = vmatprep.mubr.f32.mxu1 %v25403_v56 }
 0x27d   :  { %6524 = vmatprep.subr.mxu1 %v25417_v27  ;;  %17779 = vmatpush1.xpose.msra.mxu0 %v17778_v39  ;;  %v6898_v21 = vand.u32 4294901760, %v25523_v50  ;;  %v18226_v27 = vand.u32 4294901760, %v25531_v40  ;;  %v25639_v1 = vsub.f32 %v92_v19, %v25627_v37  ;;  %v25649_v14 = vsub.f32 %v140_v60, %v25631_v23 }
 0x27e   :  { %17843 = vmatprep.mubr.f32.mxu0 %v25407_v41  ;;  %17852 = vmatprep.subr.mxu0 %v25427_v54 }
 0x27f   :  { %v6899_v54 = vsub.f32 %v25523_v50, %v6898_v21 }
 0x283   :  { %6517 = vmatmul.mubr.f32.vlgmr.msra.gmra.mrb[0].mxu1 %v25424_v8  ;;  %17845 = vmatmul.mubr.f32.vlgmr.msra.gmra.mrb[0].mxu0 %v25433_v16 }
 0x284   :  { %6527 = vmatpush1.xpose.msra.mxu1 %v25446_v20  ;;  %6592 = vmatprep.mubr.f32.mxu1 %v25413_v63  ;;  %v25543_v63 = vand.u32 4294901760, %v510_v44 }
 0x285   :  { %6601 = vmatprep.subr.mxu1 %v25405_v61  ;;  %17855 = vmatpush1.xpose.msra.mxu0 %v25462_v6 }
 0x286   :  { %17920 = vmatprep.mubr.f32.mxu0 %v25421_v51  ;;  %17929 = vmatprep.subr.mxu0 %v25409_v43  ;;  %v18242_v51 = vand.u32 4294901760, %v25537_v42 }
 0x28b   :  { %6595 = vmatmul.mubr.f32.vlgmr.msra.gmra.mrb[0].mxu1 %v25440_v55  ;;  %17923 = vmatmul.mubr.f32.vlgmr.msra.gmra.mrb[0].mxu0 %v25457_v24  ;;  %v18243_v55 = vsub.f32 %v25537_v42, %v18242_v51 }
 0x28c   :  { %6603 = vmatpush1.xpose.msra.mxu1 %v25429_v62  ;;  %6669 = vmatprep.mubr.f32.mxu1 %v6426_v53 }
 0x28d   :  { %6681 = vmatprep.subr.mxu1 %v6442_v15  ;;  %17931 = vmatpush1.xpose.msra.mxu0 %v25435_v59  ;;  %v25567_v15 = vsub.f32 %v510_v44, %v25543_v63  ;;  %v18244_v6 = vand.u32 4294901760, %v18243_v55  ;;  %v139_v44 = vld [vmem:[#allocation5 + $0x260] sm:$0x3f] }
 0x28e   :  { %17997 = vmatprep.mubr.f32.mxu0 %v17754_v36  ;;  %18009 = vmatprep.subr.mxu0 %v17770_v0  ;;  %v6900_v0 = vand.u32 4294901760, %v6899_v54  ;;  %v25657_v35 = vand.u32 4294901760, %v139_v44 }
 0x293   :  { %6673 = vmatmul.mubr.f32.vlgmr.msra.gmra.mrb[0].mxu1 %v6432_v47  ;;  %18001 = vmatmul.mubr.f32.vlgmr.msra.gmra.mrb[0].mxu0 %v17760_v52  ;;  %v25607_v52 = vld [vmem:[#allocation2 + $0x98] sm:$0xff] }
 0x294   :  { %6685 = vmatpush1.xpose.msra.mxu1 %v6448_v12  ;;  %6749 = vmatprep.mubr.f32.mxu1 %v25403_v56 }
 0x295   :  { %6757 = vmatprep.subr.mxu1 %v25405_v61  ;;  %18013 = vmatpush1.xpose.msra.mxu0 %v17776_v33  ;;  %v6914_v61 = vand.u32 4294901760, %v25527_v17  ;;  %v520_v33 = vrot.slane %v25607_v52, %v24091_v5 }
 0x296   :  { %18077 = vmatprep.mubr.f32.mxu0 %v25407_v41  ;;  %18085 = vmatprep.subr.mxu0 %v25409_v43  ;;  %v25550_v43 = vsub.f32 %v306_v30, %v25534_v58 }
 0x297   :  { %v6915_v53 = vsub.f32 %v25527_v17, %v6914_v61  ;;  %v528_v26 = vcombine.high %v520_v33, %v520_v33 }
 0x298   :  { %v6904_v36 = vand.u32 4294901760, %v25550_v43 }
 0x299   :  { %v6916_v20 = vand.u32 4294901760, %v6915_v53  ;;  %v25629_v22 = vand.u32 4294901760, %v528_v26 }
 0x29a   :  { %v6905_v24 = vsub.f32 %v25550_v43, %v6904_v36 }
 0x29b   :  { %6751 = vmatmul.mubr.f32.vlgmr.msra.gmra.mrb[0].mxu1 %v25424_v8  ;;  %18079 = vmatmul.mubr.f32.vlgmr.msra.gmra.mrb[0].mxu0 %v25433_v16  ;;  %v25643_v30 = vsub.f32 %v528_v26, %v25629_v22 }
 0x29c   :  { %6759 = vmatpush1.xpose.msra.mxu1 %v25429_v62  ;;  %6823 = vmatprep.mubr.f32.mxu1 %v25403_v56  ;;  %v25572_v56 = vsub.f32 %v137_v57, %v25545_v46  ;;  %v18227_v62 = vsub.f32 %v25531_v40, %v18226_v27  ;;  %v6906_v10 = vand.u32 4294901760, %v6905_v24  ;;  %v25668_v57 = vsub.f32 %v91_v25, %v25651_v38 }
 0x29d   :  { %6831 = vmatprep.subr.mxu1 %v25515_v48  ;;  %18087 = vmatpush1.xpose.msra.mxu0 %v25435_v59  ;;  %v6920_v59 = vand.u32 4294901760, %v25556_v7 }
 0x29e   :  { %18151 = vmatprep.mubr.f32.mxu0 %v25407_v41  ;;  %18159 = vmatprep.subr.mxu0 %v25519_v32  ;;  %v18232_v41 = vand.u32 4294901760, %v25567_v15  ;;  %v18228_v3 = vand.u32 4294901760, %v18227_v62  ;;  %v18248_v2 = vand.u32 4294901760, %v25572_v56 }
 0x29f   :  { %v6921_v9 = vsub.f32 %v25556_v7, %v6920_v59 }
 0x2a0   :  { %v18233_v47 = vsub.f32 %v25567_v15, %v18232_v41  ;;  %v18249_v4 = vsub.f32 %v25572_v56, %v18248_v2 }
 0x2a2   :  { %v18234_v12 = vand.u32 4294901760, %v18233_v47  ;;  %v18250_v29 = vand.u32 4294901760, %v18249_v4  ;;  %v142_v47 = vld [vmem:[#allocation5 + $0x278] sm:$0x3f] }
 0x2a3   :  { %6825 = vmatmul.mubr.f32.vlgmr.msra.gmra.mrb[0].mxu1 %v25424_v8  ;;  %18153 = vmatmul.mubr.f32.vlgmr.msra.gmra.mrb[0].mxu0 %v25433_v16  ;;  %v6922_v8 = vand.u32 4294901760, %v6921_v9  ;;  %v25602_v16 = vld [vmem:[#allocation2 + $0x38] sm:$0xff] }
 0x2a4   :  { %6833 = vmatpush1.xpose.msra.mxu1 %v25539_v49  ;;  %6901 = vmatprep.mubr.f32.mxu1 %v6900_v0  ;;  %v316_v11 = vrot.slane %v25602_v16, %v24091_v5 }
 0x2a5   :  { %6917 = vmatprep.subr.mxu1 %v6916_v20  ;;  %18161 = vmatpush1.xpose.msra.mxu0 %v25545_v46 }
 0x2a6   :  { %18229 = vmatprep.mubr.f32.mxu0 %v18228_v3  ;;  %18245 = vmatprep.subr.mxu0 %v18244_v6  ;;  %v324_v34 = vcombine.high %v316_v11, %v316_v11  ;;  %v25646_v45 = vand.u32 4294901760, %v316_v11  ;;  %v94_v6 = vld [vmem:[#allocation5 + $0xf8] sm:$0x3f] }
 0x2a8   :  { %v25625_v18 = vand.u32 4294901760, %v324_v34 }
 0x2aa   :  { %v25635_v39 = vsub.f32 %v324_v34, %v25625_v18 }
 0x2ab   :  { %6907 = vmatmul.mubr.f32.vlgmr.msra.gmra.mrb[0].mxu1 %v6906_v10  ;;  %18235 = vmatmul.mubr.f32.vlgmr.msra.gmra.mrb[0].mxu0 %v18234_v12  ;;  %v25737_v10 = vand.u32 4294901760, %v94_v6  ;;  %v25741_v12 = vand.u32 4294901760, %v142_v47 }
 0x2ac   :  { %6923 = vmatpush1.xpose.msra.mxu1 %v6922_v8  ;;  %6987 = vmatprep.mubr.f32.mxu1 %v25513_v28  ;;  %v7370_v13 = vand.u32 4294901760, %v25635_v39 }
 0x2ad   :  { %6996 = vmatprep.subr.mxu1 %v25527_v17  ;;  %18251 = vmatpush1.xpose.msra.mxu0 %v18250_v29  ;;  %v18698_v17 = vand.u32 4294901760, %v25643_v30  ;;  %v25759_v19 = vsub.f32 %v142_v47, %v25741_v12 }
 0x2ae   :  { %18315 = vmatprep.mubr.f32.mxu0 %v25517_v31  ;;  %18324 = vmatprep.subr.mxu0 %v25537_v42  ;;  %v7371_v42 = vsub.f32 %v25635_v39, %v7370_v13 }
 0x2b3   :  { %6989 = vmatmul.mubr.f32.vlgmr.msra.gmra.mrb[0].mxu1 %v25534_v58  ;;  %18317 = vmatmul.mubr.f32.vlgmr.msra.gmra.mrb[0].mxu0 %v25543_v63 }
 0x2b4   :  { %6999 = vmatpush1.xpose.msra.mxu1 %v25556_v7  ;;  %7064 = vmatprep.mubr.f32.mxu1 %v25523_v50  ;;  %v25655_v50 = vand.u32 4294901760, %v520_v33 }
 0x2b5   :  { %7073 = vmatprep.subr.mxu1 %v25515_v48  ;;  %18327 = vmatpush1.xpose.msra.mxu0 %v25572_v56 }
 0x2b6   :  { %18392 = vmatprep.mubr.f32.mxu0 %v25531_v40  ;;  %18401 = vmatprep.subr.mxu0 %v25519_v32  ;;  %v18714_v40 = vand.u32 4294901760, %v25649_v14 }
 0x2bb   :  { %7067 = vmatmul.mubr.f32.vlgmr.msra.gmra.mrb[0].mxu1 %v25550_v43  ;;  %18395 = vmatmul.mubr.f32.vlgmr.msra.gmra.mrb[0].mxu0 %v25567_v15  ;;  %v18715_v43 = vsub.f32 %v25649_v14, %v18714_v40 }
 0x2bc   :  { %7075 = vmatpush1.xpose.msra.mxu1 %v25539_v49  ;;  %7141 = vmatprep.mubr.f32.mxu1 %v6898_v21 }
 0x2bd   :  { %7153 = vmatprep.subr.mxu1 %v6914_v61  ;;  %18403 = vmatpush1.xpose.msra.mxu0 %v25545_v46  ;;  %v25679_v61 = vsub.f32 %v520_v33, %v25655_v50  ;;  %v18716_v56 = vand.u32 4294901760, %v18715_v43  ;;  %v141_v33 = vld [vmem:[#allocation5 + $0x270] sm:$0x3f] }
 0x2be   :  { %18469 = vmatprep.mubr.f32.mxu0 %v18226_v27  ;;  %18481 = vmatprep.subr.mxu0 %v18242_v51  ;;  %v7372_v51 = vand.u32 4294901760, %v7371_v42  ;;  %v25767_v25 = vand.u32 4294901760, %v141_v33 }
 0x2c3   :  { %7145 = vmatmul.mubr.f32.vlgmr.msra.gmra.mrb[0].mxu1 %v6904_v36  ;;  %18473 = vmatmul.mubr.f32.vlgmr.msra.gmra.mrb[0].mxu0 %v18232_v41  ;;  %v513_v41 = vcombine.high %v25607_v52, %v25607_v52  ;;  %v25749_v52 = vsub.f32 %v94_v6, %v25737_v10 }
 0x2c4   :  { %7157 = vmatpush1.xpose.msra.mxu1 %v6920_v59  ;;  %7221 = vmatprep.mubr.f32.mxu1 %v25513_v28 }
 0x2c5   :  { %7229 = vmatprep.subr.mxu1 %v25515_v48  ;;  %18485 = vmatpush1.xpose.msra.mxu0 %v18248_v2  ;;  %v7386_v48 = vand.u32 4294901760, %v25639_v1  ;;  %v527_v2 = vrot.slane %v513_v41, %v24091_v5 }
 0x2c6   :  { %18549 = vmatprep.mubr.f32.mxu0 %v25517_v31  ;;  %18557 = vmatprep.subr.mxu0 %v25519_v32  ;;  %v25662_v32 = vsub.f32 %v316_v11, %v25646_v45 }
 0x2c7   :  { %v7387_v21 = vsub.f32 %v25639_v1, %v7386_v48  ;;  %v529_v9 = vcombine.high %v527_v2, %v527_v2 }
 0x2c8   :  { %v7376_v27 = vand.u32 4294901760, %v25662_v32 }
 0x2c9   :  { %v7388_v7 = vand.u32 4294901760, %v7387_v21  ;;  %v25739_v8 = vand.u32 4294901760, %v529_v9 }
 0x2ca   :  { %v7377_v15 = vsub.f32 %v25662_v32, %v7376_v27 }
 0x2cb   :  { %7223 = vmatmul.mubr.f32.vlgmr.msra.gmra.mrb[0].mxu1 %v25534_v58  ;;  %18551 = vmatmul.mubr.f32.vlgmr.msra.gmra.mrb[0].mxu0 %v25543_v63  ;;  %v25753_v11 = vsub.f32 %v529_v9, %v25739_v8 }
 0x2cc   :  { %7231 = vmatpush1.xpose.msra.mxu1 %v25539_v49  ;;  %7295 = vmatprep.mubr.f32.mxu1 %v25513_v28  ;;  %v25684_v28 = vsub.f32 %v139_v44, %v25657_v35  ;;  %v18699_v49 = vsub.f32 %v25643_v30, %v18698_v17  ;;  %v7378_v0 = vand.u32 4294901760, %v7377_v15 }
 0x2cd   :  { %7303 = vmatprep.subr.mxu1 %v25627_v37  ;;  %18559 = vmatpush1.xpose.msra.mxu0 %v25545_v46  ;;  %v7392_v46 = vand.u32 4294901760, %v25668_v57 }
 0x2ce   :  { %18623 = vmatprep.mubr.f32.mxu0 %v25517_v31  ;;  %18631 = vmatprep.subr.mxu0 %v25631_v23  ;;  %v18704_v31 = vand.u32 4294901760, %v25679_v61  ;;  %v18700_v54 = vand.u32 4294901760, %v18699_v49  ;;  %v18720_v53 = vand.u32 4294901760, %v25684_v28 }
 0x2cf   :  { %v7393_v62 = vsub.f32 %v25668_v57, %v7392_v46 }
 0x2d0   :  { %v18705_v36 = vsub.f32 %v25679_v61, %v18704_v31  ;;  %v18721_v55 = vsub.f32 %v25684_v28, %v18720_v53 }
 0x2d2   :  { %v18706_v59 = vand.u32 4294901760, %v18705_v36  ;;  %v18722_v20 = vand.u32 4294901760, %v18721_v55  ;;  %v144_v36 = vld [vmem:[#allocation5 + $0x288] sm:$0x3f] }
 0x2d3   :  { %7297 = vmatmul.mubr.f32.vlgmr.msra.gmra.mrb[0].mxu1 %v25534_v58  ;;  %18625 = vmatmul.mubr.f32.vlgmr.msra.gmra.mrb[0].mxu0 %v25543_v63  ;;  %v7394_v58 = vand.u32 4294901760, %v7393_v62  ;;  %v309_v63 = vcombine.high %v25602_v16, %v25602_v16  ;;  %v93_v16 = vld [vmem:[#allocation5 + $0xf0] sm:$0x3f] }
 0x2d4   :  { %7305 = vmatpush1.xpose.msra.mxu1 %v25651_v38  ;;  %7373 = vmatprep.mubr.f32.mxu1 %v7372_v51  ;;  %v25761_v26 = vand.u32 4294901760, %v93_v16 }
 0x2d5   :  { %7389 = vmatprep.subr.mxu1 %v7388_v7  ;;  %18633 = vmatpush1.xpose.msra.mxu0 %v25657_v35  ;;  %v323_v3 = vrot.slane %v309_v63, %v24091_v5  ;;  %v95_v63 = vld [vmem:[#allocation5 + $0x100] sm:$0x3f] }
 0x2d6   :  { %18701 = vmatprep.mubr.f32.mxu0 %v18700_v54  ;;  %18717 = vmatprep.subr.mxu0 %v18716_v56  ;;  %v25778_v44 = vsub.f32 %v93_v16, %v25761_v26  ;;  %v96_v56 = vld [vmem:[#allocation5 + $0x108] sm:$0x3f]  ;;  %v25873_v9 = vand.u32 4294901760, %v95_v63 }
 0x2d7   :  { %v325_v24 = vcombine.high %v323_v3, %v323_v3  ;;  %v25756_v34 = vand.u32 4294901760, %v323_v3 }
 0x2d9   :  { %v25735_v4 = vand.u32 4294901760, %v325_v24 }
 0x2db   :  { %7379 = vmatmul.mubr.f32.vlgmr.msra.gmra.mrb[0].mxu1 %v7378_v0  ;;  %18707 = vmatmul.mubr.f32.vlgmr.msra.gmra.mrb[0].mxu0 %v18706_v59  ;;  %v25745_v29 = vsub.f32 %v325_v24, %v25735_v4  ;;  %v25849_v0 = vand.u32 4294901760, %v96_v56  ;;  %v25853_v59 = vand.u32 4294901760, %v144_v36 }
 0x2dc   :  { %7395 = vmatpush1.xpose.msra.mxu1 %v7394_v58  ;;  %7459 = vmatprep.mubr.f32.mxu1 %v25625_v18 }
 0x2dd   :  { %7468 = vmatprep.subr.mxu1 %v25639_v1  ;;  %18723 = vmatpush1.xpose.msra.mxu0 %v18722_v20  ;;  %v7842_v60 = vand.u32 4294901760, %v25745_v29  ;;  %v19170_v1 = vand.u32 4294901760, %v25753_v11  ;;  %v25861_v41 = vsub.f32 %v96_v56, %v25849_v0  ;;  %v25871_v6 = vsub.f32 %v144_v36, %v25853_v59 }
 0x2de   :  { %18787 = vmatprep.mubr.f32.mxu0 %v25629_v22  ;;  %18796 = vmatprep.subr.mxu0 %v25649_v14 }
 0x2df   :  { %v7843_v14 = vsub.f32 %v25745_v29, %v7842_v60 }
 0x2e3   :  { %7461 = vmatmul.mubr.f32.vlgmr.msra.gmra.mrb[0].mxu1 %v25646_v45  ;;  %18789 = vmatmul.mubr.f32.vlgmr.msra.gmra.mrb[0].mxu0 %v25655_v50 }
 0x2e4   :  { %7471 = vmatpush1.xpose.msra.mxu1 %v25668_v57  ;;  %7536 = vmatprep.mubr.f32.mxu1 %v25635_v39  ;;  %v25765_v39 = vand.u32 4294901760, %v527_v2 }
 0x2e5   :  { %7545 = vmatprep.subr.mxu1 %v25627_v37  ;;  %18799 = vmatpush1.xpose.msra.mxu0 %v25684_v28 }
 0x2e6   :  { %18864 = vmatprep.mubr.f32.mxu0 %v25643_v30  ;;  %18873 = vmatprep.subr.mxu0 %v25631_v23  ;;  %v19186_v30 = vand.u32 4294901760, %v25759_v19 }
 0x2eb   :  { %7539 = vmatmul.mubr.f32.vlgmr.msra.gmra.mrb[0].mxu1 %v25662_v32  ;;  %18867 = vmatmul.mubr.f32.vlgmr.msra.gmra.mrb[0].mxu0 %v25679_v61  ;;  %v19187_v32 = vsub.f32 %v25759_v19, %v19186_v30 }
 0x2ec   :  { %7547 = vmatpush1.xpose.msra.mxu1 %v25651_v38  ;;  %7613 = vmatprep.mubr.f32.mxu1 %v7370_v13 }
 0x2ed   :  { %7625 = vmatprep.subr.mxu1 %v7386_v48  ;;  %18875 = vmatpush1.xpose.msra.mxu0 %v25657_v35  ;;  %v25789_v48 = vsub.f32 %v527_v2, %v25765_v39  ;;  %v19188_v28 = vand.u32 4294901760, %v19187_v32  ;;  %v143_v2 = vld [vmem:[#allocation5 + $0x280] sm:$0x3f] }
 0x2ee   :  { %18941 = vmatprep.mubr.f32.mxu0 %v18698_v17  ;;  %18953 = vmatprep.subr.mxu0 %v18714_v40  ;;  %v7844_v40 = vand.u32 4294901760, %v7843_v14  ;;  %v25879_v16 = vand.u32 4294901760, %v143_v2 }
 0x2f3   :  { %7617 = vmatmul.mubr.f32.vlgmr.msra.gmra.mrb[0].mxu1 %v7376_v27  ;;  %18945 = vmatmul.mubr.f32.vlgmr.msra.gmra.mrb[0].mxu0 %v18704_v31  ;;  %v25829_v31 = vld [vmem:[#allocation2 + $0xa0] sm:$0xff] }
 0x2f4   :  { %7629 = vmatpush1.xpose.msra.mxu1 %v7392_v46  ;;  %7693 = vmatprep.mubr.f32.mxu1 %v25625_v18 }
 0x2f5   :  { %7701 = vmatprep.subr.mxu1 %v25627_v37  ;;  %18957 = vmatpush1.xpose.msra.mxu0 %v18720_v53  ;;  %v7858_v37 = vand.u32 4294901760, %v25749_v52  ;;  %v537_v53 = vrot.slane %v25829_v31, %v24091_v5 }
 0x2f6   :  { %19021 = vmatprep.mubr.f32.mxu0 %v25629_v22  ;;  %19029 = vmatprep.subr.mxu0 %v25631_v23  ;;  %v25772_v23 = vsub.f32 %v323_v3, %v25756_v34 }
 0x2f7   :  { %v7859_v13 = vsub.f32 %v25749_v52, %v7858_v37  ;;  %v545_v62 = vcombine.high %v537_v53, %v537_v53 }
 0x2f8   :  { %v7848_v17 = vand.u32 4294901760, %v25772_v23 }
 0x2f9   :  { %v7860_v57 = vand.u32 4294901760, %v7859_v13  ;;  %v25851_v58 = vand.u32 4294901760, %v545_v62 }
 0x2fa   :  { %v7849_v61 = vsub.f32 %v25772_v23, %v7848_v17 }
 0x2fb   :  { %7695 = vmatmul.mubr.f32.vlgmr.msra.gmra.mrb[0].mxu1 %v25646_v45  ;;  %19023 = vmatmul.mubr.f32.vlgmr.msra.gmra.mrb[0].mxu0 %v25655_v50  ;;  %v25865_v3 = vsub.f32 %v545_v62, %v25851_v58 }
 0x2fc   :  { %7703 = vmatpush1.xpose.msra.mxu1 %v25651_v38  ;;  %7767 = vmatprep.mubr.f32.mxu1 %v25625_v18  ;;  %v25794_v18 = vsub.f32 %v141_v33, %v25767_v25  ;;  %v19171_v38 = vsub.f32 %v25753_v11, %v19170_v1  ;;  %v7850_v51 = vand.u32 4294901760, %v7849_v61  ;;  %v25890_v33 = vsub.f32 %v95_v63, %v25873_v9 }
 0x2fd   :  { %7775 = vmatprep.subr.mxu1 %v25737_v10  ;;  %19031 = vmatpush1.xpose.msra.mxu0 %v25657_v35  ;;  %v7864_v35 = vand.u32 4294901760, %v25778_v44 }
 0x2fe   :  { %19095 = vmatprep.mubr.f32.mxu0 %v25629_v22  ;;  %19103 = vmatprep.subr.mxu0 %v25741_v12  ;;  %v19176_v22 = vand.u32 4294901760, %v25789_v48  ;;  %v19172_v42 = vand.u32 4294901760, %v19171_v38  ;;  %v19192_v21 = vand.u32 4294901760, %v25794_v18 }
 0x2ff   :  { %v7865_v49 = vsub.f32 %v25778_v44, %v7864_v35 }
 0x300   :  { %v19177_v27 = vsub.f32 %v25789_v48, %v19176_v22  ;;  %v19193_v43 = vsub.f32 %v25794_v18, %v19192_v21 }
 0x302   :  { %v19178_v46 = vand.u32 4294901760, %v19177_v27  ;;  %v19194_v7 = vand.u32 4294901760, %v19193_v43  ;;  %v146_v27 = vld [vmem:[#allocation5 + $0x298] sm:$0x3f] }
 0x303   :  { %7769 = vmatmul.mubr.f32.vlgmr.msra.gmra.mrb[0].mxu1 %v25646_v45  ;;  %19097 = vmatmul.mubr.f32.vlgmr.msra.gmra.mrb[0].mxu0 %v25655_v50  ;;  %v7866_v45 = vand.u32 4294901760, %v7865_v49  ;;  %v25824_v50 = vld [vmem:[#allocation2 + $0x40] sm:$0xff] }
 0x304   :  { %7777 = vmatpush1.xpose.msra.mxu1 %v25761_v26  ;;  %7845 = vmatprep.mubr.f32.mxu1 %v7844_v40  ;;  %v333_v54 = vrot.slane %v25824_v50, %v24091_v5 }
 0x305   :  { %7861 = vmatprep.subr.mxu1 %v7860_v57  ;;  %19105 = vmatpush1.xpose.msra.mxu0 %v25767_v25 }
 0x306   :  { %19173 = vmatprep.mubr.f32.mxu0 %v19172_v42  ;;  %19189 = vmatprep.subr.mxu0 %v19188_v28  ;;  %v341_v15 = vcombine.high %v333_v54, %v333_v54  ;;  %v25868_v24 = vand.u32 4294901760, %v333_v54  ;;  %v98_v28 = vld [vmem:[#allocation5 + $0x118] sm:$0x3f] }
 0x308   :  { %v25847_v55 = vand.u32 4294901760, %v341_v15 }
 0x30a   :  { %v25857_v20 = vsub.f32 %v341_v15, %v25847_v55 }
 0x30b   :  { %7851 = vmatmul.mubr.f32.vlgmr.msra.gmra.mrb[0].mxu1 %v7850_v51  ;;  %19179 = vmatmul.mubr.f32.vlgmr.msra.gmra.mrb[0].mxu0 %v19178_v46  ;;  %v25959_v51 = vand.u32 4294901760, %v98_v28  ;;  %v25963_v46 = vand.u32 4294901760, %v146_v27 }
 0x30c   :  { %7867 = vmatpush1.xpose.msra.mxu1 %v7866_v45  ;;  %7931 = vmatprep.mubr.f32.mxu1 %v25735_v4  ;;  %v8314_v47 = vand.u32 4294901760, %v25857_v20 }
 0x30d   :  { %7940 = vmatprep.subr.mxu1 %v25749_v52  ;;  %19195 = vmatpush1.xpose.msra.mxu0 %v19194_v7  ;;  %v19642_v52 = vand.u32 4294901760, %v25865_v3  ;;  %v25981_v56 = vsub.f32 %v146_v27, %v25963_v46 }
 0x30e   :  { %19259 = vmatprep.mubr.f32.mxu0 %v25739_v8  ;;  %19268 = vmatprep.subr.mxu0 %v25759_v19  ;;  %v8315_v19 = vsub.f32 %v25857_v20, %v8314_v47 }
 0x313   :  { %7933 = vmatmul.mubr.f32.vlgmr.msra.gmra.mrb[0].mxu1 %v25756_v34  ;;  %19261 = vmatmul.mubr.f32.vlgmr.msra.gmra.mrb[0].mxu0 %v25765_v39 }
 0x314   :  { %7943 = vmatpush1.xpose.msra.mxu1 %v25778_v44  ;;  %8008 = vmatprep.mubr.f32.mxu1 %v25745_v29  ;;  %v25877_v29 = vand.u32 4294901760, %v537_v53 }
 0x315   :  { %8017 = vmatprep.subr.mxu1 %v25737_v10  ;;  %19271 = vmatpush1.xpose.msra.mxu0 %v25794_v18 }
 0x316   :  { %19336 = vmatprep.mubr.f32.mxu0 %v25753_v11  ;;  %19345 = vmatprep.subr.mxu0 %v25741_v12  ;;  %v19658_v11 = vand.u32 4294901760, %v25871_v6 }
 0x31b   :  { %8011 = vmatmul.mubr.f32.vlgmr.msra.gmra.mrb[0].mxu1 %v25772_v23  ;;  %19339 = vmatmul.mubr.f32.vlgmr.msra.gmra.mrb[0].mxu0 %v25789_v48  ;;  %v19659_v23 = vsub.f32 %v25871_v6, %v19658_v11 }
 0x31c   :  { %8019 = vmatpush1.xpose.msra.mxu1 %v25761_v26  ;;  %8085 = vmatprep.mubr.f32.mxu1 %v7842_v60 }
 0x31d   :  { %8097 = vmatprep.subr.mxu1 %v7858_v37  ;;  %19347 = vmatpush1.xpose.msra.mxu0 %v25767_v25  ;;  %v25901_v37 = vsub.f32 %v537_v53, %v25877_v29  ;;  %v19660_v18 = vand.u32 4294901760, %v19659_v23  ;;  %v145_v53 = vld [vmem:[#allocation5 + $0x290] sm:$0x3f] }
 0x31e   :  { %19413 = vmatprep.mubr.f32.mxu0 %v19170_v1  ;;  %19425 = vmatprep.subr.mxu0 %v19186_v30  ;;  %v8316_v30 = vand.u32 4294901760, %v8315_v19  ;;  %v25989_v63 = vand.u32 4294901760, %v145_v53 }
 0x323   :  { %8089 = vmatmul.mubr.f32.vlgmr.msra.gmra.mrb[0].mxu1 %v7848_v17  ;;  %19417 = vmatmul.mubr.f32.vlgmr.msra.gmra.mrb[0].mxu0 %v19176_v22  ;;  %v530_v22 = vcombine.high %v25829_v31, %v25829_v31  ;;  %v25971_v31 = vsub.f32 %v98_v28, %v25959_v51 }
 0x324   :  { %8101 = vmatpush1.xpose.msra.mxu1 %v7864_v35  ;;  %8165 = vmatprep.mubr.f32.mxu1 %v25735_v4 }
 0x325   :  { %8173 = vmatprep.subr.mxu1 %v25737_v10  ;;  %19429 = vmatpush1.xpose.msra.mxu0 %v19192_v21  ;;  %v8330_v10 = vand.u32 4294901760, %v25861_v41  ;;  %v544_v21 = vrot.slane %v530_v22, %v24091_v5 }
 0x326   :  { %19493 = vmatprep.mubr.f32.mxu0 %v25739_v8  ;;  %19501 = vmatprep.subr.mxu0 %v25741_v12  ;;  %v25884_v12 = vsub.f32 %v333_v54, %v25868_v24 }
 0x327   :  { %v8331_v60 = vsub.f32 %v25861_v41, %v8330_v10  ;;  %v546_v49 = vcombine.high %v544_v21, %v544_v21 }
 0x328   :  { %v8320_v1 = vand.u32 4294901760, %v25884_v12 }
 0x329   :  { %v8332_v44 = vand.u32 4294901760, %v8331_v60  ;;  %v25961_v45 = vand.u32 4294901760, %v546_v49 }
 0x32a   :  { %v8321_v48 = vsub.f32 %v25884_v12, %v8320_v1 }
 0x32b   :  { %8167 = vmatmul.mubr.f32.vlgmr.msra.gmra.mrb[0].mxu1 %v25756_v34  ;;  %19495 = vmatmul.mubr.f32.vlgmr.msra.gmra.mrb[0].mxu0 %v25765_v39  ;;  %v25975_v54 = vsub.f32 %v546_v49, %v25961_v45 }
 0x32c   :  { %8175 = vmatpush1.xpose.msra.mxu1 %v25761_v26  ;;  %8239 = vmatprep.mubr.f32.mxu1 %v25735_v4  ;;  %v25906_v4 = vsub.f32 %v143_v2, %v25879_v16  ;;  %v19643_v26 = vsub.f32 %v25865_v3, %v19642_v52  ;;  %v8322_v40 = vand.u32 4294901760, %v8321_v48 }
 0x32d   :  { %8247 = vmatprep.subr.mxu1 %v25849_v0  ;;  %19503 = vmatpush1.xpose.msra.mxu0 %v25767_v25  ;;  %v8336_v25 = vand.u32 4294901760, %v25890_v33 }
 0x32e   :  { %19567 = vmatprep.mubr.f32.mxu0 %v25739_v8  ;;  %19575 = vmatprep.subr.mxu0 %v25853_v59  ;;  %v19648_v8 = vand.u32 4294901760, %v25901_v37  ;;  %v19644_v14 = vand.u32 4294901760, %v19643_v26  ;;  %v19664_v13 = vand.u32 4294901760, %v25906_v4 }
 0x32f   :  { %v8337_v38 = vsub.f32 %v25890_v33, %v8336_v25 }
 0x330   :  { %v19649_v17 = vsub.f32 %v25901_v37, %v19648_v8  ;;  %v19665_v32 = vsub.f32 %v25906_v4, %v19664_v13 }
 0x332   :  { %v19650_v35 = vand.u32 4294901760, %v19649_v17  ;;  %v19666_v57 = vand.u32 4294901760, %v19665_v32  ;;  %v148_v17 = vld [vmem:[#allocation5 + $0x2a8] sm:$0x3f] }
 0x333   :  { %8241 = vmatmul.mubr.f32.vlgmr.msra.gmra.mrb[0].mxu1 %v25756_v34  ;;  %19569 = vmatmul.mubr.f32.vlgmr.msra.gmra.mrb[0].mxu0 %v25765_v39  ;;  %v8338_v34 = vand.u32 4294901760, %v8337_v38  ;;  %v326_v39 = vcombine.high %v25824_v50, %v25824_v50  ;;  %v97_v50 = vld [vmem:[#allocation5 + $0x110] sm:$0x3f] }
 0x334   :  { %8249 = vmatpush1.xpose.msra.mxu1 %v25873_v9  ;;  %8317 = vmatprep.mubr.f32.mxu1 %v8316_v30  ;;  %v25983_v62 = vand.u32 4294901760, %v97_v50 }
 0x335   :  { %8333 = vmatprep.subr.mxu1 %v8332_v44  ;;  %19577 = vmatpush1.xpose.msra.mxu0 %v25879_v16  ;;  %v340_v42 = vrot.slane %v326_v39, %v24091_v5  ;;  %v99_v39 = vld [vmem:[#allocation5 + $0x120] sm:$0x3f] }
 0x336   :  { %19645 = vmatprep.mubr.f32.mxu0 %v19644_v14  ;;  %19661 = vmatprep.subr.mxu0 %v19660_v18  ;;  %v26000_v2 = vsub.f32 %v97_v50, %v25983_v62  ;;  %v100_v18 = vld [vmem:[#allocation5 + $0x128] sm:$0x3f]  ;;  %v26095_v49 = vand.u32 4294901760, %v99_v39 }
 0x337   :  { %v342_v61 = vcombine.high %v340_v42, %v340_v42  ;;  %v25978_v15 = vand.u32 4294901760, %v340_v42 }
 0x339   :  { %v25957_v43 = vand.u32 4294901760, %v342_v61 }
 0x33b   :  { %8323 = vmatmul.mubr.f32.vlgmr.msra.gmra.mrb[0].mxu1 %v8322_v40  ;;  %19651 = vmatmul.mubr.f32.vlgmr.msra.gmra.mrb[0].mxu0 %v19650_v35  ;;  %v25967_v7 = vsub.f32 %v342_v61, %v25957_v43  ;;  %v26071_v40 = vand.u32 4294901760, %v100_v18  ;;  %v26075_v35 = vand.u32 4294901760, %v148_v17 }
 0x33c   :  { %8339 = vmatpush1.xpose.msra.mxu1 %v8338_v34  ;;  %8403 = vmatprep.mubr.f32.mxu1 %v25847_v55 }
 0x33d   :  { %8412 = vmatprep.subr.mxu1 %v25861_v41  ;;  %19667 = vmatpush1.xpose.msra.mxu0 %v19666_v57  ;;  %v8786_v36 = vand.u32 4294901760, %v25967_v7  ;;  %v20114_v41 = vand.u32 4294901760, %v25975_v54  ;;  %v26083_v22 = vsub.f32 %v100_v18, %v26071_v40  ;;  %v26093_v28 = vsub.f32 %v148_v17, %v26075_v35 }
 0x33e   :  { %19731 = vmatprep.mubr.f32.mxu0 %v25851_v58  ;;  %19740 = vmatprep.subr.mxu0 %v25871_v6 }
 0x33f   :  { %v8787_v6 = vsub.f32 %v25967_v7, %v8786_v36 }
 0x343   :  { %8405 = vmatmul.mubr.f32.vlgmr.msra.gmra.mrb[0].mxu1 %v25868_v24  ;;  %19733 = vmatmul.mubr.f32.vlgmr.msra.gmra.mrb[0].mxu0 %v25877_v29 }
 0x344   :  { %8415 = vmatpush1.xpose.msra.mxu1 %v25890_v33  ;;  %8480 = vmatprep.mubr.f32.mxu1 %v25857_v20  ;;  %v25987_v20 = vand.u32 4294901760, %v544_v21 }
 0x345   :  { %8489 = vmatprep.subr.mxu1 %v25849_v0  ;;  %19743 = vmatpush1.xpose.msra.mxu0 %v25906_v4 }
 0x346   :  { %19808 = vmatprep.mubr.f32.mxu0 %v25865_v3  ;;  %19817 = vmatprep.subr.mxu0 %v25853_v59  ;;  %v20130_v3 = vand.u32 4294901760, %v25981_v56 }
 0x34b   :  { %8483 = vmatmul.mubr.f32.vlgmr.msra.gmra.mrb[0].mxu1 %v25884_v12  ;;  %19811 = vmatmul.mubr.f32.vlgmr.msra.gmra.mrb[0].mxu0 %v25901_v37  ;;  %v20131_v12 = vsub.f32 %v25981_v56, %v20130_v3 }
 0x34c   :  { %8491 = vmatpush1.xpose.msra.mxu1 %v25873_v9  ;;  %8557 = vmatprep.mubr.f32.mxu1 %v8314_v47 }
 0x34d   :  { %8569 = vmatprep.subr.mxu1 %v8330_v10  ;;  %19819 = vmatpush1.xpose.msra.mxu0 %v25879_v16  ;;  %v26011_v10 = vsub.f32 %v544_v21, %v25987_v20  ;;  %v20132_v4 = vand.u32 4294901760, %v20131_v12  ;;  %v147_v21 = vld [vmem:[#allocation5 + $0x2a0] sm:$0x3f] }
 0x34e   :  { %19885 = vmatprep.mubr.f32.mxu0 %v19642_v52  ;;  %19897 = vmatprep.subr.mxu0 %v19658_v11  ;;  %v8788_v11 = vand.u32 4294901760, %v8787_v6  ;;  %v26101_v50 = vand.u32 4294901760, %v147_v21 }
 0x353   :  { %8561 = vmatmul.mubr.f32.vlgmr.msra.gmra.mrb[0].mxu1 %v8320_v1  ;;  %19889 = vmatmul.mubr.f32.vlgmr.msra.gmra.mrb[0].mxu0 %v19648_v8  ;;  %v26051_v8 = vld [vmem:[#allocation2 + $0xa8] sm:$0xff] }
 0x354   :  { %8573 = vmatpush1.xpose.msra.mxu1 %v8336_v25  ;;  %8637 = vmatprep.mubr.f32.mxu1 %v25847_v55 }
 0x355   :  { %8645 = vmatprep.subr.mxu1 %v25849_v0  ;;  %19901 = vmatpush1.xpose.msra.mxu0 %v19664_v13  ;;  %v8802_v0 = vand.u32 4294901760, %v25971_v31  ;;  %v554_v13 = vrot.slane %v26051_v8, %v24091_v5 }
 0x356   :  { %19965 = vmatprep.mubr.f32.mxu0 %v25851_v58  ;;  %19973 = vmatprep.subr.mxu0 %v25853_v59  ;;  %v25994_v59 = vsub.f32 %v340_v42, %v25978_v15 }
 0x357   :  { %v8803_v47 = vsub.f32 %v25971_v31, %v8802_v0  ;;  %v562_v38 = vcombine.high %v554_v13, %v554_v13 }
 0x358   :  { %v8792_v52 = vand.u32 4294901760, %v25994_v59 }
 0x359   :  { %v8804_v33 = vand.u32 4294901760, %v8803_v47  ;;  %v26073_v34 = vand.u32 4294901760, %v562_v38 }
 0x35a   :  { %v8793_v37 = vsub.f32 %v25994_v59, %v8792_v52 }
 0x35b   :  { %8639 = vmatmul.mubr.f32.vlgmr.msra.gmra.mrb[0].mxu1 %v25868_v24  ;;  %19967 = vmatmul.mubr.f32.vlgmr.msra.gmra.mrb[0].mxu0 %v25877_v29  ;;  %v26087_v42 = vsub.f32 %v562_v38, %v26073_v34 }
 0x35c   :  { %8647 = vmatpush1.xpose.msra.mxu1 %v25873_v9  ;;  %8711 = vmatprep.mubr.f32.mxu1 %v25847_v55  ;;  %v26016_v55 = vsub.f32 %v145_v53, %v25989_v63  ;;  %v20115_v9 = vsub.f32 %v25975_v54, %v20114_v41  ;;  %v8794_v30 = vand.u32 4294901760, %v8793_v37  ;;  %v26112_v53 = vsub.f32 %v99_v39, %v26095_v49 }
 0x35d   :  { %8719 = vmatprep.subr.mxu1 %v25959_v51  ;;  %19975 = vmatpush1.xpose.msra.mxu0 %v25879_v16  ;;  %v8808_v16 = vand.u32 4294901760, %v26000_v2 }
 0x35e   :  { %20039 = vmatprep.mubr.f32.mxu0 %v25851_v58  ;;  %20047 = vmatprep.subr.mxu0 %v25963_v46  ;;  %v20120_v58 = vand.u32 4294901760, %v26011_v10  ;;  %v20116_v19 = vand.u32 4294901760, %v20115_v9  ;;  %v20136_v60 = vand.u32 4294901760, %v26016_v55 }
 0x35f   :  { %v8809_v26 = vsub.f32 %v26000_v2, %v8808_v16 }
 0x360   :  { %v20121_v1 = vsub.f32 %v26011_v10, %v20120_v58  ;;  %v20137_v23 = vsub.f32 %v26016_v55, %v20136_v60 }
 0x362   :  { %v20122_v25 = vand.u32 4294901760, %v20121_v1  ;;  %v20138_v44 = vand.u32 4294901760, %v20137_v23  ;;  %v150_v1 = vld [vmem:[#allocation5 + $0x2b8] sm:$0x3f] }
 0x363   :  { %8713 = vmatmul.mubr.f32.vlgmr.msra.gmra.mrb[0].mxu1 %v25868_v24  ;;  %20041 = vmatmul.mubr.f32.vlgmr.msra.gmra.mrb[0].mxu0 %v25877_v29  ;;  %v8810_v24 = vand.u32 4294901760, %v8809_v26  ;;  %v26046_v29 = vld [vmem:[#allocation2 + $0x48] sm:$0xff] }
 0x364   :  { %8721 = vmatpush1.xpose.msra.mxu1 %v25983_v62  ;;  %8789 = vmatprep.mubr.f32.mxu1 %v8788_v11  ;;  %v350_v14 = vrot.slane %v26046_v29, %v24091_v5 }
 0x365   :  { %8805 = vmatprep.subr.mxu1 %v8804_v33  ;;  %20049 = vmatpush1.xpose.msra.mxu0 %v25989_v63 }
 0x366   :  { %20117 = vmatprep.mubr.f32.mxu0 %v20116_v19  ;;  %20133 = vmatprep.subr.mxu0 %v20132_v4  ;;  %v358_v48 = vcombine.high %v350_v14, %v350_v14  ;;  %v26090_v61 = vand.u32 4294901760, %v350_v14  ;;  %v102_v4 = vld [vmem:[#allocation5 + $0x138] sm:$0x3f] }
 0x368   :  { %v26069_v32 = vand.u32 4294901760, %v358_v48 }
 0x36a   :  { %v26079_v57 = vsub.f32 %v358_v48, %v26069_v32 }
 0x36b   :  { %8795 = vmatmul.mubr.f32.vlgmr.msra.gmra.mrb[0].mxu1 %v8794_v30  ;;  %20123 = vmatmul.mubr.f32.vlgmr.msra.gmra.mrb[0].mxu0 %v20122_v25  ;;  %v26181_v30 = vand.u32 4294901760, %v102_v4  ;;  %v26185_v25 = vand.u32 4294901760, %v150_v1 }
 0x36c   :  { %8811 = vmatpush1.xpose.msra.mxu1 %v8810_v24  ;;  %8875 = vmatprep.mubr.f32.mxu1 %v25957_v43  ;;  %v9258_v27 = vand.u32 4294901760, %v26079_v57 }
 0x36d   :  { %8884 = vmatprep.subr.mxu1 %v25971_v31  ;;  %20139 = vmatpush1.xpose.msra.mxu0 %v20138_v44  ;;  %v20586_v31 = vand.u32 4294901760, %v26087_v42  ;;  %v26203_v18 = vsub.f32 %v150_v1, %v26185_v25 }
 0x36e   :  { %20203 = vmatprep.mubr.f32.mxu0 %v25961_v45  ;;  %20212 = vmatprep.subr.mxu0 %v25981_v56  ;;  %v9259_v56 = vsub.f32 %v26079_v57, %v9258_v27 }
 0x373   :  { %8877 = vmatmul.mubr.f32.vlgmr.msra.gmra.mrb[0].mxu1 %v25978_v15  ;;  %20205 = vmatmul.mubr.f32.vlgmr.msra.gmra.mrb[0].mxu0 %v25987_v20 }
 0x374   :  { %8887 = vmatpush1.xpose.msra.mxu1 %v26000_v2  ;;  %8952 = vmatprep.mubr.f32.mxu1 %v25967_v7  ;;  %v26099_v7 = vand.u32 4294901760, %v554_v13 }
 0x375   :  { %8961 = vmatprep.subr.mxu1 %v25959_v51  ;;  %20215 = vmatpush1.xpose.msra.mxu0 %v26016_v55 }
 0x376   :  { %20280 = vmatprep.mubr.f32.mxu0 %v25975_v54  ;;  %20289 = vmatprep.subr.mxu0 %v25963_v46  ;;  %v20602_v54 = vand.u32 4294901760, %v26093_v28 }
 0x37b   :  { %8955 = vmatmul.mubr.f32.vlgmr.msra.gmra.mrb[0].mxu1 %v25994_v59  ;;  %20283 = vmatmul.mubr.f32.vlgmr.msra.gmra.mrb[0].mxu0 %v26011_v10  ;;  %v20603_v59 = vsub.f32 %v26093_v28, %v20602_v54 }
 0x37c   :  { %8963 = vmatpush1.xpose.msra.mxu1 %v25983_v62  ;;  %9029 = vmatprep.mubr.f32.mxu1 %v8786_v36 }
 0x37d   :  { %9041 = vmatprep.subr.mxu1 %v8802_v0  ;;  %20291 = vmatpush1.xpose.msra.mxu0 %v25989_v63  ;;  %v26123_v0 = vsub.f32 %v554_v13, %v26099_v7  ;;  %v20604_v55 = vand.u32 4294901760, %v20603_v59  ;;  %v149_v13 = vld [vmem:[#allocation5 + $0x2b0] sm:$0x3f] }
 0x37e   :  { %20357 = vmatprep.mubr.f32.mxu0 %v20114_v41  ;;  %20369 = vmatprep.subr.mxu0 %v20130_v3  ;;  %v9260_v3 = vand.u32 4294901760, %v9259_v56  ;;  %v26211_v39 = vand.u32 4294901760, %v149_v13 }
 0x383   :  { %9033 = vmatmul.mubr.f32.vlgmr.msra.gmra.mrb[0].mxu1 %v8792_v52  ;;  %20361 = vmatmul.mubr.f32.vlgmr.msra.gmra.mrb[0].mxu0 %v20120_v58  ;;  %v547_v58 = vcombine.high %v26051_v8, %v26051_v8  ;;  %v26193_v8 = vsub.f32 %v102_v4, %v26181_v30 }
 0x384   :  { %9045 = vmatpush1.xpose.msra.mxu1 %v8808_v16  ;;  %9109 = vmatprep.mubr.f32.mxu1 %v25957_v43 }
 0x385   :  { %9117 = vmatprep.subr.mxu1 %v25959_v51  ;;  %20373 = vmatpush1.xpose.msra.mxu0 %v20136_v60  ;;  %v9274_v51 = vand.u32 4294901760, %v26083_v22  ;;  %v561_v60 = vrot.slane %v547_v58, %v24091_v5 }
 0x386   :  { %20437 = vmatprep.mubr.f32.mxu0 %v25961_v45  ;;  %20445 = vmatprep.subr.mxu0 %v25963_v46  ;;  %v26106_v46 = vsub.f32 %v350_v14, %v26090_v61 }
 0x387   :  { %v9275_v36 = vsub.f32 %v26083_v22, %v9274_v51  ;;  %v563_v26 = vcombine.high %v561_v60, %v561_v60 }
 0x388   :  { %v9264_v41 = vand.u32 4294901760, %v26106_v46 }
 0x389   :  { %v9276_v2 = vand.u32 4294901760, %v9275_v36  ;;  %v26183_v24 = vand.u32 4294901760, %v563_v26 }
 0x38a   :  { %v9265_v10 = vsub.f32 %v26106_v46, %v9264_v41 }
 0x38b   :  { %9111 = vmatmul.mubr.f32.vlgmr.msra.gmra.mrb[0].mxu1 %v25978_v15  ;;  %20439 = vmatmul.mubr.f32.vlgmr.msra.gmra.mrb[0].mxu0 %v25987_v20  ;;  %v26197_v14 = vsub.f32 %v563_v26, %v26183_v24 }
 0x38c   :  { %9119 = vmatpush1.xpose.msra.mxu1 %v25983_v62  ;;  %9183 = vmatprep.mubr.f32.mxu1 %v25957_v43  ;;  %v26128_v43 = vsub.f32 %v147_v21, %v26101_v50  ;;  %v20587_v62 = vsub.f32 %v26087_v42, %v20586_v31  ;;  %v9266_v11 = vand.u32 4294901760, %v9265_v10 }
 0x38d   :  { %9191 = vmatprep.subr.mxu1 %v26071_v40  ;;  %20447 = vmatpush1.xpose.msra.mxu0 %v25989_v63  ;;  %v9280_v63 = vand.u32 4294901760, %v26112_v53 }
 0x38e   :  { %20511 = vmatprep.mubr.f32.mxu0 %v25961_v45  ;;  %20519 = vmatprep.subr.mxu0 %v26075_v35  ;;  %v20592_v45 = vand.u32 4294901760, %v26123_v0  ;;  %v20588_v6 = vand.u32 4294901760, %v20587_v62  ;;  %v20608_v47 = vand.u32 4294901760, %v26128_v43 }
 0x38f   :  { %v9281_v9 = vsub.f32 %v26112_v53, %v9280_v63 }
 0x390   :  { %v20593_v52 = vsub.f32 %v26123_v0, %v20592_v45  ;;  %v20609_v12 = vsub.f32 %v26128_v43, %v20608_v47 }
 0x392   :  { %v20594_v16 = vand.u32 4294901760, %v20593_v52  ;;  %v20610_v33 = vand.u32 4294901760, %v20609_v12  ;;  %v152_v52 = vld [vmem:[#allocation5 + $0x2c8] sm:$0x3f] }
 0x393   :  { %9185 = vmatmul.mubr.f32.vlgmr.msra.gmra.mrb[0].mxu1 %v25978_v15  ;;  %20513 = vmatmul.mubr.f32.vlgmr.msra.gmra.mrb[0].mxu0 %v25987_v20  ;;  %v9282_v15 = vand.u32 4294901760, %v9281_v9  ;;  %v343_v20 = vcombine.high %v26046_v29, %v26046_v29  ;;  %v101_v29 = vld [vmem:[#allocation5 + $0x130] sm:$0x3f] }
 0x394   :  { %9193 = vmatpush1.xpose.msra.mxu1 %v26095_v49  ;;  %9261 = vmatprep.mubr.f32.mxu1 %v9260_v3  ;;  %v26205_v38 = vand.u32 4294901760, %v101_v29 }
 0x395   :  { %9277 = vmatprep.subr.mxu1 %v9276_v2  ;;  %20521 = vmatpush1.xpose.msra.mxu0 %v26101_v50  ;;  %v357_v19 = vrot.slane %v343_v20, %v24091_v5  ;;  %v103_v20 = vld [vmem:[#allocation5 + $0x140] sm:$0x3f] }
 0x396   :  { %20589 = vmatprep.mubr.f32.mxu0 %v20588_v6  ;;  %20605 = vmatprep.subr.mxu0 %v20604_v55  ;;  %v26222_v21 = vsub.f32 %v101_v29, %v26205_v38  ;;  %v104_v55 = vld [vmem:[#allocation5 + $0x148] sm:$0x3f]  ;;  %v26317_v26 = vand.u32 4294901760, %v103_v20 }
 0x397   :  { %v359_v37 = vcombine.high %v357_v19, %v357_v19  ;;  %v26200_v48 = vand.u32 4294901760, %v357_v19 }
 0x399   :  { %v26179_v23 = vand.u32 4294901760, %v359_v37 }
 0x39b   :  { %9267 = vmatmul.mubr.f32.vlgmr.msra.gmra.mrb[0].mxu1 %v9266_v11  ;;  %20595 = vmatmul.mubr.f32.vlgmr.msra.gmra.mrb[0].mxu0 %v20594_v16  ;;  %v26189_v44 = vsub.f32 %v359_v37, %v26179_v23  ;;  %v26293_v11 = vand.u32 4294901760, %v104_v55  ;;  %v26297_v16 = vand.u32 4294901760, %v152_v52 }
 0x39c   :  { %9283 = vmatpush1.xpose.msra.mxu1 %v9282_v15  ;;  %9347 = vmatprep.mubr.f32.mxu1 %v26069_v32 }
 0x39d   :  { %9356 = vmatprep.subr.mxu1 %v26083_v22  ;;  %20611 = vmatpush1.xpose.msra.mxu0 %v20610_v33  ;;  %v9730_v17 = vand.u32 4294901760, %v26189_v44  ;;  %v21058_v22 = vand.u32 4294901760, %v26197_v14  ;;  %v26305_v58 = vsub.f32 %v104_v55, %v26293_v11  ;;  %v26315_v4 = vsub.f32 %v152_v52, %v26297_v16 }
 0x39e   :  { %20675 = vmatprep.mubr.f32.mxu0 %v26073_v34  ;;  %20684 = vmatprep.subr.mxu0 %v26093_v28 }
 0x39f   :  { %v9731_v28 = vsub.f32 %v26189_v44, %v9730_v17 }
 0x3a3   :  { %9349 = vmatmul.mubr.f32.vlgmr.msra.gmra.mrb[0].mxu1 %v26090_v61  ;;  %20677 = vmatmul.mubr.f32.vlgmr.msra.gmra.mrb[0].mxu0 %v26099_v7 }
 0x3a4   :  { %9359 = vmatpush1.xpose.msra.mxu1 %v26112_v53  ;;  %9424 = vmatprep.mubr.f32.mxu1 %v26079_v57  ;;  %v26209_v57 = vand.u32 4294901760, %v561_v60 }
 0x3a5   :  { %9433 = vmatprep.subr.mxu1 %v26071_v40  ;;  %20687 = vmatpush1.xpose.msra.mxu0 %v26128_v43 }
 0x3a6   :  { %20752 = vmatprep.mubr.f32.mxu0 %v26087_v42  ;;  %20761 = vmatprep.subr.mxu0 %v26075_v35  ;;  %v21074_v42 = vand.u32 4294901760, %v26203_v18 }
 0x3ab   :  { %9427 = vmatmul.mubr.f32.vlgmr.msra.gmra.mrb[0].mxu1 %v26106_v46  ;;  %20755 = vmatmul.mubr.f32.vlgmr.msra.gmra.mrb[0].mxu0 %v26123_v0  ;;  %v21075_v46 = vsub.f32 %v26203_v18, %v21074_v42 }
 0x3ac   :  { %9435 = vmatpush1.xpose.msra.mxu1 %v26095_v49  ;;  %9501 = vmatprep.mubr.f32.mxu1 %v9258_v27 }
 0x3ad   :  { %9513 = vmatprep.subr.mxu1 %v9274_v51  ;;  %20763 = vmatpush1.xpose.msra.mxu0 %v26101_v50  ;;  %v26233_v51 = vsub.f32 %v561_v60, %v26209_v57  ;;  %v21076_v43 = vand.u32 4294901760, %v21075_v46  ;;  %v151_v60 = vld [vmem:[#allocation5 + $0x2c0] sm:$0x3f] }
 0x3ae   :  { %20829 = vmatprep.mubr.f32.mxu0 %v20586_v31  ;;  %20841 = vmatprep.subr.mxu0 %v20602_v54  ;;  %v9732_v54 = vand.u32 4294901760, %v9731_v28  ;;  %v26323_v29 = vand.u32 4294901760, %v151_v60 }
 0x3b3   :  { %9505 = vmatmul.mubr.f32.vlgmr.msra.gmra.mrb[0].mxu1 %v9264_v41  ;;  %20833 = vmatmul.mubr.f32.vlgmr.msra.gmra.mrb[0].mxu0 %v20592_v45  ;;  %v26273_v45 = vld [vmem:[#allocation2 + $0xb0] sm:$0xff] }
 0x3b4   :  { %9517 = vmatpush1.xpose.msra.mxu1 %v9280_v63  ;;  %9581 = vmatprep.mubr.f32.mxu1 %v26069_v32 }
 0x3b5   :  { %9589 = vmatprep.subr.mxu1 %v26071_v40  ;;  %20845 = vmatpush1.xpose.msra.mxu0 %v20608_v47  ;;  %v9746_v40 = vand.u32 4294901760, %v26193_v8  ;;  %v571_v47 = vrot.slane %v26273_v45, %v24091_v5 }
 0x3b6   :  { %20909 = vmatprep.mubr.f32.mxu0 %v26073_v34  ;;  %20917 = vmatprep.subr.mxu0 %v26075_v35  ;;  %v26216_v35 = vsub.f32 %v357_v19, %v26200_v48 }
 0x3b7   :  { %v9747_v27 = vsub.f32 %v26193_v8, %v9746_v40  ;;  %v579_v9 = vcombine.high %v571_v47, %v571_v47 }
 0x3b8   :  { %v9736_v31 = vand.u32 4294901760, %v26216_v35 }
 0x3b9   :  { %v9748_v53 = vand.u32 4294901760, %v9747_v27  ;;  %v26295_v15 = vand.u32 4294901760, %v579_v9 }
 0x3ba   :  { %v9737_v0 = vsub.f32 %v26216_v35, %v9736_v31 }
 0x3bb   :  { %9583 = vmatmul.mubr.f32.vlgmr.msra.gmra.mrb[0].mxu1 %v26090_v61  ;;  %20911 = vmatmul.mubr.f32.vlgmr.msra.gmra.mrb[0].mxu0 %v26099_v7  ;;  %v26309_v19 = vsub.f32 %v579_v9, %v26295_v15 }
 0x3bc   :  { %9591 = vmatpush1.xpose.msra.mxu1 %v26095_v49  ;;  %9655 = vmatprep.mubr.f32.mxu1 %v26069_v32  ;;  %v26238_v32 = vsub.f32 %v149_v13, %v26211_v39  ;;  %v21059_v49 = vsub.f32 %v26197_v14, %v21058_v22  ;;  %v9738_v3 = vand.u32 4294901760, %v9737_v0  ;;  %v26334_v13 = vsub.f32 %v103_v20, %v26317_v26 }
 0x3bd   :  { %9663 = vmatprep.subr.mxu1 %v26181_v30  ;;  %20919 = vmatpush1.xpose.msra.mxu0 %v26101_v50  ;;  %v9752_v50 = vand.u32 4294901760, %v26222_v21 }
 0x3be   :  { %20983 = vmatprep.mubr.f32.mxu0 %v26073_v34  ;;  %20991 = vmatprep.subr.mxu0 %v26185_v25  ;;  %v21064_v34 = vand.u32 4294901760, %v26233_v51  ;;  %v21060_v56 = vand.u32 4294901760, %v21059_v49  ;;  %v21080_v36 = vand.u32 4294901760, %v26238_v32 }
 0x3bf   :  { %v9753_v62 = vsub.f32 %v26222_v21, %v9752_v50 }
 0x3c0   :  { %v21065_v41 = vsub.f32 %v26233_v51, %v21064_v34  ;;  %v21081_v59 = vsub.f32 %v26238_v32, %v21080_v36 }
 0x3c2   :  { %v21066_v63 = vand.u32 4294901760, %v21065_v41  ;;  %v21082_v2 = vand.u32 4294901760, %v21081_v59  ;;  %v154_v41 = vld [vmem:[#allocation5 + $0x2d8] sm:$0x3f] }
 0x3c3   :  { %9657 = vmatmul.mubr.f32.vlgmr.msra.gmra.mrb[0].mxu1 %v26090_v61  ;;  %20985 = vmatmul.mubr.f32.vlgmr.msra.gmra.mrb[0].mxu0 %v26099_v7  ;;  %v9754_v61 = vand.u32 4294901760, %v9753_v62  ;;  %v26268_v7 = vld [vmem:[#allocation2 + $0x50] sm:$0xff] }
 0x3c4   :  { %9665 = vmatpush1.xpose.msra.mxu1 %v26205_v38  ;;  %9733 = vmatprep.mubr.f32.mxu1 %v9732_v54  ;;  %v367_v6 = vrot.slane %v26268_v7, %v24091_v5 }
 0x3c5   :  { %9749 = vmatprep.subr.mxu1 %v9748_v53  ;;  %20993 = vmatpush1.xpose.msra.mxu0 %v26211_v39 }
 0x3c6   :  { %21061 = vmatprep.mubr.f32.mxu0 %v21060_v56  ;;  %21077 = vmatprep.subr.mxu0 %v21076_v43  ;;  %v375_v10 = vcombine.high %v367_v6, %v367_v6  ;;  %v26312_v37 = vand.u32 4294901760, %v367_v6  ;;  %v106_v43 = vld [vmem:[#allocation5 + $0x158] sm:$0x3f] }
 0x3c8   :  { %v26291_v12 = vand.u32 4294901760, %v375_v10 }
 0x3ca   :  { %v26301_v33 = vsub.f32 %v375_v10, %v26291_v12 }
 0x3cb   :  { %9739 = vmatmul.mubr.f32.vlgmr.msra.gmra.mrb[0].mxu1 %v9738_v3  ;;  %21067 = vmatmul.mubr.f32.vlgmr.msra.gmra.mrb[0].mxu0 %v21066_v63  ;;  %v26403_v3 = vand.u32 4294901760, %v106_v43  ;;  %v26407_v63 = vand.u32 4294901760, %v154_v41 }
 0x3cc   :  { %9755 = vmatpush1.xpose.msra.mxu1 %v9754_v61  ;;  %9819 = vmatprep.mubr.f32.mxu1 %v26179_v23  ;;  %v10202_v1 = vand.u32 4294901760, %v26301_v33 }
 0x3cd   :  { %9828 = vmatprep.subr.mxu1 %v26193_v8  ;;  %21083 = vmatpush1.xpose.msra.mxu0 %v21082_v2  ;;  %v21530_v8 = vand.u32 4294901760, %v26309_v19  ;;  %v26425_v55 = vsub.f32 %v154_v41, %v26407_v63 }
 0x3ce   :  { %21147 = vmatprep.mubr.f32.mxu0 %v26183_v24  ;;  %21156 = vmatprep.subr.mxu0 %v26203_v18  ;;  %v10203_v18 = vsub.f32 %v26301_v33, %v10202_v1 }
 0x3d3   :  { %9821 = vmatmul.mubr.f32.vlgmr.msra.gmra.mrb[0].mxu1 %v26200_v48  ;;  %21149 = vmatmul.mubr.f32.vlgmr.msra.gmra.mrb[0].mxu0 %v26209_v57 }
 0x3d4   :  { %9831 = vmatpush1.xpose.msra.mxu1 %v26222_v21  ;;  %9896 = vmatprep.mubr.f32.mxu1 %v26189_v44  ;;  %v26321_v44 = vand.u32 4294901760, %v571_v47 }
 0x3d5   :  { %9905 = vmatprep.subr.mxu1 %v26181_v30  ;;  %21159 = vmatpush1.xpose.msra.mxu0 %v26238_v32 }
 0x3d6   :  { %21224 = vmatprep.mubr.f32.mxu0 %v26197_v14  ;;  %21233 = vmatprep.subr.mxu0 %v26185_v25  ;;  %v21546_v14 = vand.u32 4294901760, %v26315_v4 }
 0x3db   :  { %9899 = vmatmul.mubr.f32.vlgmr.msra.gmra.mrb[0].mxu1 %v26216_v35  ;;  %21227 = vmatmul.mubr.f32.vlgmr.msra.gmra.mrb[0].mxu0 %v26233_v51  ;;  %v21547_v35 = vsub.f32 %v26315_v4, %v21546_v14 }
 0x3dc   :  { %9907 = vmatpush1.xpose.msra.mxu1 %v26205_v38  ;;  %9973 = vmatprep.mubr.f32.mxu1 %v9730_v17 }
 0x3dd   :  { %9985 = vmatprep.subr.mxu1 %v9746_v40  ;;  %21235 = vmatpush1.xpose.msra.mxu0 %v26211_v39  ;;  %v26345_v40 = vsub.f32 %v571_v47, %v26321_v44  ;;  %v21548_v32 = vand.u32 4294901760, %v21547_v35  ;;  %v153_v47 = vld [vmem:[#allocation5 + $0x2d0] sm:$0x3f] }
 0x3de   :  { %21301 = vmatprep.mubr.f32.mxu0 %v21058_v22  ;;  %21313 = vmatprep.subr.mxu0 %v21074_v42  ;;  %v10204_v42 = vand.u32 4294901760, %v10203_v18  ;;  %v26433_v20 = vand.u32 4294901760, %v153_v47 }
 0x3e3   :  { %9977 = vmatmul.mubr.f32.vlgmr.msra.gmra.mrb[0].mxu1 %v9736_v31  ;;  %21305 = vmatmul.mubr.f32.vlgmr.msra.gmra.mrb[0].mxu0 %v21064_v34  ;;  %v564_v34 = vcombine.high %v26273_v45, %v26273_v45  ;;  %v26415_v45 = vsub.f32 %v106_v43, %v26403_v3 }
 0x3e4   :  { %9989 = vmatpush1.xpose.msra.mxu1 %v9752_v50  ;;  %10053 = vmatprep.mubr.f32.mxu1 %v26179_v23 }
 0x3e5   :  { %10061 = vmatprep.subr.mxu1 %v26181_v30  ;;  %21317 = vmatpush1.xpose.msra.mxu0 %v21080_v36  ;;  %v10218_v30 = vand.u32 4294901760, %v26305_v58  ;;  %v578_v36 = vrot.slane %v564_v34, %v24091_v5 }
 0x3e6   :  { %21381 = vmatprep.mubr.f32.mxu0 %v26183_v24  ;;  %21389 = vmatprep.subr.mxu0 %v26185_v25  ;;  %v26328_v25 = vsub.f32 %v367_v6, %v26312_v37 }
 0x3e7   :  { %v10219_v17 = vsub.f32 %v26305_v58, %v10218_v30  ;;  %v580_v62 = vcombine.high %v578_v36, %v578_v36 }
 0x3e8   :  { %v10208_v22 = vand.u32 4294901760, %v26328_v25 }
 0x3e9   :  { %v10220_v21 = vand.u32 4294901760, %v10219_v17  ;;  %v26405_v61 = vand.u32 4294901760, %v580_v62 }
 0x3ea   :  { %v10209_v51 = vsub.f32 %v26328_v25, %v10208_v22 }
 0x3eb   :  { %10055 = vmatmul.mubr.f32.vlgmr.msra.gmra.mrb[0].mxu1 %v26200_v48  ;;  %21383 = vmatmul.mubr.f32.vlgmr.msra.gmra.mrb[0].mxu0 %v26209_v57  ;;  %v26419_v6 = vsub.f32 %v580_v62, %v26405_v61 }
 0x3ec   :  { %10063 = vmatpush1.xpose.msra.mxu1 %v26205_v38  ;;  %10127 = vmatprep.mubr.f32.mxu1 %v26179_v23  ;;  %v26350_v23 = vsub.f32 %v151_v60, %v26323_v29  ;;  %v21531_v38 = vsub.f32 %v26309_v19, %v21530_v8  ;;  %v10210_v54 = vand.u32 4294901760, %v10209_v51 }
 0x3ed   :  { %10135 = vmatprep.subr.mxu1 %v26293_v11  ;;  %21391 = vmatpush1.xpose.msra.mxu0 %v26211_v39  ;;  %v10224_v39 = vand.u32 4294901760, %v26334_v13 }
 0x3ee   :  { %21455 = vmatprep.mubr.f32.mxu0 %v26183_v24  ;;  %21463 = vmatprep.subr.mxu0 %v26297_v16  ;;  %v21536_v24 = vand.u32 4294901760, %v26345_v40  ;;  %v21532_v28 = vand.u32 4294901760, %v21531_v38  ;;  %v21552_v27 = vand.u32 4294901760, %v26350_v23 }
 0x3ef   :  { %v10225_v49 = vsub.f32 %v26334_v13, %v10224_v39 }
 0x3f0   :  { %v21537_v31 = vsub.f32 %v26345_v40, %v21536_v24  ;;  %v21553_v46 = vsub.f32 %v26350_v23, %v21552_v27 }
 0x3f2   :  { %v21538_v50 = vand.u32 4294901760, %v21537_v31  ;;  %v21554_v53 = vand.u32 4294901760, %v21553_v46  ;;  %v156_v31 = vld [vmem:[#allocation5 + $0x2e8] sm:$0x3f] }
 0x3f3   :  { %10129 = vmatmul.mubr.f32.vlgmr.msra.gmra.mrb[0].mxu1 %v26200_v48  ;;  %21457 = vmatmul.mubr.f32.vlgmr.msra.gmra.mrb[0].mxu0 %v26209_v57  ;;  %v10226_v48 = vand.u32 4294901760, %v10225_v49  ;;  %v360_v57 = vcombine.high %v26268_v7, %v26268_v7  ;;  %v105_v7 = vld [vmem:[#allocation5 + $0x150] sm:$0x3f] }
 0x3f4   :  { %10137 = vmatpush1.xpose.msra.mxu1 %v26317_v26  ;;  %10205 = vmatprep.mubr.f32.mxu1 %v10204_v42  ;;  %v26427_v9 = vand.u32 4294901760, %v105_v7 }
 0x3f5   :  { %10221 = vmatprep.subr.mxu1 %v10220_v21  ;;  %21465 = vmatpush1.xpose.msra.mxu0 %v26323_v29  ;;  %v374_v56 = vrot.slane %v360_v57, %v24091_v5  ;;  %v107_v57 = vld [vmem:[#allocation5 + $0x160] sm:$0x3f] }
 0x3f6   :  { %21533 = vmatprep.mubr.f32.mxu0 %v21532_v28  ;;  %21549 = vmatprep.subr.mxu0 %v21548_v32  ;;  %v26444_v60 = vsub.f32 %v105_v7, %v26427_v9  ;;  %v108_v32 = vld [vmem:[#allocation5 + $0x168] sm:$0x3f]  ;;  %v26539_v62 = vand.u32 4294901760, %v107_v57 }
 0x3f7   :  { %v376_v0 = vcombine.high %v374_v56, %v374_v56  ;;  %v26422_v10 = vand.u32 4294901760, %v374_v56 }
 0x3f9   :  { %v26401_v59 = vand.u32 4294901760, %v376_v0 }
 0x3fb   :  { %10211 = vmatmul.mubr.f32.vlgmr.msra.gmra.mrb[0].mxu1 %v10210_v54  ;;  %21539 = vmatmul.mubr.f32.vlgmr.msra.gmra.mrb[0].mxu0 %v21538_v50  ;;  %v26411_v2 = vsub.f32 %v376_v0, %v26401_v59  ;;  %v26515_v54 = vand.u32 4294901760, %v108_v32  ;;  %v26519_v50 = vand.u32 4294901760, %v156_v31 }
 0x3fc   :  { %10227 = vmatpush1.xpose.msra.mxu1 %v10226_v48  ;;  %10291 = vmatprep.mubr.f32.mxu1 %v26291_v12 }
 0x3fd   :  { %10300 = vmatprep.subr.mxu1 %v26305_v58  ;;  %21555 = vmatpush1.xpose.msra.mxu0 %v21554_v53  ;;  %v10674_v52 = vand.u32 4294901760, %v26411_v2  ;;  %v22002_v58 = vand.u32 4294901760, %v26419_v6  ;;  %v26527_v34 = vsub.f32 %v108_v32, %v26515_v54  ;;  %v26537_v43 = vsub.f32 %v156_v31, %v26519_v50 }
 0x3fe   :  { %21619 = vmatprep.mubr.f32.mxu0 %v26295_v15  ;;  %21628 = vmatprep.subr.mxu0 %v26315_v4 }
 0x3ff   :  { %v10675_v4 = vsub.f32 %v26411_v2, %v10674_v52 }
 0x403   :  { %10293 = vmatmul.mubr.f32.vlgmr.msra.gmra.mrb[0].mxu1 %v26312_v37  ;;  %21621 = vmatmul.mubr.f32.vlgmr.msra.gmra.mrb[0].mxu0 %v26321_v44 }
 0x404   :  { %10303 = vmatpush1.xpose.msra.mxu1 %v26334_v13  ;;  %10368 = vmatprep.mubr.f32.mxu1 %v26301_v33  ;;  %v26431_v33 = vand.u32 4294901760, %v578_v36 }
 0x405   :  { %10377 = vmatprep.subr.mxu1 %v26293_v11  ;;  %21631 = vmatpush1.xpose.msra.mxu0 %v26350_v23 }
 0x406   :  { %21696 = vmatprep.mubr.f32.mxu0 %v26309_v19  ;;  %21705 = vmatprep.subr.mxu0 %v26297_v16  ;;  %v22018_v19 = vand.u32 4294901760, %v26425_v55 }
 0x40b   :  { %10371 = vmatmul.mubr.f32.vlgmr.msra.gmra.mrb[0].mxu1 %v26328_v25  ;;  %21699 = vmatmul.mubr.f32.vlgmr.msra.gmra.mrb[0].mxu0 %v26345_v40  ;;  %v22019_v25 = vsub.f32 %v26425_v55, %v22018_v19 }
 0x40c   :  { %10379 = vmatpush1.xpose.msra.mxu1 %v26317_v26  ;;  %10445 = vmatprep.mubr.f32.mxu1 %v10202_v1 }
 0x40d   :  { %10457 = vmatprep.subr.mxu1 %v10218_v30  ;;  %21707 = vmatpush1.xpose.msra.mxu0 %v26323_v29  ;;  %v26455_v30 = vsub.f32 %v578_v36, %v26431_v33  ;;  %v22020_v23 = vand.u32 4294901760, %v22019_v25  ;;  %v155_v36 = vld [vmem:[#allocation5 + $0x2e0] sm:$0x3f] }
 0x40e   :  { %21773 = vmatprep.mubr.f32.mxu0 %v21530_v8  ;;  %21785 = vmatprep.subr.mxu0 %v21546_v14  ;;  %v10676_v14 = vand.u32 4294901760, %v10675_v4  ;;  %v26545_v7 = vand.u32 4294901760, %v155_v36 }
 0x413   :  { %10449 = vmatmul.mubr.f32.vlgmr.msra.gmra.mrb[0].mxu1 %v10208_v22  ;;  %21777 = vmatmul.mubr.f32.vlgmr.msra.gmra.mrb[0].mxu0 %v21536_v24  ;;  %v26495_v24 = vld [vmem:[#allocation2 + $0xb8] sm:$0xff] }
 0x414   :  { %10461 = vmatpush1.xpose.msra.mxu1 %v10224_v39  ;;  %10525 = vmatprep.mubr.f32.mxu1 %v26291_v12 }
 0x415   :  { %10533 = vmatprep.subr.mxu1 %v26293_v11  ;;  %21789 = vmatpush1.xpose.msra.mxu0 %v21552_v27  ;;  %v10690_v11 = vand.u32 4294901760, %v26415_v45  ;;  %v588_v27 = vrot.slane %v26495_v24, %v24091_v5 }
 0x416   :  { %21853 = vmatprep.mubr.f32.mxu0 %v26295_v15  ;;  %21861 = vmatprep.subr.mxu0 %v26297_v16  ;;  %v26438_v16 = vsub.f32 %v374_v56, %v26422_v10 }
 0x417   :  { %v10691_v1 = vsub.f32 %v26415_v45, %v10690_v11  ;;  %v596_v49 = vcombine.high %v588_v27, %v588_v27 }
 0x418   :  { %v10680_v8 = vand.u32 4294901760, %v26438_v16 }
 0x419   :  { %v10692_v13 = vand.u32 4294901760, %v10691_v1  ;;  %v26517_v48 = vand.u32 4294901760, %v596_v49 }
 0x41a   :  { %v10681_v40 = vsub.f32 %v26438_v16, %v10680_v8 }
 0x41b   :  { %10527 = vmatmul.mubr.f32.vlgmr.msra.gmra.mrb[0].mxu1 %v26312_v37  ;;  %21855 = vmatmul.mubr.f32.vlgmr.msra.gmra.mrb[0].mxu0 %v26321_v44  ;;  %v26531_v56 = vsub.f32 %v596_v49, %v26517_v48 }
 0x41c   :  { %10535 = vmatpush1.xpose.msra.mxu1 %v26317_v26  ;;  %10599 = vmatprep.mubr.f32.mxu1 %v26291_v12  ;;  %v26460_v12 = vsub.f32 %v153_v47, %v26433_v20  ;;  %v22003_v26 = vsub.f32 %v26419_v6, %v22002_v58  ;;  %v10682_v42 = vand.u32 4294901760, %v10681_v40  ;;  %v26556_v47 = vsub.f32 %v107_v57, %v26539_v62 }
 0x41d   :  { %10607 = vmatprep.subr.mxu1 %v26403_v3  ;;  %21863 = vmatpush1.xpose.msra.mxu0 %v26323_v29  ;;  %v10696_v29 = vand.u32 4294901760, %v26444_v60 }
 0x41e   :  { %21927 = vmatprep.mubr.f32.mxu0 %v26295_v15  ;;  %21935 = vmatprep.subr.mxu0 %v26407_v63  ;;  %v22008_v15 = vand.u32 4294901760, %v26455_v30  ;;  %v22004_v18 = vand.u32 4294901760, %v22003_v26  ;;  %v22024_v17 = vand.u32 4294901760, %v26460_v12 }
 0x41f   :  { %v10697_v38 = vsub.f32 %v26444_v60, %v10696_v29 }
 0x420   :  { %v22009_v22 = vsub.f32 %v26455_v30, %v22008_v15  ;;  %v22025_v35 = vsub.f32 %v26460_v12, %v22024_v17 }
 0x422   :  { %v22010_v39 = vand.u32 4294901760, %v22009_v22  ;;  %v22026_v21 = vand.u32 4294901760, %v22025_v35 }
 0x423   :  { %10601 = vmatmul.mubr.f32.vlgmr.msra.gmra.mrb[0].mxu1 %v26312_v37  ;;  %21929 = vmatmul.mubr.f32.vlgmr.msra.gmra.mrb[0].mxu0 %v26321_v44  ;;  %v10698_v37 = vand.u32 4294901760, %v10697_v38  ;;  %v26490_v44 = vld [vmem:[#allocation2 + $0x58] sm:$0xff] }
 0x424   :  { %10609 = vmatpush1.xpose.msra.mxu1 %v26427_v9  ;;  %10677 = vmatprep.mubr.f32.mxu1 %v10676_v14  ;;  %v384_v28 = vrot.slane %v26490_v44, %v24091_v5  ;;  %v158_v38 = vld [vmem:[#allocation5 + $0x2f8] sm:$0x3f] }
 0x425   :  { %10693 = vmatprep.subr.mxu1 %v10692_v13  ;;  %21937 = vmatpush1.xpose.msra.mxu0 %v26433_v20 }
 0x426   :  { %22005 = vmatprep.mubr.f32.mxu0 %v22004_v18  ;;  %22021 = vmatprep.subr.mxu0 %v22020_v23  ;;  %v392_v51 = vcombine.high %v384_v28, %v384_v28  ;;  %v26534_v0 = vand.u32 4294901760, %v384_v28  ;;  %v110_v23 = vld [vmem:[#allocation5 + $0x178] sm:$0x3f] }
 0x427   :  { %v26625_v35 = vand.u32 4294901760, %v110_v23 }
 0x428   :  { %v26513_v46 = vand.u32 4294901760, %v392_v51 }
 0x42a   :  { %v26523_v53 = vsub.f32 %v392_v51, %v26513_v46 }
 0x42b   :  { %10683 = vmatmul.mubr.f32.vlgmr.msra.gmra.mrb[0].mxu1 %v10682_v42  ;;  %22011 = vmatmul.mubr.f32.vlgmr.msra.gmra.mrb[0].mxu0 %v22010_v39 }
 0x42c   :  { %10699 = vmatpush1.xpose.msra.mxu1 %v10698_v37  ;;  %10763 = vmatprep.mubr.f32.mxu1 %v26401_v59  ;;  %v11146_v41 = vand.u32 4294901760, %v26523_v53  ;;  %v26629_v37 = vand.u32 4294901760, %v158_v38 }
 0x42d   :  { %10772 = vmatprep.subr.mxu1 %v26415_v45  ;;  %22027 = vmatpush1.xpose.msra.mxu0 %v22026_v21  ;;  %v22474_v45 = vand.u32 4294901760, %v26531_v56  ;;  %v109_v21 = vld [vmem:[#allocation5 + $0x170] sm:$0x3f] }
 0x42e   :  { %22091 = vmatprep.mubr.f32.mxu0 %v26405_v61  ;;  %22100 = vmatprep.subr.mxu0 %v26425_v55  ;;  %v11147_v55 = vsub.f32 %v26523_v53, %v11146_v41  ;;  %v26647_v51 = vsub.f32 %v158_v38, %v26629_v37  ;;  %v26649_v32 = vand.u32 4294901760, %v109_v21 }
 0x433   :  { %10765 = vmatmul.mubr.f32.vlgmr.msra.gmra.mrb[0].mxu1 %v26422_v10  ;;  %22093 = vmatmul.mubr.f32.vlgmr.msra.gmra.mrb[0].mxu0 %v26431_v33 }
 0x434   :  { %10775 = vmatpush1.xpose.msra.mxu1 %v26444_v60  ;;  %10840 = vmatprep.mubr.f32.mxu1 %v26411_v2  ;;  %v26543_v2 = vand.u32 4294901760, %v588_v27 }
 0x435   :  { %10849 = vmatprep.subr.mxu1 %v26403_v3  ;;  %22103 = vmatpush1.xpose.msra.mxu0 %v26460_v12 }
 0x436   :  { %22168 = vmatprep.mubr.f32.mxu0 %v26419_v6  ;;  %22177 = vmatprep.subr.mxu0 %v26407_v63  ;;  %v22490_v6 = vand.u32 4294901760, %v26537_v43 }
 0x43b   :  { %10843 = vmatmul.mubr.f32.vlgmr.msra.gmra.mrb[0].mxu1 %v26438_v16  ;;  %22171 = vmatmul.mubr.f32.vlgmr.msra.gmra.mrb[0].mxu0 %v26455_v30  ;;  %v22491_v16 = vsub.f32 %v26537_v43, %v22490_v6 }
 0x43c   :  { %10851 = vmatpush1.xpose.msra.mxu1 %v26427_v9  ;;  %10917 = vmatprep.mubr.f32.mxu1 %v10674_v52 }
 0x43d   :  { %10929 = vmatprep.subr.mxu1 %v10690_v11  ;;  %22179 = vmatpush1.xpose.msra.mxu0 %v26433_v20  ;;  %v26567_v11 = vsub.f32 %v588_v27, %v26543_v2  ;;  %v22492_v12 = vand.u32 4294901760, %v22491_v16 }
 0x43e   :  { %22245 = vmatprep.mubr.f32.mxu0 %v22002_v58  ;;  %22257 = vmatprep.subr.mxu0 %v22018_v19  ;;  %v11148_v19 = vand.u32 4294901760, %v11147_v55 }
 0x443   :  { %10921 = vmatmul.mubr.f32.vlgmr.msra.gmra.mrb[0].mxu1 %v10680_v8  ;;  %22249 = vmatmul.mubr.f32.vlgmr.msra.gmra.mrb[0].mxu0 %v22008_v15  ;;  %v581_v15 = vcombine.high %v26495_v24, %v26495_v24 }
 0x444   :  { %10933 = vmatpush1.xpose.msra.mxu1 %v10696_v29  ;;  %10997 = vmatprep.mubr.f32.mxu1 %v26401_v59 }
 0x445   :  { %11005 = vmatprep.subr.mxu1 %v26403_v3  ;;  %22261 = vmatpush1.xpose.msra.mxu0 %v22024_v17  ;;  %v11162_v3 = vand.u32 4294901760, %v26527_v34  ;;  %v595_v17 = vrot.slane %v581_v15, %v24091_v5 }
 0x446   :  { %22325 = vmatprep.mubr.f32.mxu0 %v26405_v61  ;;  %22333 = vmatprep.subr.mxu0 %v26407_v63  ;;  %v26550_v63 = vsub.f32 %v384_v28, %v26534_v0  ;;  %v157_v28 = vld [vmem:[#allocation5 + $0x2f0] sm:$0x3f] }
 0x447   :  { %v11163_v52 = vsub.f32 %v26527_v34, %v11162_v3 }
 0x448   :  { %v11152_v58 = vand.u32 4294901760, %v26550_v63 }
 0x449   :  { %v11164_v60 = vand.u32 4294901760, %v11163_v52 }
 0x44a   :  { %v11153_v30 = vsub.f32 %v26550_v63, %v11152_v58 }
 0x44b   :  { %10999 = vmatmul.mubr.f32.vlgmr.msra.gmra.mrb[0].mxu1 %v26422_v10  ;;  %22327 = vmatmul.mubr.f32.vlgmr.msra.gmra.mrb[0].mxu0 %v26431_v33 }
 0x44c   :  { %11007 = vmatpush1.xpose.msra.mxu1 %v26427_v9  ;;  %11071 = vmatprep.mubr.f32.mxu1 %v26401_v59  ;;  %v26572_v59 = vsub.f32 %v155_v36, %v26545_v7  ;;  %v22475_v9 = vsub.f32 %v26531_v56, %v22474_v45  ;;  %v11154_v14 = vand.u32 4294901760, %v11153_v30 }
 0x44d   :  { %11079 = vmatprep.subr.mxu1 %v26515_v54  ;;  %22335 = vmatpush1.xpose.msra.mxu0 %v26433_v20  ;;  %v11168_v20 = vand.u32 4294901760, %v26556_v47 }
 0x44e   :  { %22399 = vmatprep.mubr.f32.mxu0 %v26405_v61  ;;  %22407 = vmatprep.subr.mxu0 %v26519_v50  ;;  %v22480_v61 = vand.u32 4294901760, %v26567_v11  ;;  %v22476_v4 = vand.u32 4294901760, %v22475_v9  ;;  %v22496_v1 = vand.u32 4294901760, %v26572_v59 }
 0x44f   :  { %v11169_v26 = vsub.f32 %v26556_v47, %v11168_v20 }
 0x450   :  { %v22481_v8 = vsub.f32 %v26567_v11, %v22480_v61  ;;  %v22497_v25 = vsub.f32 %v26572_v59, %v22496_v1 }
 0x452   :  { %v22482_v29 = vand.u32 4294901760, %v22481_v8  ;;  %v22498_v13 = vand.u32 4294901760, %v22497_v25 }
 0x453   :  { %11073 = vmatmul.mubr.f32.vlgmr.msra.gmra.mrb[0].mxu1 %v26422_v10  ;;  %22401 = vmatmul.mubr.f32.vlgmr.msra.gmra.mrb[0].mxu0 %v26431_v33  ;;  %v11170_v10 = vand.u32 4294901760, %v11169_v26  ;;  %v377_v33 = vcombine.high %v26490_v44, %v26490_v44  ;;  %v26637_v44 = vsub.f32 %v110_v23, %v26625_v35 }
 0x454   :  { %11081 = vmatpush1.xpose.msra.mxu1 %v26539_v62  ;;  %11149 = vmatprep.mubr.f32.mxu1 %v11148_v19 }
 0x455   :  { %11165 = vmatprep.subr.mxu1 %v11164_v60  ;;  %22409 = vmatpush1.xpose.msra.mxu0 %v26545_v7  ;;  %v391_v18 = vrot.slane %v377_v33, %v24091_v5  ;;  %v597_v5 = vcombine.high %v595_v17, %v595_v17  ;;  %v11634_v31 = vand.u32 4294901760, %v26637_v44 }
 0x456   :  { %22477 = vmatprep.mubr.f32.mxu0 %v22476_v4  ;;  %22493 = vmatprep.subr.mxu0 %v22492_v12 }
 0x457   :  { %v393_v40 = vcombine.high %v391_v18, %v391_v18  ;;  %v26627_v42 = vand.u32 4294901760, %v597_v5  ;;  %v26644_v27 = vand.u32 4294901760, %v391_v18 }
 0x459   :  { %v26623_v22 = vand.u32 4294901760, %v393_v40  ;;  %v26641_v24 = vsub.f32 %v597_v5, %v26627_v42 }
 0x45b   :  { %11155 = vmatmul.mubr.f32.vlgmr.msra.gmra.mrb[0].mxu1 %v11154_v14  ;;  %22483 = vmatmul.mubr.f32.vlgmr.msra.gmra.mrb[0].mxu0 %v22482_v29  ;;  %v26633_v39 = vsub.f32 %v393_v40, %v26623_v22  ;;  %v22946_v57 = vand.u32 4294901760, %v26641_v24 }
 0x45c   :  { %11171 = vmatpush1.xpose.msra.mxu1 %v11170_v10  ;;  %11235 = vmatprep.mubr.f32.mxu1 %v26513_v46 }
 0x45d   :  { %11244 = vmatprep.subr.mxu1 %v26527_v34  ;;  %22499 = vmatpush1.xpose.msra.mxu0 %v22498_v13  ;;  %v11618_v49 = vand.u32 4294901760, %v26633_v39  ;;  %v22962_v34 = vand.u32 4294901760, %v26647_v51 }
 0x45e   :  { %22563 = vmatprep.mubr.f32.mxu0 %v26517_v48  ;;  %22572 = vmatprep.subr.mxu0 %v26537_v43  ;;  %v11635_v43 = vsub.f32 %v26637_v44, %v11634_v31 }
 0x45f   :  { %v11619_v36 = vsub.f32 %v26633_v39, %v11618_v49 }
 0x463   :  { %11237 = vmatmul.mubr.f32.vlgmr.msra.gmra.mrb[0].mxu1 %v26534_v0  ;;  %22565 = vmatmul.mubr.f32.vlgmr.msra.gmra.mrb[0].mxu0 %v26543_v2 }
 0x464   :  { %11247 = vmatpush1.xpose.msra.mxu1 %v26556_v47  ;;  %11312 = vmatprep.mubr.f32.mxu1 %v26523_v53  ;;  %v26655_v53 = vand.u32 4294901760, %v157_v28  ;;  %v11636_v47 = vand.u32 4294901760, %v11635_v43 }
 0x465   :  { %11321 = vmatprep.subr.mxu1 %v26515_v54  ;;  %22575 = vmatpush1.xpose.msra.mxu0 %v26572_v59 }
 0x466   :  { %22640 = vmatprep.mubr.f32.mxu0 %v26531_v56  ;;  %22649 = vmatprep.subr.mxu0 %v26519_v50  ;;  %v11639_v56 = vsub.f32 %v109_v21, %v26649_v32 }
 0x46b   :  { %11315 = vmatmul.mubr.f32.vlgmr.msra.gmra.mrb[0].mxu1 %v26550_v63  ;;  %22643 = vmatmul.mubr.f32.vlgmr.msra.gmra.mrb[0].mxu0 %v26567_v11  ;;  %v11620_v63 = vand.u32 4294901760, %v11619_v36 }
 0x46c   :  { %11323 = vmatpush1.xpose.msra.mxu1 %v26539_v62  ;;  %11389 = vmatprep.mubr.f32.mxu1 %v11146_v41 }
 0x46d   :  { %11401 = vmatprep.subr.mxu1 %v11162_v3  ;;  %22651 = vmatpush1.xpose.msra.mxu0 %v26545_v7 }
 0x46e   :  { %22717 = vmatprep.mubr.f32.mxu0 %v22474_v45  ;;  %22729 = vmatprep.subr.mxu0 %v22490_v6  ;;  %v22963_v45 = vsub.f32 %v26647_v51, %v22962_v34  ;;  %v11640_v6 = vand.u32 4294901760, %v11639_v56 }
 0x470   :  { %v22964_v11 = vand.u32 4294901760, %v22963_v45  ;;  %v11641_v59 = vsub.f32 %v11639_v56, %v11640_v6 }
 0x472   :  { %v11642_v19 = vand.u32 4294901760, %v11641_v59 }
 0x473   :  { %11393 = vmatmul.mubr.f32.vlgmr.msra.gmra.mrb[0].mxu1 %v11152_v58  ;;  %22721 = vmatmul.mubr.f32.vlgmr.msra.gmra.mrb[0].mxu0 %v22480_v61 }
 0x474   :  { %11405 = vmatpush1.xpose.msra.mxu1 %v11168_v20  ;;  %11469 = vmatprep.mubr.f32.mxu1 %v26513_v46 }
 0x475   :  { %11477 = vmatprep.subr.mxu1 %v26515_v54  ;;  %22733 = vmatpush1.xpose.msra.mxu0 %v22496_v1  ;;  %v26653_v54 = vand.u32 4294901760, %v595_v17 }
 0x476   :  { %22797 = vmatprep.mubr.f32.mxu0 %v26517_v48  ;;  %22805 = vmatprep.subr.mxu0 %v26519_v50  ;;  %v26660_v50 = vsub.f32 %v391_v18, %v26644_v27 }
 0x477   :  { %v22951_v41 = vsub.f32 %v595_v17, %v26653_v54 }
 0x478   :  { %v11624_v3 = vand.u32 4294901760, %v26660_v50 }
 0x479   :  { %v22952_v55 = vand.u32 4294901760, %v22951_v41 }
 0x47b   :  { %11471 = vmatmul.mubr.f32.vlgmr.msra.gmra.mrb[0].mxu1 %v26534_v0  ;;  %22799 = vmatmul.mubr.f32.vlgmr.msra.gmra.mrb[0].mxu0 %v26543_v2  ;;  %v22953_v9 = vsub.f32 %v22951_v41, %v22952_v55 }
 0x47c   :  { %11479 = vmatpush1.xpose.msra.mxu1 %v26539_v62  ;;  %11543 = vmatprep.mubr.f32.mxu1 %v26513_v46  ;;  %v22967_v46 = vsub.f32 %v157_v28, %v26655_v53  ;;  %v22947_v62 = vsub.f32 %v26641_v24, %v22946_v57 }
 0x47d   :  { %11551 = vmatprep.subr.mxu1 %v26625_v35  ;;  %22807 = vmatpush1.xpose.msra.mxu0 %v26545_v7  ;;  %v22954_v20 = vand.u32 4294901760, %v22953_v9 }
 0x47e   :  { %22871 = vmatprep.mubr.f32.mxu0 %v26517_v48  ;;  %22879 = vmatprep.subr.mxu0 %v26629_v37  ;;  %v22948_v52 = vand.u32 4294901760, %v22947_v62  ;;  %v22968_v7 = vand.u32 4294901760, %v22967_v46  ;;  %v11625_v48 = vsub.f32 %v26660_v50, %v11624_v3 }
 0x480   :  { %v22969_v58 = vsub.f32 %v22967_v46, %v22968_v7  ;;  %v11626_v16 = vand.u32 4294901760, %v11625_v48 }
 0x483   :  { %11545 = vmatmul.mubr.f32.vlgmr.msra.gmra.mrb[0].mxu1 %v26534_v0  ;;  %22873 = vmatmul.mubr.f32.vlgmr.msra.gmra.mrb[0].mxu0 %v26543_v2  ;;  %v22970_v0 = vand.u32 4294901760, %v22969_v58  ;;  %v23368_v2 = vld [vmem:[%s26737_s2] ss:$0 sm:$0xff] }
 0x484   :  { %11553 = vmatpush1.xpose.msra.mxu1 %v26649_v32  ;;  %11621 = vmatprep.mubr.f32.mxu1 %v11620_v63 }
 0x485   :  { %11637 = vmatprep.subr.mxu1 %v11636_v47  ;;  %22881 = vmatpush1.xpose.msra.mxu0 %v26655_v53 }
 0x486   :  { %22949 = vmatprep.mubr.f32.mxu0 %v22948_v52  ;;  %22965 = vmatprep.subr.mxu0 %v22964_v11 }
 0x48b   :  { %11627 = vmatmul.mubr.f32.vlgmr.msra.gmra.mrb[0].mxu1 %v11626_v16  ;;  %22955 = vmatmul.mubr.f32.vlgmr.msra.gmra.mrb[0].mxu0 %v22954_v20 }
 0x48c   :  { %11643 = vmatpush1.xpose.msra.mxu1 %v11642_v19  ;;  %11707 = vmatprep.mubr.f32.mxu1 %v26623_v22 }
 0x48d   :  { %11716 = vmatprep.subr.mxu1 %v26637_v44  ;;  %22971 = vmatpush1.xpose.msra.mxu0 %v22970_v0 }
 0x48e   :  { %23035 = vmatprep.mubr.f32.mxu0 %v26627_v42  ;;  %23044 = vmatprep.subr.mxu0 %v26647_v51 }
 0x493   :  { %11709 = vmatmul.mubr.f32.vlgmr.msra.gmra.mrb[0].mxu1 %v26644_v27  ;;  %23037 = vmatmul.mubr.f32.vlgmr.msra.gmra.mrb[0].mxu0 %v26653_v54 }
 0x494   :  { %11719 = vmatpush1.xpose.msra.mxu1 %v11639_v56  ;;  %11784 = vmatprep.mubr.f32.mxu1 %v26633_v39 }
 0x495   :  { %11793 = vmatprep.subr.mxu1 %v26625_v35  ;;  %23047 = vmatpush1.xpose.msra.mxu0 %v22967_v46 }
 0x496   :  { %23112 = vmatprep.mubr.f32.mxu0 %v26641_v24  ;;  %23121 = vmatprep.subr.mxu0 %v26629_v37 }
 0x49b   :  { %11787 = vmatmul.mubr.f32.vlgmr.msra.gmra.mrb[0].mxu1 %v26660_v50  ;;  %23115 = vmatmul.mubr.f32.vlgmr.msra.gmra.mrb[0].mxu0 %v22951_v41 }
 0x49c   :  { %11795 = vmatpush1.xpose.msra.mxu1 %v26649_v32  ;;  %11861 = vmatprep.mubr.f32.mxu1 %v11618_v49 }
 0x49d   :  { %11873 = vmatprep.subr.mxu1 %v11634_v31  ;;  %23123 = vmatpush1.xpose.msra.mxu0 %v26655_v53 }
 0x49e   :  { %23189 = vmatprep.mubr.f32.mxu0 %v22946_v57  ;;  %23201 = vmatprep.subr.mxu0 %v22962_v34 }
 0x4a3   :  { %11865 = vmatmul.mubr.f32.vlgmr.msra.gmra.mrb[0].mxu1 %v11624_v3  ;;  %23193 = vmatmul.mubr.f32.vlgmr.msra.gmra.mrb[0].mxu0 %v22952_v55 }
 0x4a4   :  { %11877 = vmatpush1.xpose.msra.mxu1 %v11640_v6  ;;  %11941 = vmatprep.mubr.f32.mxu1 %v26623_v22 }
 0x4a5   :  { %11949 = vmatprep.subr.mxu1 %v26625_v35  ;;  %23205 = vmatpush1.xpose.msra.mxu0 %v22968_v7 }
 0x4a6   :  { %23269 = vmatprep.mubr.f32.mxu0 %v26627_v42  ;;  %23277 = vmatprep.subr.mxu0 %v26629_v37 }
 0x4ab   :  { %11943 = vmatmul.mubr.f32.vlgmr.msra.gmra.mrb[0].mxu1 %v26644_v27  ;;  %23271 = vmatmul.mubr.f32.vlgmr.msra.gmra.mrb[0].mxu0 %v26653_v54 }
 0x4ac   :  { %11951 = vmatpush1.xpose.msra.mxu1 %v26649_v32  ;;  %12015 = vmatprep.mubr.f32.mxu1 %v26623_v22 }
 0x4ad   :  { %23279 = vmatpush1.xpose.msra.mxu0 %v26655_v53  ;;  %23343 = vmatprep.mubr.f32.mxu0 %v26627_v42 }
 0x4b3   :  { %12017 = vmatmul.mubr.f32.vlgmr.msra.gmra.mrb[0].mxu1 %v26644_v27  ;;  %23345 = vmatmul.mubr.f32.vlgmr.msra.gmra.mrb[0].mxu0 %v26653_v54 }
 0x586   :  { %v12018_v60 = vpop.f32.mrb[0].mxu1  ;;  %v23346_v1 = vpop.f32.mrb[0].mxu0 }
 0x587   :  { %v23369_v61 = vadd.f32 %v23368_v2, %v12018_v60  ;;  %v12020_v4 = vpop.f32.mrb[1].mxu1  ;;  %v23348_v12 = vpop.f32.mrb[1].mxu0 }
 0x589   :  { %v23370_v30 = vadd.f32 %v23369_v61, %v23346_v1 }
 0x58b   :  { %23351 = vst.msk [vmem:[#allocation7] sm:$0x3] %vm23350_vm0, %v23370_v30 }
 0x58c   :  { %24026 = shalt.err (!%p24023_p6)
}
 0x58d   :  { %s24027_s13 = scalar_lea.hbm %s26738_s3, 32 }
 0x58e   :  { %p24028_p7 = scmp.ne.s32.totalorder %s26738_s3, %s24027_s13  ;;  %p24031_p8 = scmp.lt.u32.totalorder %s24027_s13, %s26738_s3 }
 0x590   :  { %p24033_p9 = pnand %p24031_p8, %p24028_p7 }
 0x592   :  { %24036 = shalt.err (!%p24033_p9)
}
 0x593   :  { %23361 = dma.vmem_to_hbm [thread:$0]  %s23359_s10, 32, %s26738_s3, [#allocation4]  }
 0x594   :  { %24041 = dma.done.wait [#allocation4], 32  }
 0x595   :  { %24042 = vsyncadd [#allocation4], 4294967264 }
 0x596   :  { %23365 = vsyncpa [#allocation3], 1 }
 0x597   :  { %23366 = vsyncpa [#allocation6], 1 }
 0x598   :  { %23367 = vsyncpa [#allocation4], 1 }

</bundles_post_ra>
